<compile_context>
chip_gen: v6e
topology: v6e:2x2x1
jax: 0.10.0
libtpu: 0.0.40
codegen_flags: <defaults>
</compile_context>

<pallas_src>
import functools

import jax
import jax.numpy as jnp
from jax.experimental import pallas as pl
from jax.experimental.pallas import tpu as pltpu


def _round_up(x: int, m: int) -> int:
    return ((x + m - 1) // m) * m


# ---------------------------------------------------------------------------
# Pallas kernel: one LSTM timestep per grid iteration.  H-path Chebyshev
# recursion + fused 4-gate projection + gate math; H/C carried in VMEM scratch.
# ---------------------------------------------------------------------------
def _gconv_lstm_seq_kernel(
    L_ref,      # [Np, Np]        rescaled Laplacian (mxu_dtype), resident
    Wh_ref,     # [K, Fg, 4*Fg]   fused H-path Cheb weights (mxu_dtype), resident
    wc_ref,     # [4, Fg]         peephole weights (rows i, f, unused, o), resident
    gx_ref,     # [1, Np, 4*Fg]   X-path gate pre-activations + all biases, streamed
    h0_ref,     # [Np, Fg]        initial hidden state (f32), resident
    c0_ref,     # [Np, Fg]        initial cell state (f32), resident
    hseq_ref,   # [1, Np, Fg]     per-step hidden-state output (f32), streamed
    cfin_ref,   # [Np, Fg]        final cell state output (f32), resident
    h_scr,      # [Np, Fg]        carried hidden state (f32 scratch)
    c_scr,      # [Np, Fg]        carried cell state (f32 scratch)
    *,
    K: int,
    Fg: int,
    mxu_dtype,
):
    t = pl.program_id(0)

    @pl.when(t == 0)
    def _():
        h_scr[...] = h0_ref[...]
        c_scr[...] = c0_ref[...]

    L = L_ref[...]
    H = h_scr[...]
    C = c_scr[...]

    # X-path gate pre-activations (all K terms and all biases already folded).
    G = gx_ref[0]                                       # [Np, 4*Fg] f32

    def gate_mm(term_b, k):
        # term_b already in mxu_dtype; f32 accumulation.
        return jnp.dot(term_b, Wh_ref[k], preferred_element_type=jnp.float32)

    # H-path Chebyshev recursion with per-term accumulation: only T_{k-1} and
    # T_{k-2} stay live, and each term is cast to mxu_dtype exactly once and
    # reused for both the recursion matmul and the gate projection.
    t0_b = H.astype(mxu_dtype)
    G = G + gate_mm(t0_b, 0)
    if K > 1:
        prev_f = jnp.dot(L, t0_b, preferred_element_type=jnp.float32)
        prev_b = prev_f.astype(mxu_dtype)
        G = G + gate_mm(prev_b, 1)
        prevprev_f = H
        for k in range(2, K):
            cur_f = (2.0 * jnp.dot(L, prev_b, preferred_element_type=jnp.float32)
                     - prevprev_f)
            cur_b = cur_f.astype(mxu_dtype)
            G = G + gate_mm(cur_b, k)
            prevprev_f, prev_f, prev_b = prev_f, cur_f, cur_b

    # Lane-aligned gate blocks (each Fg = round_up(F_out,128) wide -> whole
    # lane-tile views, no cross-lane shuffles).  Gate math in f32 on VPU/EUP.
    wc = wc_ref[...]
    gI = G[:, 0 * Fg:1 * Fg]
    gF = G[:, 1 * Fg:2 * Fg]
    gC = G[:, 2 * Fg:3 * Fg]
    gO = G[:, 3 * Fg:4 * Fg]

    I = jax.nn.sigmoid(gI + wc[0:1, :] * C)
    F = jax.nn.sigmoid(gF + wc[1:2, :] * C)
    Tc = jnp.tanh(gC)
    Cn = F * C + I * Tc
    O = jax.nn.sigmoid(gO + wc[3:4, :] * Cn)
    Hn = O * jnp.tanh(Cn)

    # Carry state, stream H_t, keep final C resident.
    h_scr[...] = Hn
    c_scr[...] = Cn
    hseq_ref[0] = Hn
    cfin_ref[...] = Cn


# ---------------------------------------------------------------------------
# Glue: dense rescaled Laplacian (ChebConv.__norm__, normalization='sym').
# NOTE: degree is computed from source endpoints; this matches torch_geometric
# ChebConv 'sym' normalization for a symmetric edge list (both directions
# present, as in the demo graph).
# ---------------------------------------------------------------------------
def build_scaled_laplacian(edge_index, edge_weight, num_nodes, lambda_max=None):
    src = edge_index[0]
    dst = edge_index[1]
    if edge_weight is None:
        edge_weight = jnp.ones(src.shape[0], dtype=jnp.float32)
    if lambda_max is None:
        lambda_max = 2.0  # torch_geometric default for 'sym' normalization

    deg = jnp.zeros((num_nodes,), jnp.float32).at[src].add(edge_weight)
    deg_inv_sqrt = jnp.where(deg > 0, 1.0 / jnp.sqrt(deg), 0.0)
    w_norm = deg_inv_sqrt[src] * edge_weight * deg_inv_sqrt[dst]

    scale = 2.0 / lambda_max
    # Message passing aggregates source messages at the target -> M[dst, src].
    L_hat = jnp.zeros((num_nodes, num_nodes), jnp.float32)
    L_hat = L_hat.at[dst, src].add(-scale * w_norm)
    L_hat = L_hat + jnp.eye(num_nodes, dtype=jnp.float32) * (scale * 1.0 - 1.0)
    return L_hat


# ---------------------------------------------------------------------------
# Parameter construction (glorot / zeros, gate order i,f,c,o along fused axis).
# ---------------------------------------------------------------------------
def init_params(key, in_channels, out_channels, K):
    def glorot(k, shape, fan_in, fan_out):
        lim = jnp.sqrt(6.0 / (fan_in + fan_out))
        return jax.random.uniform(k, shape, jnp.float32, -lim, lim)

    kx, kh, kwi, kwf, kwo = jax.random.split(key, 5)
    Wx, Wh = [], []
    for k in range(K):
        wx_gates = [glorot(jax.random.fold_in(kx, k * 10 + g),
                           (in_channels, out_channels), in_channels, out_channels)
                    for g in range(4)]
        wh_gates = [glorot(jax.random.fold_in(kh, k * 10 + g),
                           (out_channels, out_channels), out_channels, out_channels)
                    for g in range(4)]
        Wx.append(jnp.concatenate(wx_gates, axis=1))
        Wh.append(jnp.concatenate(wh_gates, axis=1))
    WxA = jnp.stack(Wx, axis=0)                      # [K, F_in, 4*F_out]
    WhA = jnp.stack(Wh, axis=0)                      # [K, F_out, 4*F_out]

    bxA = jnp.zeros((1, 4 * out_channels), jnp.float32)   # ChebConv biases
    bhA = jnp.zeros((1, 4 * out_channels), jnp.float32)

    wc = jnp.zeros((4, out_channels), jnp.float32)         # peepholes (row 2 unused)
    wc = wc.at[0].set(glorot(kwi, (out_channels,), 1, out_channels))
    wc = wc.at[1].set(glorot(kwf, (out_channels,), 1, out_channels))
    wc = wc.at[3].set(glorot(kwo, (out_channels,), 1, out_channels))

    bg = jnp.zeros((4, out_channels), jnp.float32)          # b_i, b_f, b_c, b_o
    return dict(WxA=WxA, bxA=bxA, WhA=WhA, bhA=bhA, wc=wc, bg=bg)


def pack_kernel_operands(params, in_channels, out_channels, K, mxu_dtype):
    """Lane-align each gate block to Fg = round_up(F_out, 128), fuse H-path
    weights across K with a zero-padded contraction dim, and fold all biases
    into one [1, 4*Fg] vector."""
    F_out = out_channels
    Fg = _round_up(F_out, 128)

    def pad_gate_cols(w):                       # [..., 4*F_out] -> [..., 4*Fg]
        lead = w.shape[:-1]
        w4 = w.reshape(lead + (4, F_out))
        w4 = jnp.pad(w4, [(0, 0)] * len(lead) + [(0, 0), (0, Fg - F_out)])
        return w4.reshape(lead + (4 * Fg,))

    Wx_pad = pad_gate_cols(params["WxA"])                          # [K, F_in, 4*Fg]
    Wh = pad_gate_cols(params["WhA"])                              # [K, F_out, 4*Fg]
    Wh_pad = jnp.pad(Wh, ((0, 0), (0, Fg - F_out), (0, 0)))        # [K, Fg, 4*Fg]
    bias_full = pad_gate_cols(params["bxA"] + params["bhA"]
                              + params["bg"].reshape(1, 4 * F_out))  # [1, 4*Fg]
    wc_pad = jnp.pad(params["wc"], ((0, 0), (0, Fg - F_out)))       # [4, Fg]
    return Wx_pad, Wh_pad.astype(mxu_dtype), bias_full, wc_pad, Fg


def _precompute_x_path(L_pad, X_seq_pad, Wx_pad, bias_full, K, mxu_dtype):
    """Batched pre-pass: X-path Chebyshev basis + gate projection + folded
    biases for ALL timesteps (X is known up front; only the H path is
    recurrent).  Plain JAX / XLA batched matmuls; mirrors the kernel's MXU
    cast points."""
    def mmL(t):
        return jnp.einsum("ij,tjc->tic", L_pad.astype(mxu_dtype),
                          t.astype(mxu_dtype),
                          preferred_element_type=jnp.float32)

    terms = [X_seq_pad.astype(jnp.float32)]
    if K > 1:
        terms.append(mmL(terms[0]))
    for _ in range(2, K):
        terms.append(2.0 * mmL(terms[-1]) - terms[-2])

    GX = bias_full.reshape(1, 1, -1)
    for k in range(K):
        GX = GX + jnp.einsum("tnc,cd->tnd", terms[k].astype(mxu_dtype),
                             Wx_pad[k].astype(mxu_dtype),
                             preferred_element_type=jnp.float32)
    return GX                                           # [T, Np, 4*Fg] f32


# ---------------------------------------------------------------------------
# Wrapper: sequence-level pallas_call (grid over timesteps, resident L/W,
# carried H/C).
# ---------------------------------------------------------------------------
def gconv_lstm_sequence(params, X_seq, edge_index, edge_weight=None, H=None,
                        C=None, lambda_max=None, *, K, out_channels,
                        use_bf16_mxu=True):
    T, N, F_in = X_seq.shape
    F_out = out_channels
    Np = _round_up(N, 128)
    mxu_dtype = jnp.bfloat16 if use_bf16_mxu else jnp.float32
    mxu_bytes = 2 if use_bf16_mxu else 4

    if H is None:
        H = jnp.zeros((N, F_out), jnp.float32)
    if C is None:
        C = jnp.zeros((N, F_out), jnp.float32)

    # Dense rescaled Laplacian, node-padded (padded rows/cols are zero so they
    # never feed back into valid rows) and cast once for the MXU.
    L = build_scaled_laplacian(edge_index, edge_weight, N, lambda_max)
    L_pad = jnp.pad(L, ((0, Np - N), (0, Np - N))).astype(mxu_dtype)

    Wx_pad, Wh_pad, bias_full, wc_pad, Fg = pack_kernel_operands(
        params, F_in, F_out, K, mxu_dtype)

    X_pad = jnp.pad(X_seq.astype(jnp.float32), ((0, 0), (0, Np - N), (0, 0)))
    GX = _precompute_x_path(L_pad, X_pad, Wx_pad, bias_full, K, mxu_dtype)

    H0 = jnp.pad(H.astype(jnp.float32), ((0, Np - N), (0, Fg - F_out)))
    C0 = jnp.pad(C.astype(jnp.float32), ((0, Np - N), (0, Fg - F_out)))

    # ---- Generation-aware VMEM sizing -------------------------------------
    try:
        vmem_cap = int(getattr(pltpu.get_tpu_info(), "vmem_capacity_bytes",
                               64 * 1024 * 1024))
    except Exception:  # pragma: no cover - conservative fallback off-TPU
        vmem_cap = 64 * 1024 * 1024

    resident = (Np * Np * mxu_bytes                 # L
                + K * Fg * 4 * Fg * mxu_bytes       # Wh
                + 8 * Fg * 4                        # wc (sublane-padded)
                + 2 * Np * Fg * 4                   # H0, C0
                + Np * Fg * 4                       # C_final (resident output)
                + 2 * Np * Fg * 4)                  # H/C scratch
    streamed = 2 * (Np * 4 * Fg * 4) + 2 * (Np * Fg * 4)   # GX_t, H_t (x2 bufs)
    interm = (Np * 4 * Fg * 4                       # G
              + 4 * Np * Fg * 4                     # gate temporaries
              + 3 * Np * Fg * (4 + mxu_bytes))      # live Cheb terms (+cast)
    vmem_needed = resident + streamed + interm

    if vmem_needed > vmem_cap - 16 * 1024 * 1024:
        # TODO(synk): for larger graphs, stage the Cheb basis through HBM with
        # a row-block grid, or go block-sparse via PrefetchScalarGridSpec.
        raise ValueError(
            f"dense-L GConvLSTM kernel needs ~{vmem_needed / 2**20:.1f} MiB VMEM "
            f"(cap {vmem_cap / 2**20:.0f} MiB); graph too large for this "
            f"formulation")
    vmem_limit = int(min(max(2 * vmem_needed, 32 * 1024 * 1024),
                         vmem_cap - 2 * 1024 * 1024))

    # ---- Cost estimate ------------------------------------------------------
    flops_per_step = (2 * Np * Np * Fg * max(K - 1, 0)   # H-path Cheb matmuls
                      + 2 * Np * Fg * (4 * Fg) * K        # H-path gate projection
                      + 30 * Np * Fg)                     # gate elementwise
    bytes_accessed = (Np * Np * mxu_bytes + K * Fg * 4 * Fg * mxu_bytes
                      + 8 * Fg * 4 + 2 * Np * Fg * 4       # resident, once
                      + T * Np * 4 * Fg * 4                # GX streamed
                      + T * Np * Fg * 4 + Np * Fg * 4)     # H_t out + C_final
    cost = pl.CostEstimate(flops=int(T * flops_per_step),
                           transcendentals=int(T * 5 * Np * Fg),
                           bytes_accessed=int(bytes_accessed))

    kernel = functools.partial(_gconv_lstm_seq_kernel, K=K, Fg=Fg,
                               mxu_dtype=mxu_dtype)

    grid_spec = pltpu.PrefetchScalarGridSpec(
        num_scalar_prefetch=0,
        grid=(T,),
        in_specs=[
            pl.BlockSpec((Np, Np), lambda t: (0, 0)),            # L (resident)
            pl.BlockSpec((K, Fg, 4 * Fg), lambda t: (0, 0, 0)),  # Wh (resident)
            pl.BlockSpec((4, Fg), lambda t: (0, 0)),             # wc (resident)
            pl.BlockSpec((1, Np, 4 * Fg), lambda t: (t, 0, 0)),  # GX_t (streamed)
            pl.BlockSpec((Np, Fg), lambda t: (0, 0)),            # H0 (resident)
            pl.BlockSpec((Np, Fg), lambda t: (0, 0)),            # C0 (resident)
        ],
        out_specs=[
            pl.BlockSpec((1, Np, Fg), lambda t: (t, 0, 0)),      # H_t (streamed)
            pl.BlockSpec((Np, Fg), lambda t: (0, 0)),            # C_final (resident)
        ],
        scratch_shapes=[
            pltpu.VMEM((Np, Fg), jnp.float32),                   # carried H
            pltpu.VMEM((Np, Fg), jnp.float32),                   # carried C
        ],
    )

    hseq_p, cfin_p = pl.pallas_call(
        kernel,
        out_shape=(jax.ShapeDtypeStruct((T, Np, Fg), jnp.float32),
                   jax.ShapeDtypeStruct((Np, Fg), jnp.float32)),
        grid_spec=grid_spec,
        compiler_params=pltpu.CompilerParams(
            dimension_semantics=("arbitrary",),   # recurrent over time
            vmem_limit_bytes=vmem_limit),
        cost_estimate=cost,
    )(L_pad, Wh_pad, wc_pad, GX, H0, C0)

    H_seq = hseq_p[:, :N, :F_out]
    C_T = cfin_p[:N, :F_out]
    return H_seq, (H_seq[-1], C_T)


def gconv_lstm_forward(params, X, edge_index, edge_weight=None, H=None, C=None,
                       lambda_max=None, *, K, out_channels, use_bf16_mxu=True):
    """Single-cell-step forward, matching the PyTorch module's signature."""
    _, (Hn, Cn) = gconv_lstm_sequence(
        params, X[None], edge_index, edge_weight, H=H, C=C,
        lambda_max=lambda_max, K=K, out_channels=out_channels,
        use_bf16_mxu=use_bf16_mxu)
    return Hn, Cn


# ---------------------------------------------------------------------------
# Pure-JAX reference (unfused, same math / structure as the PyTorch module).
# `mxu_dtype` mirrors the bf16-operand / f32-accumulate cast points.
# ---------------------------------------------------------------------------
def gconv_lstm_reference_step(params, X, L, H, C, *, K, out_channels,
                              mxu_dtype=jnp.float32):
    F_out = out_channels

    def mm(a, b):
        return jnp.dot(a.astype(mxu_dtype), b.astype(mxu_dtype),
                       preferred_element_type=jnp.float32)

    def cheb(Z):
        terms = [Z.astype(jnp.float32)]
        if K > 1:
            terms.append(mm(L, Z))
        for _ in range(2, K):
            terms.append(2.0 * mm(L, terms[-1]) - terms[-2])
        return terms

    Tx, Th = cheb(X), cheb(H)
    G = sum(mm(Tx[k], params["WxA"][k]) for k in range(K))
    G = G + sum(mm(Th[k], params["WhA"][k]) for k in range(K))
    G = G + params["bxA"] + params["bhA"]
    wc, bg = params["wc"], params["bg"]
    gI, gF, gC, gO = (G[:, i * F_out:(i + 1) * F_out] for i in range(4))
    I = jax.nn.sigmoid(gI + wc[0:1] * C + bg[0:1])
    F = jax.nn.sigmoid(gF + wc[1:2] * C + bg[1:2])
    Tt = jnp.tanh(gC + bg[2:3])
    Cn = F * C + I * Tt
    O = jax.nn.sigmoid(gO + wc[3:4] * Cn + bg[3:4])
    Hn = O * jnp.tanh(Cn)
    return Hn, Cn


def gconv_lstm_reference_sequence(params, X_seq, edge_index, edge_weight=None,
                                  H=None, C=None, lambda_max=None, *,
                                  K, out_channels, mxu_dtype=jnp.float32):
    T, N, _ = X_seq.shape
    if H is None:
        H = jnp.zeros((N, out_channels), jnp.float32)
    if C is None:
        C = jnp.zeros((N, out_channels), jnp.float32)
    L = build_scaled_laplacian(edge_index, edge_weight, N, lambda_max)
    Hs = []
    for t in range(T):
        H, C = gconv_lstm_reference_step(params, X_seq[t], L, H, C, K=K,
                                         out_channels=out_channels,
                                         mxu_dtype=mxu_dtype)
        Hs.append(H)
    return jnp.stack(Hs), (H, C)


if __name__ == "__main__":
    N = 16       # graph nodes
    IN_CH = 4    # in_channels
    OUT_CH = 32  # out_channels
    K = 3        # Chebyshev filter size
    T = 8        # timesteps for the sequence-level kernel

    key = jax.random.PRNGKey(0)
    k_params, k_x, k_w, k_h, k_c = jax.random.split(key, 5)
    params = init_params(k_params, IN_CH, OUT_CH, K)

    X_seq = jax.random.normal(k_x, (T, N, IN_CH), jnp.float32)

    # Undirected ring graph with positive edge weights.
    src = jnp.arange(N, dtype=jnp.int32)
    dst = (src + 1) % N
    edge_index = jnp.stack(
        [jnp.concatenate([src, dst]), jnp.concatenate([dst, src])], axis=0)
    edge_weight = jax.random.uniform(k_w, (edge_index.shape[1],), jnp.float32,
                                     minval=0.5, maxval=1.5)

    H0 = jax.random.normal(k_h, (N, OUT_CH), jnp.float32) * 0.1
    C0 = jax.random.normal(k_c, (N, OUT_CH), jnp.float32) * 0.1
    L_ref = build_scaled_laplacian(edge_index, edge_weight, N, None)

    # 1) f32-MXU path, single cell step (module semantics), tight check.
    Hn32, Cn32 = gconv_lstm_forward(params, X_seq[0], edge_index, edge_weight,
                                    H=H0, C=C0, K=K, out_channels=OUT_CH,
                                    use_bf16_mxu=False)
    jax.block_until_ready((Hn32, Cn32))
    Hr32, Cr32 = gconv_lstm_reference_step(params, X_seq[0], L_ref, H0, C0,
                                           K=K, out_channels=OUT_CH)
    assert jnp.allclose(Hn32, Hr32, atol=1e-4, rtol=1e-4), "H mismatch (f32, step)"
    assert jnp.allclose(Cn32, Cr32, atol=1e-4, rtol=1e-4), "C mismatch (f32, step)"

    # 2) f32-MXU path, full T-step sequence in ONE pallas_call (resident L/W,
    #    carried H/C).  Tolerance allows tiny fp-ordering drift over 8 steps.
    Hseq32, (HT32, CT32) = gconv_lstm_sequence(params, X_seq, edge_index,
                                               edge_weight, H=H0, C=C0, K=K,
                                               out_channels=OUT_CH,
                                               use_bf16_mxu=False)
    jax.block_until_ready((Hseq32, CT32))
    Hseq_r, (HT_r, CT_r) = gconv_lstm_reference_sequence(
        params, X_seq, edge_index, edge_weight, H=H0, C=C0, K=K,
        out_channels=OUT_CH)
    assert jnp.allclose(Hseq32, Hseq_r, atol=2e-3, rtol=2e-3), "H mismatch (f32, seq)"
    assert jnp.allclose(CT32, CT_r, atol=2e-3, rtol=2e-3), "C mismatch (f32, seq)"

    # 3) bf16-MXU fast path, single step vs a bf16-matched reference.
    Hnb, Cnb = gconv_lstm_forward(params, X_seq[0], edge_index, edge_weight,
                                  H=H0, C=C0, K=K, out_channels=OUT_CH,
                                  use_bf16_mxu=True)
    jax.block_until_ready((Hnb, Cnb))
    Hrb, Crb = gconv_lstm_reference_step(params, X_seq[0], L_ref, H0, C0,
                                         K=K, out_channels=OUT_CH,
                                         mxu_dtype=jnp.bfloat16)
    assert jnp.allclose(Hnb, Hrb, atol=2e-3, rtol=2e-3), "H mismatch (bf16, step)"
    assert jnp.allclose(Cnb, Crb, atol=2e-3, rtol=2e-3), "C mismatch (bf16, step)"

    # 4) bf16-MXU fast path, full sequence: run + finiteness sanity (bf16 error
    #    compounds through the recurrence, so no tight assert here).
    Hseqb, (HTb, CTb) = gconv_lstm_sequence(params, X_seq, edge_index,
                                            edge_weight, H=H0, C=C0, K=K,
                                            out_channels=OUT_CH,
                                            use_bf16_mxu=True)
    jax.block_until_ready((Hseqb, CTb))
    assert bool(jnp.all(jnp.isfinite(Hseqb))) and bool(jnp.all(jnp.isfinite(CTb)))

    # 5) Default H=None / C=None path (zero init), as in the module.
    Hn0, Cn0 = gconv_lstm_forward(params, X_seq[0], edge_index, edge_weight,
                                  K=K, out_channels=OUT_CH)
    jax.block_until_ready((Hn0, Cn0))

    print("KERNEL_OK")
</pallas_src>

<mosaic_0001>
module attributes {stable_mosaic.version = 11 : i64} {
  func.func @_gconv_lstm_seq_kernel(%arg0: i32, %arg1: memref<128x128xf32, #tpu.memory_space<vmem>>, %arg2: memref<3x128x512xf32, #tpu.memory_space<vmem>>, %arg3: memref<4x128xf32, #tpu.memory_space<vmem>>, %arg4: memref<1x128x512xf32, #tpu.memory_space<vmem>>, %arg5: memref<128x128xf32, #tpu.memory_space<vmem>>, %arg6: memref<128x128xf32, #tpu.memory_space<vmem>>, %arg7: memref<1x128x128xf32, #tpu.memory_space<vmem>>, %arg8: memref<128x128xf32, #tpu.memory_space<vmem>>, %arg9: memref<128x128xf32, #tpu.memory_space<vmem>>, %arg10: memref<128x128xf32, #tpu.memory_space<vmem>>) attributes {dimension_semantics = [#tpu.dimension_semantics<arbitrary>], iteration_bounds = array<i64: 1>, scalar_prefetch = 0 : i64, scratch_operands = 2 : i64, tpu.core_type = #tpu.core_type<tc>, window_params = [{pipeline_mode = #tpu.pipeline_mode<synchronous>, transform_indices = @transform_0, window_bounds = array<i64: 128, 128>}, {pipeline_mode = #tpu.pipeline_mode<synchronous>, transform_indices = @transform_1, window_bounds = array<i64: 3, 128, 512>}, {pipeline_mode = #tpu.pipeline_mode<synchronous>, transform_indices = @transform_2, window_bounds = array<i64: 4, 128>}, {transform_indices = @transform_3, window_bounds = array<i64: 1, 128, 512>}, {pipeline_mode = #tpu.pipeline_mode<synchronous>, transform_indices = @transform_4, window_bounds = array<i64: 128, 128>}, {pipeline_mode = #tpu.pipeline_mode<synchronous>, transform_indices = @transform_5, window_bounds = array<i64: 128, 128>}, {transform_indices = @transform_6, window_bounds = array<i64: 1, 128, 128>}, {pipeline_mode = #tpu.pipeline_mode<synchronous>, transform_indices = @transform_7, window_bounds = array<i64: 128, 128>}]} {
    %c0_i32 = arith.constant 0 : i32
    %0 = arith.cmpi eq, %arg0, %c0_i32 : i32
    %1 = arith.extui %0 : i1 to i32
    %c0_i32_0 = arith.constant 0 : i32
    %2 = arith.cmpi ne, %1, %c0_i32_0 : i32
    scf.if %2 {
      %c0_35 = arith.constant 0 : index
      %c0_36 = arith.constant 0 : index
      %69 = vector.load %arg5[%c0_35, %c0_36] : memref<128x128xf32, #tpu.memory_space<vmem>>, vector<128x128xf32>
      %c0_37 = arith.constant 0 : index
      %c0_38 = arith.constant 0 : index
      %70 = vector.load %arg9[%c0_37, %c0_38] : memref<128x128xf32, #tpu.memory_space<vmem>>, vector<128x128xf32>
      tpu.vector_store %arg9[%c0_37, %c0_38], %69 {strides = array<i32>} : memref<128x128xf32, #tpu.memory_space<vmem>>, vector<128x128xf32>,
      %c0_39 = arith.constant 0 : index
      %c0_40 = arith.constant 0 : index
      %71 = vector.load %arg6[%c0_39, %c0_40] : memref<128x128xf32, #tpu.memory_space<vmem>>, vector<128x128xf32>
      %c0_41 = arith.constant 0 : index
      %c0_42 = arith.constant 0 : index
      %72 = vector.load %arg10[%c0_41, %c0_42] : memref<128x128xf32, #tpu.memory_space<vmem>>, vector<128x128xf32>
      tpu.vector_store %arg10[%c0_41, %c0_42], %71 {strides = array<i32>} : memref<128x128xf32, #tpu.memory_space<vmem>>, vector<128x128xf32>,
    } else {
    }
    %c0 = arith.constant 0 : index
    %c0_1 = arith.constant 0 : index
    %3 = vector.load %arg1[%c0, %c0_1] : memref<128x128xf32, #tpu.memory_space<vmem>>, vector<128x128xf32>
    %c0_2 = arith.constant 0 : index
    %c0_3 = arith.constant 0 : index
    %4 = vector.load %arg9[%c0_2, %c0_3] : memref<128x128xf32, #tpu.memory_space<vmem>>, vector<128x128xf32>
    %c0_4 = arith.constant 0 : index
    %c0_5 = arith.constant 0 : index
    %5 = vector.load %arg10[%c0_4, %c0_5] : memref<128x128xf32, #tpu.memory_space<vmem>>, vector<128x128xf32>
    %c0_6 = arith.constant 0 : index
    %c0_7 = arith.constant 0 : index
    %c0_8 = arith.constant 0 : index
    %6 = vector.load %arg4[%c0_6, %c0_7, %c0_8] : memref<1x128x512xf32, #tpu.memory_space<vmem>>, vector<1x128x512xf32>
    %7 = vector.shape_cast %6 : vector<1x128x512xf32> to vector<128x512xf32>
    %c0_9 = arith.constant 0 : index
    %c0_10 = arith.constant 0 : index
    %c0_11 = arith.constant 0 : index
    %8 = vector.load %arg2[%c0_9, %c0_10, %c0_11] : memref<3x128x512xf32, #tpu.memory_space<vmem>>, vector<1x128x512xf32>
    %9 = vector.shape_cast %8 : vector<1x128x512xf32> to vector<128x512xf32>
    %cst = arith.constant dense<0.000000e+00> : vector<128x512xf32>
    %10 = tpu.matmul %4, %9, %cst {dimension_numbers = #tpu.dot_dimension_numbers<[1], [0], [0], [1], [0, 0, 1, 1], [], []>} : vector<128x128xf32>, vector<128x512xf32>, vector<128x512xf32> -> vector<128x512xf32>
    %11 = arith.addf %7, %10 : vector<128x512xf32>
    %cst_12 = arith.constant dense<0.000000e+00> : vector<128x128xf32>
    %12 = tpu.matmul %3, %4, %cst_12 {dimension_numbers = #tpu.dot_dimension_numbers<[1], [0], [0], [1], [0, 0, 1, 1], [], []>} : vector<128x128xf32>, vector<128x128xf32>, vector<128x128xf32> -> vector<128x128xf32>
    %c1 = arith.constant 1 : index
    %c0_13 = arith.constant 0 : index
    %c0_14 = arith.constant 0 : index
    %13 = vector.load %arg2[%c1, %c0_13, %c0_14] : memref<3x128x512xf32, #tpu.memory_space<vmem>>, vector<1x128x512xf32>
    %14 = vector.shape_cast %13 : vector<1x128x512xf32> to vector<128x512xf32>
    %cst_15 = arith.constant dense<0.000000e+00> : vector<128x512xf32>
    %15 = tpu.matmul %12, %14, %cst_15 {dimension_numbers = #tpu.dot_dimension_numbers<[1], [0], [0], [1], [0, 0, 1, 1], [], []>} : vector<128x128xf32>, vector<128x512xf32>, vector<128x512xf32> -> vector<128x512xf32>
    %16 = arith.addf %11, %15 : vector<128x512xf32>
    %cst_16 = arith.constant dense<0.000000e+00> : vector<128x128xf32>
    %17 = tpu.matmul %3, %12, %cst_16 {dimension_numbers = #tpu.dot_dimension_numbers<[1], [0], [0], [1], [0, 0, 1, 1], [], []>} : vector<128x128xf32>, vector<128x128xf32>, vector<128x128xf32> -> vector<128x128xf32>
    %cst_17 = arith.constant 2.000000e+00 : f32
    %18 = vector.broadcast %cst_17 : f32 to vector<128x128xf32>
    %19 = arith.mulf %18, %17 : vector<128x128xf32>
    %20 = arith.subf %19, %4 : vector<128x128xf32>
    %c2 = arith.constant 2 : index
    %c0_18 = arith.constant 0 : index
    %c0_19 = arith.constant 0 : index
    %21 = vector.load %arg2[%c2, %c0_18, %c0_19] : memref<3x128x512xf32, #tpu.memory_space<vmem>>, vector<1x128x512xf32>
    %22 = vector.shape_cast %21 : vector<1x128x512xf32> to vector<128x512xf32>
    %cst_20 = arith.constant dense<0.000000e+00> : vector<128x512xf32>
    %23 = tpu.matmul %20, %22, %cst_20 {dimension_numbers = #tpu.dot_dimension_numbers<[1], [0], [0], [1], [0, 0, 1, 1], [], []>} : vector<128x128xf32>, vector<128x512xf32>, vector<128x512xf32> -> vector<128x512xf32>
    %24 = arith.addf %16, %23 : vector<128x512xf32>
    %c0_21 = arith.constant 0 : index
    %c0_22 = arith.constant 0 : index
    %25 = vector.load %arg3[%c0_21, %c0_22] : memref<4x128xf32, #tpu.memory_space<vmem>>, vector<4x128xf32>
    %26 = vector.extract_strided_slice %24 {offsets = [0, 0], sizes = [128, 128], strides = [1, 1]} : vector<128x512xf32> to vector<128x128xf32>
    %27 = vector.extract_strided_slice %24 {offsets = [0, 128], sizes = [128, 128], strides = [1, 1]} : vector<128x512xf32> to vector<128x128xf32>
    %28 = vector.extract_strided_slice %24 {offsets = [0, 256], sizes = [128, 128], strides = [1, 1]} : vector<128x512xf32> to vector<128x128xf32>
    %29 = vector.extract_strided_slice %24 {offsets = [0, 384], sizes = [128, 128], strides = [1, 1]} : vector<128x512xf32> to vector<128x128xf32>
    %30 = vector.extract_strided_slice %25 {offsets = [0, 0], sizes = [1, 128], strides = [1, 1]} : vector<4x128xf32> to vector<1x128xf32>
    %31 = vector.broadcast %30 : vector<1x128xf32> to vector<128x128xf32>
    %32 = arith.mulf %31, %5 : vector<128x128xf32>
    %33 = arith.addf %26, %32 : vector<128x128xf32>
    %34 = arith.negf %33 : vector<128x128xf32>
    %35 = math.exp %34 : vector<128x128xf32>
    %cst_23 = arith.constant 1.000000e+00 : f32
    %36 = vector.broadcast %cst_23 : f32 to vector<128x128xf32>
    %37 = arith.addf %36, %35 : vector<128x128xf32>
    %38 = arith.divf %36, %37 : vector<128x128xf32>
    %39 = vector.extract_strided_slice %25 {offsets = [1, 0], sizes = [1, 128], strides = [1, 1]} : vector<4x128xf32> to vector<1x128xf32>
    %40 = vector.broadcast %39 : vector<1x128xf32> to vector<128x128xf32>
    %41 = arith.mulf %40, %5 : vector<128x128xf32>
    %42 = arith.addf %27, %41 : vector<128x128xf32>
    %43 = arith.negf %42 : vector<128x128xf32>
    %44 = math.exp %43 : vector<128x128xf32>
    %cst_24 = arith.constant 1.000000e+00 : f32
    %45 = vector.broadcast %cst_24 : f32 to vector<128x128xf32>
    %46 = arith.addf %45, %44 : vector<128x128xf32>
    %47 = arith.divf %45, %46 : vector<128x128xf32>
    %48 = math.tanh %28 : vector<128x128xf32>
    %49 = arith.mulf %47, %5 : vector<128x128xf32>
    %50 = arith.mulf %38, %48 : vector<128x128xf32>
    %51 = arith.addf %49, %50 : vector<128x128xf32>
    %52 = vector.extract_strided_slice %25 {offsets = [3, 0], sizes = [1, 128], strides = [1, 1]} : vector<4x128xf32> to vector<1x128xf32>
    %53 = vector.broadcast %52 : vector<1x128xf32> to vector<128x128xf32>
    %54 = arith.mulf %53, %51 : vector<128x128xf32>
    %55 = arith.addf %29, %54 : vector<128x128xf32>
    %56 = arith.negf %55 : vector<128x128xf32>
    %57 = math.exp %56 : vector<128x128xf32>
    %cst_25 = arith.constant 1.000000e+00 : f32
    %58 = vector.broadcast %cst_25 : f32 to vector<128x128xf32>
    %59 = arith.addf %58, %57 : vector<128x128xf32>
    %60 = arith.divf %58, %59 : vector<128x128xf32>
    %61 = math.tanh %51 : vector<128x128xf32>
    %62 = arith.mulf %60, %61 : vector<128x128xf32>
    %c0_26 = arith.constant 0 : index
    %c0_27 = arith.constant 0 : index
    %63 = vector.load %arg9[%c0_26, %c0_27] : memref<128x128xf32, #tpu.memory_space<vmem>>, vector<128x128xf32>
    tpu.vector_store %arg9[%c0_26, %c0_27], %62 {strides = array<i32>} : memref<128x128xf32, #tpu.memory_space<vmem>>, vector<128x128xf32>,
    %c0_28 = arith.constant 0 : index
    %c0_29 = arith.constant 0 : index
    %64 = vector.load %arg10[%c0_28, %c0_29] : memref<128x128xf32, #tpu.memory_space<vmem>>, vector<128x128xf32>
    tpu.vector_store %arg10[%c0_28, %c0_29], %51 {strides = array<i32>} : memref<128x128xf32, #tpu.memory_space<vmem>>, vector<128x128xf32>,
    %c0_30 = arith.constant 0 : index
    %c0_31 = arith.constant 0 : index
    %c0_32 = arith.constant 0 : index
    %65 = vector.load %arg7[%c0_30, %c0_31, %c0_32] : memref<1x128x128xf32, #tpu.memory_space<vmem>>, vector<1x128x128xf32>
    %66 = vector.shape_cast %65 : vector<1x128x128xf32> to vector<128x128xf32>
    %67 = vector.shape_cast %62 : vector<128x128xf32> to vector<1x128x128xf32>
    tpu.vector_store %arg7[%c0_30, %c0_31, %c0_32], %67 {strides = array<i32>} : memref<1x128x128xf32, #tpu.memory_space<vmem>>, vector<1x128x128xf32>,
    %c0_33 = arith.constant 0 : index
    %c0_34 = arith.constant 0 : index
    %68 = vector.load %arg8[%c0_33, %c0_34] : memref<128x128xf32, #tpu.memory_space<vmem>>, vector<128x128xf32>
    tpu.vector_store %arg8[%c0_33, %c0_34], %51 {strides = array<i32>} : memref<128x128xf32, #tpu.memory_space<vmem>>, vector<128x128xf32>,
    return
  }
  func.func @transform_0(%arg0: i32) -> (i32, i32) {
    %c0_i32 = arith.constant 0 : i32
    %c0_i32_0 = arith.constant 0 : i32
    %c0_i32_1 = arith.constant 0 : i32
    return %c0_i32, %c0_i32_0 : i32, i32
  }
  func.func @transform_1(%arg0: i32) -> (i32, i32, i32) {
    %c0_i32 = arith.constant 0 : i32
    %c0_i32_0 = arith.constant 0 : i32
    %c0_i32_1 = arith.constant 0 : i32
    %c0_i32_2 = arith.constant 0 : i32
    return %c0_i32, %c0_i32_0, %c0_i32_1 : i32, i32, i32
  }
  func.func @transform_2(%arg0: i32) -> (i32, i32) {
    %c0_i32 = arith.constant 0 : i32
    %c0_i32_0 = arith.constant 0 : i32
    %c0_i32_1 = arith.constant 0 : i32
    return %c0_i32, %c0_i32_0 : i32, i32
  }
  func.func @transform_3(%arg0: i32) -> (i32, i32, i32) {
    %c0_i32 = arith.constant 0 : i32
    %c0_i32_0 = arith.constant 0 : i32
    %c0_i32_1 = arith.constant 0 : i32
    return %arg0, %c0_i32, %c0_i32_0 : i32, i32, i32
  }
  func.func @transform_4(%arg0: i32) -> (i32, i32) {
    %c0_i32 = arith.constant 0 : i32
    %c0_i32_0 = arith.constant 0 : i32
    %c0_i32_1 = arith.constant 0 : i32
    return %c0_i32, %c0_i32_0 : i32, i32
  }
  func.func @transform_5(%arg0: i32) -> (i32, i32) {
    %c0_i32 = arith.constant 0 : i32
    %c0_i32_0 = arith.constant 0 : i32
    %c0_i32_1 = arith.constant 0 : i32
    return %c0_i32, %c0_i32_0 : i32, i32
  }
  func.func @transform_6(%arg0: i32) -> (i32, i32, i32) {
    %c0_i32 = arith.constant 0 : i32
    %c0_i32_0 = arith.constant 0 : i32
    %c0_i32_1 = arith.constant 0 : i32
    return %arg0, %c0_i32, %c0_i32_0 : i32, i32, i32
  }
  func.func @transform_7(%arg0: i32) -> (i32, i32) {
    %c0_i32 = arith.constant 0 : i32
    %c0_i32_0 = arith.constant 0 : i32
    %c0_i32_1 = arith.constant 0 : i32
    return %c0_i32, %c0_i32_0 : i32, i32
  }
}

</mosaic_0001>

<bundles_post_ra>
// kernel: tpu_custom_call.1
= control target key start
LH: loop header
LB: loop body
LE: loop exit
PB: predicated region body
PF: predicated region fallthrough
CT: control target
= control target key end

     0   :  { %13 = vsyncpa [#allocation5], 0  ;;  %s4276_s0 = inlined_call_operand.hbm [shape: f32[128,128], index: 0, kind: input, shape index: {}]   ;;  %s4277_s1 = inlined_call_operand.hbm [shape: f32[3,128,512], index: 1, kind: input, shape index: {}]   ;;  %s4278_s2 = inlined_call_operand.hbm [shape: f32[4,128], index: 2, kind: input, shape index: {}]   ;;  %s4279_s3 = inlined_call_operand.hbm [shape: f32[1,128,512], index: 3, kind: input, shape index: {}]   ;;  %s4280_s4 = inlined_call_operand.hbm [shape: f32[128,128], index: 4, kind: input, shape index: {}]   ;;  %s4281_s5 = inlined_call_operand.hbm [shape: f32[128,128], index: 5, kind: input, shape index: {}]   ;;  %s4282_s6 = inlined_call_operand.hbm [shape: f32[1,128,128], index: 6, kind: output, shape index: {0}]   ;;  %s4283_s7 = inlined_call_operand.hbm [shape: f32[128,128], index: 7, kind: output, shape index: {1}]  }
   0x1   :  { %14 = vsyncpa [#allocation8], 0 }
   0x2   :  { %15 = vsyncpa [#allocation11], 0 }
   0x3   :  { %16 = vsyncpa [#allocation14], 0 }
   0x4   :  { %17 = vsyncpa [#allocation6], 0 }
   0x5   :  { %18 = vsyncpa [#allocation17], 0  ;;  %s3235_s24 = smov [#allocation7]  }
   0x6   :  { %s36_s25 = sshll.u32 %s3235_s24, 4  ;;  %s37_s25 = int_to_ptr.vmem [resolvable:$true] %s36_s25 }
   0x7   :  { %s3071_s26 = scalar_lea.vmem %s37_s25, 24576  ;;  %p3076_p1 = scmp.lt.s32.totalorder %s37_s25, %s37_s25 }
   0x8   :  { %p3072_p0 = scmp.ne.s32.totalorder %s37_s25, %s3071_s26  ;;  %p3077_p2 = scmp.lt.s32.totalorder %s3071_s26, %s3071_s26 }
   0xa   :  { %p3078_p3 = por %p3077_p2, %p3076_p1 }
   0xc   :  { %p3079_p4 = pnand %p3078_p3, %p3072_p0 }
   0xe   :  { %3082 = shalt.err (!%p3079_p4)
}
   0xf   :  { %s3236_s27 = smov 512   ;;  %s3237_s28 = smov 32  }
  0x10   :  { %42 = dma.hbm_to_vmem [thread:$0]  %s4277_s1, 24576, %s37_s25, [#allocation8], %s3236_s27, %s3236_s27, %s3237_s28  }
  0x11   :  { %s3238_s8 = smov [#allocation10]   ;;  %s3239_s10 = smov [#allocation4]  }
  0x12   :  { %s58_s9 = sshll.u32 %s3238_s8, 4  ;;  %s24_s11 = sshll.u32 %s3239_s10, 4  ;;  %s59_s9 = int_to_ptr.vmem [resolvable:$true] %s58_s9  ;;  %s25_s11 = int_to_ptr.vmem [resolvable:$true] %s24_s11 }
  0x13   :  { %s3091_s12 = scalar_lea.vmem %s59_s9, 8192  ;;  %p3096_p6 = scmp.lt.s32.totalorder %s59_s9, %s59_s9 }
  0x14   :  { %p3092_p5 = scmp.ne.s32.totalorder %s59_s9, %s3091_s12  ;;  %p3097_p7 = scmp.lt.s32.totalorder %s3091_s12, %s3091_s12 }
  0x16   :  { %p3098_p8 = por %p3097_p7, %p3096_p6 }
  0x18   :  { %p3099_p9 = pnand %p3098_p8, %p3092_p5 }
  0x1a   :  { %3102 = shalt.err (!%p3099_p9)
}
  0x1b   :  { %64 = dma.hbm_to_vmem [thread:$0]  %s4279_s3, 8192, %s59_s9, [#allocation11], %s3236_s27, %s3236_s27, %s3237_s28  }
  0x1c   :  { %s3111_s15 = scalar_lea.vmem %s25_s11, 2048  ;;  %p3116_p11 = scmp.lt.s32.totalorder %s25_s11, %s25_s11 }
  0x1d   :  { %p3112_p10 = scmp.ne.s32.totalorder %s25_s11, %s3111_s15  ;;  %p3117_p12 = scmp.lt.s32.totalorder %s3111_s15, %s3111_s15 }
  0x1f   :  { %p3118_p13 = por %p3117_p12, %p3116_p11 }
  0x21   :  { %p3119_p0 = pnand %p3118_p13, %p3112_p10 }
  0x23   :  { %3122 = shalt.err (!%p3119_p0)
}
  0x24   :  { %s3240_s1 = smov 128   ;;  %s3241_s16 = smov 8  }
  0x25   :  { %30 = dma.hbm_to_vmem [thread:$0]  %s4276_s0, 2048, %s25_s11, [#allocation5], %s3240_s1, %s3240_s1, %s3241_s16  }
  0x26   :  { %s3242_s19 = smov [#allocation9]   ;;  %s3243_s3 = smov [#allocation12]  }
  0x27   :  { %s49_s20 = sshll.u32 %s3242_s19, 4  ;;  %s70_s21 = sshll.u32 %s3243_s3, 4  ;;  %s50_s20 = int_to_ptr.vmem [resolvable:$true] %s49_s20  ;;  %s71_s21 = int_to_ptr.vmem [resolvable:$true] %s70_s21 }
  0x28   :  { %s3131_s22 = scalar_lea.vmem %s50_s20, 64  ;;  %p3136_p2 = scmp.lt.s32.totalorder %s50_s20, %s50_s20 }
  0x29   :  { %p3132_p1 = scmp.ne.s32.totalorder %s50_s20, %s3131_s22  ;;  %p3137_p3 = scmp.lt.s32.totalorder %s3131_s22, %s3131_s22 }
  0x2b   :  { %p3138_p4 = por %p3137_p3, %p3136_p2 }
  0x2d   :  { %p3139_p5 = pnand %p3138_p4, %p3132_p1 }
  0x2f   :  { %3142 = shalt.err (!%p3139_p5)
}
  0x30   :  { %52 = dma.hbm_to_vmem [thread:$0]  %s4278_s2, 64, %s50_s20, [#allocation8]  }
  0x31   :  { %s3151_s25 = scalar_lea.vmem %s71_s21, 2048  ;;  %p3156_p7 = scmp.lt.s32.totalorder %s71_s21, %s71_s21 }
  0x32   :  { %p3152_p6 = scmp.ne.s32.totalorder %s71_s21, %s3151_s25  ;;  %p3157_p8 = scmp.lt.s32.totalorder %s3151_s25, %s3151_s25 }
  0x34   :  { %p3158_p9 = por %p3157_p8, %p3156_p7 }
  0x36   :  { %p3159_p10 = pnand %p3158_p9, %p3152_p6 }
  0x38   :  { %3162 = shalt.err (!%p3159_p10)
}
  0x39   :  { %76 = dma.hbm_to_vmem [thread:$0]  %s4280_s4, 2048, %s71_s21, [#allocation11], %s3240_s1, %s3240_s1, %s3241_s16  }
  0x3a   :  { %s3244_s27 = smov [#allocation13]  }
  0x3b   :  { %s82_s28 = sshll.u32 %s3244_s27, 4  ;;  %s83_s28 = int_to_ptr.vmem [resolvable:$true] %s82_s28 }
  0x3c   :  { %s3171_s29 = scalar_lea.vmem %s83_s28, 2048  ;;  %p3176_p12 = scmp.lt.s32.totalorder %s83_s28, %s83_s28 }
  0x3d   :  { %p3172_p11 = scmp.ne.s32.totalorder %s83_s28, %s3171_s29  ;;  %p3177_p13 = scmp.lt.s32.totalorder %s3171_s29, %s3171_s29 }
  0x3f   :  { %p3178_p0 = por %p3177_p13, %p3176_p12 }
  0x41   :  { %p3179_p1 = pnand %p3178_p0, %p3172_p11 }
  0x43   :  { %3182 = shalt.err (!%p3179_p1)
}
  0x44   :  { %88 = dma.hbm_to_vmem [thread:$0]  %s4281_s5, 2048, %s83_s28, [#allocation14], %s3240_s1, %s3240_s1, %s3241_s16  }
  0x45   :  { %3223 = dma.done.wait [#allocation5], 2048  }
  0x46   :  { %3224 = vsyncadd [#allocation5], 4294965248 }
  0x47   :  { %3225 = dma.done.wait [#allocation8], 24640  }
  0x48   :  { %3226 = vsyncadd [#allocation8], 4294942656 }
  0x49   :  { %3227 = dma.done.wait [#allocation11], 10240  }
  0x4a   :  { %3228 = vsyncadd [#allocation11], 4294957056 }
  0x4b   :  { %3229 = dma.done.wait [#allocation14], 2048  }
  0x4c   :  { %3230 = vsyncadd [#allocation14], 4294965248  ;;  %v4284_v0 = vmov 0.0   ;;  %v348_v1 = vld [vmem:[#allocation7 + $0x1e8] sm:$0xff]  ;;  %v347_v2 = vld [vmem:[#allocation7 + $0x1e0] sm:$0xff]  ;;  %s3246_s4 = smov [#allocation16]  }
  0x4d   :  { %415 = vmatprep.mubr.f32.mxu0 %v4284_v0  ;;  %576 = vmatprep.mubr.f32.mxu1 %v4284_v0  ;;  %v344_v3 = vld [vmem:[#allocation7 + $0x1c8] sm:$0xff]  ;;  %v343_v4 = vld [vmem:[#allocation7 + $0x1c0] sm:$0xff]  ;;  %v350_v25 = vld [vmem:[#allocation7 + $0x1f8] sm:$0xff]  ;;  %s2535_s5 = sshll.u32 %s3246_s4, 4  ;;  %s2536_s5 = int_to_ptr.vmem [resolvable:$true] %s2535_s5 }
  0x4e   :  { %351 = vmatprep.subr.mxu0 %v348_v1  ;;  %v340_v5 = vld [vmem:[#allocation7 + $0x1a8] sm:$0xff]  ;;  %v339_v6 = vld [vmem:[#allocation7 + $0x1a0] sm:$0xff]  ;;  %v349_v26 = vld [vmem:[#allocation7 + $0x1f0] sm:$0xff]  ;;  %512 = vmatprep.subr.mxu1 %v350_v25  ;;  %s3183_s8 = scalar_lea.vmem %s2536_s5, 2048  ;;  %p3188_p3 = scmp.lt.s32.totalorder %s2536_s5, %s2536_s5 }
  0x4f   :  { %352 = vmatpush1.msra.mxu0 %v347_v2  ;;  %v336_v7 = vld [vmem:[#allocation7 + $0x188] sm:$0xff]  ;;  %v335_v8 = vld [vmem:[#allocation7 + $0x180] sm:$0xff]  ;;  %v346_v28 = vld [vmem:[#allocation7 + $0x1d8] sm:$0xff]  ;;  %513 = vmatpush1.msra.mxu1 %v349_v26  ;;  %p3184_p2 = scmp.ne.s32.totalorder %s2536_s5, %s3183_s8  ;;  %p3189_p4 = scmp.lt.s32.totalorder %s3183_s8, %s3183_s8 }
  0x50   :  { %353 = vmatprep.subr.mxu0 %v344_v3  ;;  %v332_v9 = vld [vmem:[#allocation7 + $0x168] sm:$0xff]  ;;  %v331_v10 = vld [vmem:[#allocation7 + $0x160] sm:$0xff]  ;;  %v345_v29 = vld [vmem:[#allocation7 + $0x1d0] sm:$0xff]  ;;  %514 = vmatprep.subr.mxu1 %v346_v28 }
  0x51   :  { %354 = vmatpush1.msra.mxu0 %v343_v4  ;;  %v328_v11 = vld [vmem:[#allocation7 + $0x148] sm:$0xff]  ;;  %v327_v12 = vld [vmem:[#allocation7 + $0x140] sm:$0xff]  ;;  %v342_v31 = vld [vmem:[#allocation7 + $0x1b8] sm:$0xff]  ;;  %515 = vmatpush1.msra.mxu1 %v345_v29  ;;  %p3190_p5 = por %p3189_p4, %p3188_p3 }
  0x52   :  { %355 = vmatprep.subr.mxu0 %v340_v5  ;;  %v324_v13 = vld [vmem:[#allocation7 + $0x128] sm:$0xff]  ;;  %v323_v14 = vld [vmem:[#allocation7 + $0x120] sm:$0xff]  ;;  %v341_v33 = vld [vmem:[#allocation7 + $0x1b0] sm:$0xff]  ;;  %516 = vmatprep.subr.mxu1 %v342_v31 }
  0x53   :  { %356 = vmatpush1.msra.mxu0 %v339_v6  ;;  %v320_v15 = vld [vmem:[#allocation7 + $0x108] sm:$0xff]  ;;  %v319_v16 = vld [vmem:[#allocation7 + $0x100] sm:$0xff]  ;;  %v338_v35 = vld [vmem:[#allocation7 + $0x198] sm:$0xff]  ;;  %517 = vmatpush1.msra.mxu1 %v341_v33  ;;  %p3191_p6 = pnand %p3190_p5, %p3184_p2 }
  0x54   :  { %357 = vmatprep.subr.mxu0 %v336_v7  ;;  %v316_v17 = vld [vmem:[#allocation7 + $0xe8] sm:$0xff]  ;;  %v315_v18 = vld [vmem:[#allocation7 + $0xe0] sm:$0xff]  ;;  %v337_v37 = vld [vmem:[#allocation7 + $0x190] sm:$0xff]  ;;  %518 = vmatprep.subr.mxu1 %v338_v35 }
  0x55   :  { %358 = vmatpush1.msra.mxu0 %v335_v8  ;;  %v312_v19 = vld [vmem:[#allocation7 + $0xc8] sm:$0xff]  ;;  %v311_v20 = vld [vmem:[#allocation7 + $0xc0] sm:$0xff]  ;;  %v334_v39 = vld [vmem:[#allocation7 + $0x178] sm:$0xff]  ;;  %519 = vmatpush1.msra.mxu1 %v337_v37 }
  0x56   :  { %359 = vmatprep.subr.mxu0 %v332_v9  ;;  %v308_v21 = vld [vmem:[#allocation7 + $0xa8] sm:$0xff]  ;;  %v307_v22 = vld [vmem:[#allocation7 + $0xa0] sm:$0xff]  ;;  %v333_v41 = vld [vmem:[#allocation7 + $0x170] sm:$0xff]  ;;  %520 = vmatprep.subr.mxu1 %v334_v39 }
  0x57   :  { %360 = vmatpush1.msra.mxu0 %v331_v10  ;;  %v304_v23 = vld [vmem:[#allocation7 + $0x88] sm:$0xff]  ;;  %v303_v24 = vld [vmem:[#allocation7 + $0x80] sm:$0xff]  ;;  %v330_v43 = vld [vmem:[#allocation7 + $0x158] sm:$0xff]  ;;  %521 = vmatpush1.msra.mxu1 %v333_v41 }
  0x58   :  { %361 = vmatprep.subr.mxu0 %v328_v11  ;;  %v300_v27 = vld [vmem:[#allocation7 + $0x68] sm:$0xff]  ;;  %v299_v30 = vld [vmem:[#allocation7 + $0x60] sm:$0xff]  ;;  %v3321_v46 = vld [vmem:[#allocation12 + $0x70] sm:$0xff]  ;;  %522 = vmatprep.subr.mxu1 %v330_v43 }
  0x59   :  { %362 = vmatpush1.msra.mxu0 %v327_v12  ;;  %v296_v32 = vld [vmem:[#allocation7 + $0x48] sm:$0xff]  ;;  %v295_v34 = vld [vmem:[#allocation7 + $0x40] sm:$0xff]  ;;  %v329_v47 = vld [vmem:[#allocation7 + $0x150] sm:$0xff] }
  0x5a   :  { %363 = vmatprep.subr.mxu0 %v324_v13  ;;  %v292_v36 = vld [vmem:[#allocation7 + $0x28] sm:$0xff]  ;;  %v291_v38 = vld [vmem:[#allocation7 + $0x20] sm:$0xff]  ;;  %v326_v48 = vld [vmem:[#allocation7 + $0x138] sm:$0xff]  ;;  %523 = vmatpush1.msra.mxu1 %v329_v47 }
  0x5b   :  { %364 = vmatpush1.msra.mxu0 %v323_v14  ;;  %v288_v40 = vld [vmem:[#allocation7 + $0x8] sm:$0xff]  ;;  %v287_v42 = vld [vmem:[#allocation7] sm:$0xff]  ;;  %524 = vmatprep.subr.mxu1 %v326_v48  ;;  %v325_v52 = vld [vmem:[#allocation7 + $0x130] sm:$0xff] }
  0x5c   :  { %365 = vmatprep.subr.mxu0 %v320_v15  ;;  %v3317_v44 = vld [vmem:[#allocation12] sm:$0xff]  ;;  %v3319_v45 = vld [vmem:[#allocation12 + $0x78] sm:$0xff]  ;;  %v3326_v49 = vld [vmem:[#allocation12 + $0x8] sm:$0xff]  ;;  %525 = vmatpush1.msra.mxu1 %v325_v52 }
  0x5d   :  { %366 = vmatpush1.msra.mxu0 %v319_v16  ;;  %v3329_v50 = vld [vmem:[#allocation12 + $0x68] sm:$0xff]  ;;  %v3333_v51 = vld [vmem:[#allocation12 + $0x60] sm:$0xff]  ;;  %v322_v53 = vld [vmem:[#allocation7 + $0x118] sm:$0xff] }
  0x5e   :  { %367 = vmatprep.subr.mxu0 %v316_v17  ;;  %v3338_v54 = vld [vmem:[#allocation12 + $0x10] sm:$0xff]  ;;  %v3341_v55 = vld [vmem:[#allocation12 + $0x58] sm:$0xff]  ;;  %526 = vmatprep.subr.mxu1 %v322_v53  ;;  %v3354_v60 = vld [vmem:[#allocation12 + $0x48] sm:$0xff] }
  0x5f   :  { %368 = vmatpush1.msra.mxu0 %v315_v18  ;;  %v321_v56 = vld [vmem:[#allocation7 + $0x110] sm:$0xff]  ;;  %v318_v57 = vld [vmem:[#allocation7 + $0xf8] sm:$0xff]  ;;  %v3360_v63 = vld [vmem:[#allocation12 + $0x20] sm:$0xff] }
  0x60   :  { %369 = vmatprep.subr.mxu0 %v312_v19  ;;  %v3348_v58 = vld [vmem:[#allocation12 + $0x18] sm:$0xff]  ;;  %v3350_v59 = vld [vmem:[#allocation12 + $0x50] sm:$0xff]  ;;  %527 = vmatpush1.msra.mxu1 %v321_v56  ;;  %v3362_v1 = vld [vmem:[#allocation12 + $0x40] sm:$0xff] }
  0x61   :  { %370 = vmatpush1.msra.mxu0 %v311_v20  ;;  %528 = vmatprep.subr.mxu1 %v318_v57  ;;  %v317_v61 = vld [vmem:[#allocation7 + $0xf0] sm:$0xff]  ;;  %v314_v62 = vld [vmem:[#allocation7 + $0xd8] sm:$0xff]  ;;  %v3411_v15 = vld [vmem:[#allocation4] sm:$0xff] }
  0x62   :  { %371 = vmatprep.subr.mxu0 %v308_v21  ;;  %529 = vmatpush1.msra.mxu1 %v317_v61  ;;  %v3366_v2 = vld [vmem:[#allocation12 + $0x38] sm:$0xff]  ;;  %v313_v3 = vld [vmem:[#allocation7 + $0xd0] sm:$0xff]  ;;  %v3415_v16 = vld [vmem:[#allocation4 + $0x8] sm:$0xff] }
  0x63   :  { %372 = vmatpush1.msra.mxu0 %v307_v22  ;;  %530 = vmatprep.subr.mxu1 %v314_v62  ;;  %v310_v4 = vld [vmem:[#allocation7 + $0xb8] sm:$0xff]  ;;  %v3372_v5 = vld [vmem:[#allocation12 + $0x28] sm:$0xff]  ;;  %v3424_v22 = vld [vmem:[#allocation4 + $0x20] sm:$0xff] }
  0x64   :  { %373 = vmatprep.subr.mxu0 %v304_v23  ;;  %v3374_v6 = vld [vmem:[#allocation12 + $0x30] sm:$0xff]  ;;  %531 = vmatpush1.msra.mxu1 %v313_v3  ;;  %v3429_v23 = vld [vmem:[#allocation4 + $0x28] sm:$0xff]  ;;  %v3440_v26 = vld [vmem:[#allocation4 + $0x40] sm:$0xff] }
  0x65   :  { %374 = vmatpush1.msra.mxu0 %v303_v24  ;;  %532 = vmatprep.subr.mxu1 %v310_v4  ;;  %v309_v7 = vld [vmem:[#allocation7 + $0xb0] sm:$0xff]  ;;  %v306_v8 = vld [vmem:[#allocation7 + $0x98] sm:$0xff]  ;;  %v3461_v31 = vld [vmem:[#allocation4 + $0x68] sm:$0xff] }
  0x66   :  { %375 = vmatprep.subr.mxu0 %v300_v27  ;;  %533 = vmatpush1.msra.mxu1 %v309_v7  ;;  %v305_v9 = vld [vmem:[#allocation7 + $0x90] sm:$0xff]  ;;  %v302_v10 = vld [vmem:[#allocation7 + $0x78] sm:$0xff]  ;;  %v3445_v27 = vld [vmem:[#allocation4 + $0x48] sm:$0xff] }
  0x67   :  { %376 = vmatpush1.msra.mxu0 %v299_v30  ;;  %534 = vmatprep.subr.mxu1 %v306_v8  ;;  %v301_v11 = vld [vmem:[#allocation7 + $0x70] sm:$0xff]  ;;  %v298_v12 = vld [vmem:[#allocation7 + $0x58] sm:$0xff]  ;;  %v3456_v30 = vld [vmem:[#allocation4 + $0x60] sm:$0xff] }
  0x68   :  { %377 = vmatprep.subr.mxu0 %v296_v32  ;;  %535 = vmatpush1.msra.mxu1 %v305_v9  ;;  %v297_v13 = vld [vmem:[#allocation7 + $0x50] sm:$0xff]  ;;  %v294_v14 = vld [vmem:[#allocation7 + $0x38] sm:$0xff]  ;;  %v943_v35 = vld [vmem:[#allocation7 + $0x3e0] sm:$0xff] }
  0x69   :  { %378 = vmatpush1.msra.mxu0 %v295_v34  ;;  %536 = vmatprep.subr.mxu1 %v302_v10  ;;  %v293_v17 = vld [vmem:[#allocation7 + $0x30] sm:$0xff]  ;;  %v290_v19 = vld [vmem:[#allocation7 + $0x18] sm:$0xff]  ;;  %v944_v34 = vld [vmem:[#allocation7 + $0x3e8] sm:$0xff] }
  0x6a   :  { %379 = vmatprep.subr.mxu0 %v292_v36  ;;  %537 = vmatpush1.msra.mxu1 %v301_v11  ;;  %v3417_v18 = vld [vmem:[#allocation4 + $0x10] sm:$0xff]  ;;  %v3421_v21 = vld [vmem:[#allocation4 + $0x18] sm:$0xff]  ;;  %v940_v36 = vld [vmem:[#allocation7 + $0x3c8] sm:$0xff] }
  0x6b   :  { %380 = vmatpush1.msra.mxu0 %v291_v38  ;;  %538 = vmatprep.subr.mxu1 %v298_v12  ;;  %v289_v20 = vld [vmem:[#allocation7 + $0x10] sm:$0xff]  ;;  %v3437_v25 = vld [vmem:[#allocation4 + $0x38] sm:$0xff]  ;;  %v939_v38 = vld [vmem:[#allocation7 + $0x3c0] sm:$0xff] }
  0x6c   :  { %381 = vmatprep.subr.mxu0 %v288_v40  ;;  %539 = vmatpush1.msra.mxu1 %v297_v13  ;;  %v3432_v24 = vld [vmem:[#allocation4 + $0x30] sm:$0xff]  ;;  %v3453_v29 = vld [vmem:[#allocation4 + $0x58] sm:$0xff]  ;;  %v936_v41 = vld [vmem:[#allocation7 + $0x3a8] sm:$0xff] }
  0x6d   :  { %382 = vmatpush1.msra.mxu0 %v287_v42  ;;  %540 = vmatprep.subr.mxu1 %v294_v14  ;;  %v3448_v28 = vld [vmem:[#allocation4 + $0x50] sm:$0xff]  ;;  %v3469_v33 = vld [vmem:[#allocation4 + $0x78] sm:$0xff]  ;;  %v932_v48 = vld [vmem:[#allocation7 + $0x388] sm:$0xff] }
  0x6e   :  { %416 = vmatmul.mubr.f32.vlgmr.msra.gmra.mxu0 %v3317_v44  ;;  %2666 = vmatprep.subr.mxu0 %v3319_v45  ;;  %v3464_v32 = vld [vmem:[#allocation4 + $0x70] sm:$0xff]  ;;  %v946_v37 = vld [vmem:[#allocation7 + $0x3f8] sm:$0xff]  ;;  %v931_v52 = vld [vmem:[#allocation7 + $0x380] sm:$0xff] }
  0x6f   :  { %421 = vmatprep.mubr.f32.mxu0 %v4284_v0  ;;  %2667 = vmatpush3.msra.mxu0 %v3319_v45  ;;  %v945_v39 = vld [vmem:[#allocation7 + $0x3f0] sm:$0xff]  ;;  %v942_v40 = vld [vmem:[#allocation7 + $0x3d8] sm:$0xff]  ;;  %v927_v57 = vld [vmem:[#allocation7 + $0x360] sm:$0xff] }
  0x70   :  { %2668 = vmatprep.subr.mxu0 %v3321_v46  ;;  %541 = vmatpush1.msra.mxu1 %v293_v17  ;;  %v941_v42 = vld [vmem:[#allocation7 + $0x3d0] sm:$0xff]  ;;  %v938_v43 = vld [vmem:[#allocation7 + $0x3b8] sm:$0xff]  ;;  %v923_v62 = vld [vmem:[#allocation7 + $0x340] sm:$0xff] }
  0x71   :  { %2669 = vmatpush3.msra.mxu0 %v3321_v46  ;;  %542 = vmatprep.subr.mxu1 %v290_v19  ;;  %v937_v47 = vld [vmem:[#allocation7 + $0x3b0] sm:$0xff]  ;;  %v930_v56 = vld [vmem:[#allocation7 + $0x378] sm:$0xff]  ;;  %v919_v3 = vld [vmem:[#allocation7 + $0x320] sm:$0xff] }
  0x72   :  { %422 = vmatmul.mubr.f32.gmra.mxu0 %v3326_v49  ;;  %2670 = vmatprep.subr.mxu0 %v3329_v50  ;;  %v933_v53 = vld [vmem:[#allocation7 + $0x390] sm:$0xff]  ;;  %v926_v61 = vld [vmem:[#allocation7 + $0x358] sm:$0xff]  ;;  %v916_v4 = vld [vmem:[#allocation7 + $0x308] sm:$0xff] }
  0x73   :  { %427 = vmatprep.mubr.f32.mxu0 %v4284_v0  ;;  %2671 = vmatpush3.msra.mxu0 %v3329_v50  ;;  %v917_v7 = vld [vmem:[#allocation7 + $0x310] sm:$0xff]  ;;  %v912_v8 = vld [vmem:[#allocation7 + $0x2e8] sm:$0xff]  ;;  %v914_v9 = vld [vmem:[#allocation7 + $0x2f8] sm:$0xff] }
  0x74   :  { %2672 = vmatprep.subr.mxu0 %v3333_v51  ;;  %543 = vmatpush1.msra.mxu1 %v289_v20  ;;  %v911_v10 = vld [vmem:[#allocation7 + $0x2e0] sm:$0xff]  ;;  %v913_v11 = vld [vmem:[#allocation7 + $0x2f0] sm:$0xff]  ;;  %v908_v12 = vld [vmem:[#allocation7 + $0x2c8] sm:$0xff] }
  0x75   :  { %2673 = vmatpush3.msra.mxu0 %v3333_v51  ;;  %577 = vmatmul.mubr.f32.vlgmr.msra.gmra.mxu1 %v3317_v44  ;;  %v907_v13 = vld [vmem:[#allocation7 + $0x2c0] sm:$0xff]  ;;  %v909_v14 = vld [vmem:[#allocation7 + $0x2d0] sm:$0xff]  ;;  %v904_v17 = vld [vmem:[#allocation7 + $0x2a8] sm:$0xff] }
  0x76   :  { %428 = vmatmul.mubr.f32.gmra.mxu0 %v3338_v54  ;;  %2674 = vmatprep.subr.mxu0 %v3341_v55  ;;  %v906_v19 = vld [vmem:[#allocation7 + $0x2b8] sm:$0xff]  ;;  %v903_v20 = vld [vmem:[#allocation7 + $0x2a0] sm:$0xff] }
  0x77   :  { %433 = vmatprep.mubr.f32.mxu0 %v4284_v0  ;;  %2675 = vmatpush3.msra.mxu0 %v3341_v55 }
  0x78   :  { %2676 = vmatprep.subr.mxu0 %v3350_v59  ;;  %582 = vmatprep.mubr.f32.mxu1 %v4284_v0 }
  0x79   :  { %2677 = vmatpush3.msra.mxu0 %v3350_v59  ;;  %583 = vmatmul.mubr.f32.gmra.mxu1 %v3326_v49 }
  0x7a   :  { %434 = vmatmul.mubr.f32.gmra.mxu0 %v3348_v58  ;;  %2678 = vmatprep.subr.mxu0 %v3354_v60 }
  0x7b   :  { %439 = vmatprep.mubr.f32.mxu0 %v4284_v0  ;;  %2679 = vmatpush3.msra.mxu0 %v3354_v60 }
  0x7c   :  { %2680 = vmatprep.subr.mxu0 %v3362_v1  ;;  %588 = vmatprep.mubr.f32.mxu1 %v4284_v0 }
  0x7d   :  { %2681 = vmatpush3.msra.mxu0 %v3362_v1  ;;  %589 = vmatmul.mubr.f32.gmra.mxu1 %v3338_v54 }
  0x7e   :  { %440 = vmatmul.mubr.f32.gmra.mxu0 %v3360_v63  ;;  %2682 = vmatprep.subr.mxu0 %v3366_v2 }
  0x7f   :  { %445 = vmatprep.mubr.f32.mxu0 %v4284_v0  ;;  %2683 = vmatpush3.msra.mxu0 %v3366_v2 }
  0x80   :  { %2684 = vmatprep.subr.mxu0 %v3374_v6  ;;  %594 = vmatprep.mubr.f32.mxu1 %v4284_v0 }
  0x81   :  { %2685 = vmatpush3.msra.mxu0 %v3374_v6  ;;  %595 = vmatmul.mubr.f32.gmra.mxu1 %v3348_v58 }
  0x82   :  { %446 = vmatmul.mubr.f32.gmra.mxu0 %v3372_v5  ;;  %2686 = vmatprep.subr.mxu0 %v3372_v5 }
  0x83   :  { %451 = vmatprep.mubr.f32.mxu0 %v4284_v0  ;;  %2687 = vmatpush3.msra.mxu0 %v3372_v5 }
  0x84   :  { %2688 = vmatprep.subr.mxu0 %v3360_v63  ;;  %600 = vmatprep.mubr.f32.mxu1 %v4284_v0 }
  0x85   :  { %2689 = vmatpush3.msra.mxu0 %v3360_v63  ;;  %601 = vmatmul.mubr.f32.gmra.mxu1 %v3360_v63  ;;  %v925_v63 = vld [vmem:[#allocation7 + $0x350] sm:$0xff] }
  0x86   :  { %452 = vmatmul.mubr.f32.gmra.mxu0 %v3374_v6  ;;  %2690 = vmatprep.subr.mxu0 %v3348_v58 }
  0x87   :  { %457 = vmatprep.mubr.f32.mxu0 %v4284_v0  ;;  %2691 = vmatpush3.msra.mxu0 %v3348_v58  ;;  %v929_v58 = vld [vmem:[#allocation7 + $0x370] sm:$0xff] }
  0x88   :  { %2692 = vmatprep.subr.mxu0 %v3338_v54  ;;  %606 = vmatprep.mubr.f32.mxu1 %v4284_v0 }
  0x89   :  { %2693 = vmatpush3.msra.mxu0 %v3338_v54  ;;  %607 = vmatmul.mubr.f32.gmra.mxu1 %v3372_v5  ;;  %v928_v54 = vld [vmem:[#allocation7 + $0x368] sm:$0xff]  ;;  %v918_v5 = vld [vmem:[#allocation7 + $0x318] sm:$0xff] }
  0x8a   :  { %458 = vmatmul.mubr.f32.gmra.mxu0 %v3366_v2  ;;  %2694 = vmatprep.subr.mxu0 %v3326_v49 }
  0x8b   :  { %463 = vmatprep.mubr.f32.mxu0 %v4284_v0  ;;  %2695 = vmatpush3.msra.mxu0 %v3326_v49  ;;  %v934_v49 = vld [vmem:[#allocation7 + $0x398] sm:$0xff] }
  0x8c   :  { %2696 = vmatprep.subr.mxu0 %v3317_v44  ;;  %612 = vmatprep.mubr.f32.mxu1 %v4284_v0 }
  0x8d   :  { %2697 = vmatpush3.msra.mxu0 %v3317_v44  ;;  %613 = vmatmul.mubr.f32.gmra.mxu1 %v3374_v6  ;;  %v935_v44 = vld [vmem:[#allocation7 + $0x3a0] sm:$0xff] }
  0x8e   :  { %464 = vmatmul.mubr.f32.gmra.mxu0 %v3362_v1  ;;  %618 = vmatprep.mubr.f32.mxu1 %v4284_v0  ;;  %v915_v6 = vld [vmem:[#allocation7 + $0x300] sm:$0xff] }
  0x8f   :  { %469 = vmatprep.mubr.f32.mxu0 %v4284_v0  ;;  %947 = vmatprep.subr.mxu1 %v944_v34  ;;  %v905_v34 = vld [vmem:[#allocation7 + $0x2b0] sm:$0xff] }
  0x90   :  { %948 = vmatpush1.msra.mxu1 %v943_v35  ;;  %1108 = vmatprep.subr.mxu0 %v946_v37  ;;  %v900_v35 = vld [vmem:[#allocation7 + $0x288] sm:$0xff]  ;;  %v901_v37 = vld [vmem:[#allocation7 + $0x290] sm:$0xff] }
  0x91   :  { %619 = vmatmul.mubr.f32.gmra.mxu1 %v3366_v2  ;;  %949 = vmatprep.subr.mxu1 %v940_v36  ;;  %v922_v2 = vld [vmem:[#allocation7 + $0x338] sm:$0xff]  ;;  %v899_v36 = vld [vmem:[#allocation7 + $0x280] sm:$0xff] }
  0x92   :  { %470 = vmatmul.mubr.f32.gmra.mxu0 %v3354_v60  ;;  %624 = vmatprep.mubr.f32.mxu1 %v4284_v0 }
  0x93   :  { %475 = vmatprep.mubr.f32.mxu0 %v4284_v0  ;;  %950 = vmatpush1.msra.mxu1 %v939_v38  ;;  %v896_v38 = vld [vmem:[#allocation7 + $0x268] sm:$0xff] }
  0x94   :  { %951 = vmatprep.subr.mxu1 %v936_v41  ;;  %v897_v41 = vld [vmem:[#allocation7 + $0x270] sm:$0xff] }
  0x95   :  { %625 = vmatmul.mubr.f32.gmra.mxu1 %v3362_v1  ;;  %v920_v1 = vld [vmem:[#allocation7 + $0x328] sm:$0xff] }
  0x96   :  { %476 = vmatmul.mubr.f32.gmra.mxu0 %v3350_v59  ;;  %630 = vmatprep.mubr.f32.mxu1 %v4284_v0 }
  0x97   :  { %481 = vmatprep.mubr.f32.mxu0 %v4284_v0  ;;  %952 = vmatpush1.msra.mxu1 %v935_v44  ;;  %v893_v44 = vld [vmem:[#allocation7 + $0x250] sm:$0xff] }
  0x98   :  { %953 = vmatprep.subr.mxu1 %v932_v48  ;;  %v890_v48 = vld [vmem:[#allocation7 + $0x238] sm:$0xff] }
  0x99   :  { %631 = vmatmul.mubr.f32.gmra.mxu1 %v3354_v60  ;;  %v924_v60 = vld [vmem:[#allocation7 + $0x348] sm:$0xff] }
  0x9a   :  { %482 = vmatmul.mubr.f32.gmra.mxu0 %v3341_v55  ;;  %636 = vmatprep.mubr.f32.mxu1 %v4284_v0 }
  0x9b   :  { %487 = vmatprep.mubr.f32.mxu0 %v4284_v0  ;;  %954 = vmatpush1.msra.mxu1 %v931_v52  ;;  %v889_v52 = vld [vmem:[#allocation7 + $0x230] sm:$0xff] }
  0x9c   :  { %955 = vmatprep.subr.mxu1 %v928_v54  ;;  %v883_v54 = vld [vmem:[#allocation7 + $0x200] sm:$0xff] }
  0x9d   :  { %637 = vmatmul.mubr.f32.gmra.mxu1 %v3350_v59  ;;  %v921_v59 = vld [vmem:[#allocation7 + $0x330] sm:$0xff] }
  0x9e   :  { %488 = vmatmul.mubr.f32.gmra.mxu0 %v3333_v51  ;;  %956 = vmatpush1.msra.mxu1 %v927_v57 }
  0x9f   :  { %493 = vmatprep.mubr.f32.mxu0 %v4284_v0  ;;  %957 = vmatprep.subr.mxu1 %v924_v60 }
  0xa0   :  { %642 = vmatprep.mubr.f32.mxu1 %v4284_v0  ;;  %958 = vmatpush1.msra.mxu1 %v923_v62 }
  0xa1   :  { %643 = vmatmul.mubr.f32.gmra.mxu1 %v3341_v55  ;;  %959 = vmatprep.subr.mxu1 %v920_v1  ;;  %v910_v55 = vld [vmem:[#allocation7 + $0x2d8] sm:$0xff] }
  0xa2   :  { %494 = vmatmul.mubr.f32.gmra.mxu0 %v3329_v50  ;;  %960 = vmatpush1.msra.mxu1 %v919_v3 }
  0xa3   :  { %499 = vmatprep.mubr.f32.mxu0 %v4284_v0  ;;  %961 = vmatprep.subr.mxu1 %v916_v4 }
  0xa4   :  { %648 = vmatprep.mubr.f32.mxu1 %v4284_v0  ;;  %962 = vmatpush1.msra.mxu1 %v915_v6 }
  0xa5   :  { %649 = vmatmul.mubr.f32.gmra.mxu1 %v3333_v51  ;;  %963 = vmatprep.subr.mxu1 %v912_v8  ;;  %v902_v51 = vld [vmem:[#allocation7 + $0x298] sm:$0xff] }
  0xa6   :  { %500 = vmatmul.mubr.f32.gmra.mxu0 %v3321_v46  ;;  %964 = vmatpush1.msra.mxu1 %v911_v10 }
  0xa7   :  { %505 = vmatprep.mubr.f32.mxu0 %v4284_v0  ;;  %965 = vmatprep.subr.mxu1 %v908_v12 }
  0xa8   :  { %654 = vmatprep.mubr.f32.mxu1 %v4284_v0  ;;  %966 = vmatpush1.msra.mxu1 %v907_v13 }
  0xa9   :  { %655 = vmatmul.mubr.f32.gmra.mxu1 %v3329_v50  ;;  %967 = vmatprep.subr.mxu1 %v904_v17  ;;  %v894_v50 = vld [vmem:[#allocation7 + $0x258] sm:$0xff] }
  0xaa   :  { %506 = vmatmul.mubr.f32.gmra.mxu0 %v3319_v45  ;;  %968 = vmatpush1.msra.mxu1 %v903_v20 }
  0xab   :  { %2698 = vmatprep.mubr.f32.mxu0 %v3411_v15  ;;  %969 = vmatprep.subr.mxu1 %v900_v35 }
  0xac   :  { %660 = vmatprep.mubr.f32.mxu1 %v4284_v0  ;;  %970 = vmatpush1.msra.mxu1 %v899_v36 }
  0xad   :  { %661 = vmatmul.mubr.f32.gmra.mxu1 %v3321_v46  ;;  %971 = vmatprep.subr.mxu1 %v896_v38  ;;  %v886_v46 = vld [vmem:[#allocation7 + $0x218] sm:$0xff] }
  0xae   :  { %2699 = vmatmul.mubr.f32.vlgmr.msra.gmra.mxu0 %v3415_v16  ;;  %666 = vmatprep.mubr.f32.mxu1 %v4284_v0 }
  0xaf   :  { %2701 = vmatprep.mubr.f32.mxu0 %v3417_v18  ;;  %1109 = vmatpush1.msra.mxu0 %v945_v39  ;;  %v898_v39 = vld [vmem:[#allocation7 + $0x278] sm:$0xff] }
  0xb0   :  { %1110 = vmatprep.subr.mxu0 %v942_v40  ;;  %v895_v40 = vld [vmem:[#allocation7 + $0x260] sm:$0xff] }
  0xb1   :  { %1111 = vmatpush1.msra.mxu0 %v941_v42  ;;  %v892_v42 = vld [vmem:[#allocation7 + $0x248] sm:$0xff]  ;;  %972 = vmatpush1.msra.mxu1 %v895_v40 }
  0xb2   :  { %2702 = vmatmul.mubr.f32.gmra.mxu0 %v3421_v21  ;;  %1112 = vmatprep.subr.mxu0 %v938_v43  ;;  %v891_v43 = vld [vmem:[#allocation7 + $0x240] sm:$0xff] }
  0xb3   :  { %2704 = vmatprep.mubr.f32.mxu0 %v3424_v22  ;;  %1113 = vmatpush1.msra.mxu0 %v937_v47  ;;  %v888_v47 = vld [vmem:[#allocation7 + $0x228] sm:$0xff] }
  0xb4   :  { %1114 = vmatprep.subr.mxu0 %v934_v49  ;;  %973 = vmatprep.subr.mxu1 %v892_v42  ;;  %v887_v49 = vld [vmem:[#allocation7 + $0x220] sm:$0xff] }
  0xb5   :  { %1115 = vmatpush1.msra.mxu0 %v933_v53  ;;  %974 = vmatpush1.msra.mxu1 %v891_v43  ;;  %v884_v53 = vld [vmem:[#allocation7 + $0x208] sm:$0xff] }
  0xb6   :  { %2705 = vmatmul.mubr.f32.gmra.mxu0 %v3429_v23  ;;  %1116 = vmatprep.subr.mxu0 %v930_v56  ;;  %v885_v56 = vld [vmem:[#allocation7 + $0x210] sm:$0xff] }
  0xb7   :  { %2707 = vmatprep.mubr.f32.mxu0 %v3432_v24  ;;  %1117 = vmatpush1.msra.mxu0 %v929_v58 }
  0xb8   :  { %1118 = vmatprep.subr.mxu0 %v926_v61  ;;  %667 = vmatmul.mubr.f32.gmra.mxu1 %v3319_v45 }
  0xb9   :  { %1119 = vmatpush1.msra.mxu0 %v925_v63  ;;  %975 = vmatprep.subr.mxu1 %v888_v47 }
  0xba   :  { %2708 = vmatmul.mubr.f32.gmra.mxu0 %v3437_v25  ;;  %1120 = vmatprep.subr.mxu0 %v922_v2 }
  0xbb   :  { %2710 = vmatprep.mubr.f32.mxu0 %v3440_v26  ;;  %1121 = vmatpush1.msra.mxu0 %v921_v59 }
  0xbc   :  { %1122 = vmatprep.subr.mxu0 %v918_v5  ;;  %976 = vmatpush1.msra.mxu1 %v887_v49 }
  0xbd   :  { %1123 = vmatpush1.msra.mxu0 %v917_v7  ;;  %977 = vmatprep.subr.mxu1 %v884_v53 }
  0xbe   :  { %2711 = vmatmul.mubr.f32.gmra.mxu0 %v3445_v27  ;;  %1124 = vmatprep.subr.mxu0 %v914_v9 }
  0xbf   :  { %2713 = vmatprep.mubr.f32.mxu0 %v3448_v28  ;;  %1125 = vmatpush1.msra.mxu0 %v913_v11 }
  0xc0   :  { %1126 = vmatprep.subr.mxu0 %v910_v55  ;;  %978 = vmatpush1.msra.mxu1 %v883_v54 }
  0xc1   :  { %1127 = vmatpush1.msra.mxu0 %v909_v14  ;;  %1011 = vmatprep.mubr.f32.mxu1 %v4284_v0 }
  0xc2   :  { %2714 = vmatmul.mubr.f32.gmra.mxu0 %v3453_v29  ;;  %1128 = vmatprep.subr.mxu0 %v906_v19 }
  0xc3   :  { %2716 = vmatprep.mubr.f32.mxu0 %v3456_v30  ;;  %1129 = vmatpush1.msra.mxu0 %v905_v34 }
  0xc4   :  { %1130 = vmatprep.subr.mxu0 %v902_v51 }
  0xc5   :  { %1131 = vmatpush1.msra.mxu0 %v901_v37 }
  0xc6   :  { %2717 = vmatmul.mubr.f32.gmra.mxu0 %v3461_v31  ;;  %1132 = vmatprep.subr.mxu0 %v898_v39 }
  0xc7   :  { %2719 = vmatprep.mubr.f32.mxu0 %v3464_v32  ;;  %1133 = vmatpush1.msra.mxu0 %v897_v41 }
  0xc8   :  { %1134 = vmatprep.subr.mxu0 %v894_v50 }
  0xc9   :  { %1135 = vmatpush1.msra.mxu0 %v893_v44 }
  0xca   :  { %2720 = vmatmul.mubr.f32.gmra.mxu0 %v3469_v33  ;;  %1136 = vmatprep.subr.mxu0 %v890_v48 }
  0xcb   :  { %1172 = vmatprep.mubr.f32.mxu0 %v4284_v0  ;;  %1137 = vmatpush1.msra.mxu0 %v889_v52 }
  0xcc   :  { %1138 = vmatprep.subr.mxu0 %v886_v46 }
  0xcd   :  { %1139 = vmatpush1.msra.mxu0 %v885_v56 }
 0x12e   :  { %v3493_v57 = vpop.f32.mrf.mxu0 }
 0x130   :  { %v3495_v58 = vpop.f32.mrf.mxu0 }
 0x132   :  { %v3497_v60 = vpop.f32.mrf.mxu0 }
 0x134   :  { %v3499_v45 = vpop.f32.mrf.mxu0 }
 0x136   :  { %v3501_v61 = vpop.f32.mrf.mxu0 }
 0x138   :  { %v3503_v62 = vpop.f32.mrf.mxu0 }
 0x13a   :  { %v3505_v63 = vpop.f32.mrf.mxu0 }
 0x13c   :  { %v3507_v1 = vpop.f32.mrf.mxu0 }
 0x13e   :  { %v3509_v2 = vpop.f32.mrf.mxu0 }
 0x140   :  { %v3511_v3 = vpop.f32.mrf.mxu0 }
 0x142   :  { %v3513_v59 = vpop.f32.mrf.mxu0 }
 0x144   :  { %v3515_v4 = vpop.f32.mrf.mxu0 }
 0x146   :  { %v3517_v5 = vpop.f32.mrf.mxu0 }
 0x148   :  { %v3519_v6 = vpop.f32.mrf.mxu0 }
 0x14a   :  { %v3521_v7 = vpop.f32.mrf.mxu0 }
 0x14c   :  { %v3523_v8 = vpop.f32.mrf.mxu0 }
 0x14e   :  { %v3525_v9 = vpop.f32.mrf.mxu0 }
 0x150   :  { %v3527_v10 = vpop.f32.mrf.mxu0 }
 0x152   :  { %v3529_v11 = vpop.f32.mrf.mxu0 }
 0x154   :  { %v3531_v12 = vpop.f32.mrf.mxu0 }
 0x156   :  { %v3533_v55 = vpop.f32.mrf.mxu0 }
 0x158   :  { %v3535_v13 = vpop.f32.mrf.mxu0 }
 0x15a   :  { %v3537_v14 = vpop.f32.mrf.mxu0 }
 0x15b   :  { %4286 = vst [vmem:[#allocation24_spill] sm:$0xff] %v3537_v14  ;;  %v231_v14 = vld [vmem:[#allocation10 + $0x40] sm:$0xff] }
 0x15c   :  { %v3539_v17 = vpop.f32.mrf.mxu0 }
 0x15d   :  { %4287 = vst [vmem:[#allocation25_spill] sm:$0xff] %v3539_v17  ;;  %v230_v17 = vld [vmem:[#allocation10 + $0x38] sm:$0xff] }
 0x15e   :  { %v3541_v19 = vpop.f32.mrf.mxu0 }
 0x15f   :  { %4288 = vst [vmem:[#allocation26_spill] sm:$0xff] %v3541_v19 }
 0x160   :  { %v3543_v20 = vpop.f32.mrf.mxu0 }
 0x161   :  { %4289 = vst [vmem:[#allocation27_spill] sm:$0xff] %v3543_v20  ;;  %v227_v20 = vld [vmem:[#allocation10 + $0x20] sm:$0xff] }
 0x162   :  { %v3545_v34 = vpop.f32.mrf.mxu0 }
 0x163   :  { %4290 = vst [vmem:[#allocation28_spill] sm:$0xff] %v3545_v34 }
 0x164   :  { %v3547_v35 = vpop.f32.mrf.mxu0 }
 0x165   :  { %4291 = vst [vmem:[#allocation29_spill] sm:$0xff] %v3547_v35 }
 0x166   :  { %v3549_v51 = vpop.f32.mrf.mxu0 }
 0x167   :  { %4292 = vst [vmem:[#allocation30_spill] sm:$0xff] %v3549_v51 }
 0x168   :  { %v3551_v36 = vpop.f32.mrf.mxu0 }
 0x169   :  { %4293 = vst [vmem:[#allocation31_spill] sm:$0xff] %v3551_v36  ;;  %v226_v36 = vld [vmem:[#allocation10 + $0x18] sm:$0xff] }
 0x16a   :  { %v3553_v37 = vpop.f32.mrf.mxu0 }
 0x16b   :  { %4294 = vst [vmem:[#allocation32_spill] sm:$0xff] %v3553_v37  ;;  %v224_v37 = vld [vmem:[#allocation10 + $0x8] sm:$0xff] }
 0x16c   :  { %v3555_v38 = vpop.f32.mrf.mxu0 }
 0x16d   :  { %4295 = vst [vmem:[#allocation33_spill] sm:$0xff] %v3555_v38 }
 0x16e   :  { %v3557_v39 = vpop.f32.mrf.mxu0 }
 0x170   :  { %v3559_v40 = vpop.f32.mrf.mxu0 }
 0x171   :  { %1012 = vmatmul.mubr.f32.vlgmr.msra.gmra.mxu1 %v3559_v40  ;;  %1173 = vmatmul.mubr.f32.vlgmr.msra.gmra.mxu0 %v3559_v40 }
 0x172   :  { %v3563_v41 = vpop.f32.mrf.mxu0  ;;  %1017 = vmatprep.mubr.f32.mxu1 %v4284_v0  ;;  %1178 = vmatprep.mubr.f32.mxu0 %v4284_v0 }
 0x174   :  { %v3567_v42 = vpop.f32.mrf.mxu0 }
 0x175   :  { %1018 = vmatmul.mubr.f32.gmra.mxu1 %v3557_v39  ;;  %1179 = vmatmul.mubr.f32.gmra.mxu0 %v3557_v39 }
 0x176   :  { %v3571_v50 = vpop.f32.mrf.mxu0  ;;  %1023 = vmatprep.mubr.f32.mxu1 %v4284_v0  ;;  %1184 = vmatprep.mubr.f32.mxu0 %v4284_v0 }
 0x178   :  { %v3575_v43 = vpop.f32.mrf.mxu0 }
 0x179   :  { %1024 = vmatmul.mubr.f32.gmra.mxu1 %v3567_v42  ;;  %1185 = vmatmul.mubr.f32.gmra.mxu0 %v3567_v42 }
 0x17a   :  { %v2709_v44 = vpop.f32.mrf.mxu0  ;;  %1029 = vmatprep.mubr.f32.mxu1 %v4284_v0  ;;  %1190 = vmatprep.mubr.f32.mxu0 %v4284_v0 }
 0x17c   :  { %v833_v47 = vpop.f32.mrf.mxu0 }
 0x17d   :  { %1030 = vmatmul.mubr.f32.gmra.mxu1 %v3563_v41  ;;  %1191 = vmatmul.mubr.f32.gmra.mxu0 %v3563_v41 }
 0x17e   :  { %v2712_v48 = vpop.f32.mrf.mxu0  ;;  %1035 = vmatprep.mubr.f32.mxu1 %v4284_v0  ;;  %1196 = vmatprep.mubr.f32.mxu0 %v4284_v0 }
 0x180   :  { %v843_v49 = vpop.f32.mrf.mxu0 }
 0x181   :  { %1036 = vmatmul.mubr.f32.gmra.mxu1 %v3575_v43  ;;  %1197 = vmatmul.mubr.f32.gmra.mxu0 %v3575_v43 }
 0x182   :  { %v2715_v52 = vpop.f32.mrf.mxu0  ;;  %1041 = vmatprep.mubr.f32.mxu1 %v4284_v0  ;;  %1202 = vmatprep.mubr.f32.mxu0 %v4284_v0 }
 0x184   :  { %v853_v53 = vpop.f32.mrf.mxu0 }
 0x185   :  { %1042 = vmatmul.mubr.f32.gmra.mxu1 %v3571_v50  ;;  %1203 = vmatmul.mubr.f32.gmra.mxu0 %v3571_v50 }
 0x186   :  { %v2718_v46 = vpop.f32.mrf.mxu0  ;;  %1047 = vmatprep.mubr.f32.mxu1 %v4284_v0  ;;  %1208 = vmatprep.mubr.f32.mxu0 %v4284_v0 }
 0x188   :  { %v863_v54 = vpop.f32.mrf.mxu0 }
 0x189   :  { %1048 = vmatmul.mubr.f32.gmra.mxu1 %v833_v47  ;;  %1209 = vmatmul.mubr.f32.gmra.mxu0 %v833_v47 }
 0x18a   :  { %v3593_v56 = vpop.f32.mrf.mxu0  ;;  %1053 = vmatprep.mubr.f32.mxu1 %v4284_v0  ;;  %1214 = vmatprep.mubr.f32.mxu0 %v4284_v0 }
 0x18b   :  { %2722 = vmatprep.subr.mxu1 %v3593_v56 }
 0x18c   :  { %v873_v38 = vpop.f32.mrf.mxu0  ;;  %2723 = vmatpush3.msra.mxu1 %v3593_v56 }
 0x18d   :  { %1054 = vmatmul.mubr.f32.gmra.mxu1 %v2709_v44  ;;  %1215 = vmatmul.mubr.f32.gmra.mxu0 %v2709_v44 }
 0x18e   :  { %2724 = vmatprep.subr.mxu1 %v873_v38  ;;  %1059 = vmatprep.mubr.f32.mxu1 %v4284_v0 }
 0x18f   :  { %2725 = vmatpush3.msra.mxu1 %v873_v38  ;;  %1220 = vmatprep.mubr.f32.mxu0 %v4284_v0 }
 0x190   :  { %2726 = vmatprep.subr.mxu1 %v2718_v46 }
 0x191   :  { %2727 = vmatpush3.msra.mxu1 %v2718_v46  ;;  %1221 = vmatmul.mubr.f32.gmra.mxu0 %v843_v49 }
 0x192   :  { %1060 = vmatmul.mubr.f32.gmra.mxu1 %v843_v49  ;;  %2728 = vmatprep.subr.mxu1 %v863_v54 }
 0x193   :  { %2729 = vmatpush3.msra.mxu1 %v863_v54  ;;  %1065 = vmatprep.mubr.f32.mxu1 %v4284_v0 }
 0x194   :  { %2730 = vmatprep.subr.mxu1 %v2715_v52  ;;  %1226 = vmatprep.mubr.f32.mxu0 %v4284_v0 }
 0x195   :  { %2731 = vmatpush3.msra.mxu1 %v2715_v52  ;;  %1227 = vmatmul.mubr.f32.gmra.mxu0 %v2712_v48 }
 0x196   :  { %1066 = vmatmul.mubr.f32.gmra.mxu1 %v2712_v48  ;;  %2732 = vmatprep.subr.mxu1 %v853_v53 }
 0x197   :  { %2733 = vmatpush3.msra.mxu1 %v853_v53  ;;  %1071 = vmatprep.mubr.f32.mxu1 %v4284_v0 }
 0x198   :  { %2734 = vmatprep.subr.mxu1 %v2712_v48  ;;  %1232 = vmatprep.mubr.f32.mxu0 %v4284_v0 }
 0x199   :  { %2735 = vmatpush3.msra.mxu1 %v2712_v48  ;;  %1233 = vmatmul.mubr.f32.gmra.mxu0 %v853_v53 }
 0x19a   :  { %1072 = vmatmul.mubr.f32.gmra.mxu1 %v853_v53  ;;  %2736 = vmatprep.subr.mxu1 %v843_v49  ;;  %v1556_v53 = vld [vmem:[#allocation7 + $0x568] sm:$0xff] }
 0x19b   :  { %2737 = vmatpush3.msra.mxu1 %v843_v49  ;;  %1077 = vmatprep.mubr.f32.mxu1 %v4284_v0  ;;  %v1559_v49 = vld [vmem:[#allocation7 + $0x580] sm:$0xff] }
 0x19c   :  { %2738 = vmatprep.subr.mxu1 %v2709_v44  ;;  %1238 = vmatprep.mubr.f32.mxu0 %v4284_v0 }
 0x19d   :  { %2739 = vmatpush3.msra.mxu1 %v2709_v44  ;;  %1239 = vmatmul.mubr.f32.gmra.mxu0 %v2715_v52  ;;  %v1560_v44 = vld [vmem:[#allocation7 + $0x588] sm:$0xff] }
 0x19e   :  { %1078 = vmatmul.mubr.f32.gmra.mxu1 %v2715_v52  ;;  %2740 = vmatprep.subr.mxu1 %v833_v47  ;;  %v1561_v52 = vld [vmem:[#allocation7 + $0x590] sm:$0xff] }
 0x19f   :  { %2741 = vmatpush3.msra.mxu1 %v833_v47  ;;  %1083 = vmatprep.mubr.f32.mxu1 %v4284_v0  ;;  %v1562_v47 = vld [vmem:[#allocation7 + $0x598] sm:$0xff] }
 0x1a0   :  { %2742 = vmatprep.subr.mxu1 %v3571_v50  ;;  %1244 = vmatprep.mubr.f32.mxu0 %v4284_v0 }
 0x1a1   :  { %2743 = vmatpush3.msra.mxu1 %v3571_v50  ;;  %1245 = vmatmul.mubr.f32.gmra.mxu0 %v863_v54  ;;  %v1563_v50 = vld [vmem:[#allocation7 + $0x5a0] sm:$0xff] }
 0x1a2   :  { %1084 = vmatmul.mubr.f32.gmra.mxu1 %v863_v54  ;;  %2744 = vmatprep.subr.mxu1 %v3575_v43  ;;  %v1555_v54 = vld [vmem:[#allocation7 + $0x560] sm:$0xff] }
 0x1a3   :  { %2745 = vmatpush3.msra.mxu1 %v3575_v43  ;;  %1089 = vmatprep.mubr.f32.mxu1 %v4284_v0  ;;  %v1565_v43 = vld [vmem:[#allocation7 + $0x5b0] sm:$0xff] }
 0x1a4   :  { %2746 = vmatprep.subr.mxu1 %v3563_v41  ;;  %1250 = vmatprep.mubr.f32.mxu0 %v4284_v0 }
 0x1a5   :  { %2747 = vmatpush3.msra.mxu1 %v3563_v41  ;;  %1251 = vmatmul.mubr.f32.gmra.mxu0 %v2718_v46  ;;  %v1569_v41 = vld [vmem:[#allocation7 + $0x5d0] sm:$0xff] }
 0x1a6   :  { %1090 = vmatmul.mubr.f32.gmra.mxu1 %v2718_v46  ;;  %2748 = vmatprep.subr.mxu1 %v3567_v42  ;;  %v1558_v46 = vld [vmem:[#allocation7 + $0x578] sm:$0xff] }
 0x1a7   :  { %2749 = vmatpush3.msra.mxu1 %v3567_v42  ;;  %1095 = vmatprep.mubr.f32.mxu1 %v4284_v0  ;;  %v1566_v42 = vld [vmem:[#allocation7 + $0x5b8] sm:$0xff] }
 0x1a8   :  { %2750 = vmatprep.subr.mxu1 %v3557_v39  ;;  %1256 = vmatprep.mubr.f32.mxu0 %v4284_v0 }
 0x1a9   :  { %2751 = vmatpush3.msra.mxu1 %v3557_v39  ;;  %1257 = vmatmul.mubr.f32.gmra.mxu0 %v873_v38 }
 0x1aa   :  { %1096 = vmatmul.mubr.f32.gmra.mxu1 %v873_v38  ;;  %2752 = vmatprep.subr.mxu1 %v3559_v40  ;;  %v3633_v38 = vpop.f32.mrf.mxu1 }
 0x1ab   :  { %2753 = vmatpush3.msra.mxu1 %v3559_v40  ;;  %1101 = vmatprep.mubr.f32.mxu1 %v4284_v0 }
 0x1ac   :  { %1262 = vmatprep.mubr.f32.mxu0 %v4284_v0  ;;  %v3637_v39 = vpop.f32.mrf.mxu1 }
 0x1ad   :  { %1263 = vmatmul.mubr.f32.gmra.mxu0 %v3593_v56 }
 0x1ae   :  { %1102 = vmatmul.mubr.f32.gmra.mxu1 %v3593_v56  ;;  %1639 = vmatprep.mubr.f32.mxu0 %v4284_v0  ;;  %v3641_v40 = vpop.f32.mrf.mxu1  ;;  %v1557_v56 = vld [vmem:[#allocation7 + $0x570] sm:$0xff] }
 0x1af   :  { %2754 = vmatprep.mubr.f32.mxu1 %v3411_v15 }
 0x1b0   :  { %v3645_v15 = vpop.f32.mrf.mxu1 }
 0x1b2   :  { %2755 = vmatmul.mubr.f32.vlgmr.msra.gmra.mxu1 %v3415_v16  ;;  %v3649_v16 = vpop.f32.mrf.mxu1 }
 0x1b3   :  { %2757 = vmatprep.mubr.f32.mxu1 %v3417_v18 }
 0x1b4   :  { %v3653_v18 = vpop.f32.mrf.mxu1 }
 0x1b6   :  { %2758 = vmatmul.mubr.f32.gmra.mxu1 %v3421_v21  ;;  %v3657_v21 = vpop.f32.mrf.mxu1 }
 0x1b7   :  { %2760 = vmatprep.mubr.f32.mxu1 %v3424_v22 }
 0x1b8   :  { %v3660_v22 = vpop.f32.mrf.mxu1 }
 0x1ba   :  { %2761 = vmatmul.mubr.f32.gmra.mxu1 %v3429_v23  ;;  %v3663_v23 = vpop.f32.mrf.mxu1 }
 0x1bb   :  { %2763 = vmatprep.mubr.f32.mxu1 %v3432_v24  ;;  %v1572_v24 = vld [vmem:[#allocation7 + $0x5e8] sm:$0xff] }
 0x1bc   :  { %1575 = vmatprep.subr.mxu0 %v1572_v24  ;;  %v1552_v24 = vld [vmem:[#allocation7 + $0x548] sm:$0xff] }
 0x1be   :  { %2764 = vmatmul.mubr.f32.gmra.mxu1 %v3437_v25  ;;  %v1571_v25 = vld [vmem:[#allocation7 + $0x5e0] sm:$0xff] }
 0x1bf   :  { %2766 = vmatprep.mubr.f32.mxu1 %v3440_v26  ;;  %1576 = vmatpush1.msra.mxu0 %v1571_v25  ;;  %v3665_v26 = vpop.f32.mrf.mxu1  ;;  %v1554_v25 = vld [vmem:[#allocation7 + $0x558] sm:$0xff] }
 0x1c2   :  { %2767 = vmatmul.mubr.f32.gmra.mxu1 %v3445_v27  ;;  %v1568_v27 = vld [vmem:[#allocation7 + $0x5c8] sm:$0xff] }
 0x1c3   :  { %2769 = vmatprep.mubr.f32.mxu1 %v3448_v28  ;;  %1577 = vmatprep.subr.mxu0 %v1568_v27  ;;  %v1574_v28 = vld [vmem:[#allocation7 + $0x5f8] sm:$0xff] }
 0x1c4   :  { %1736 = vmatprep.subr.mxu1 %v1574_v28  ;;  %v1551_v28 = vld [vmem:[#allocation7 + $0x540] sm:$0xff] }
 0x1c6   :  { %2770 = vmatmul.mubr.f32.gmra.mxu1 %v3453_v29  ;;  %v1567_v29 = vld [vmem:[#allocation7 + $0x5c0] sm:$0xff] }
 0x1c7   :  { %2772 = vmatprep.mubr.f32.mxu1 %v3456_v30  ;;  %v1573_v30 = vld [vmem:[#allocation7 + $0x5f0] sm:$0xff]  ;;  %1578 = vmatpush1.msra.mxu0 %v1567_v29 }
 0x1c8   :  { %1737 = vmatpush1.msra.mxu1 %v1573_v30  ;;  %v1553_v29 = vld [vmem:[#allocation7 + $0x550] sm:$0xff]  ;;  %v1548_v30 = vld [vmem:[#allocation7 + $0x528] sm:$0xff] }
 0x1ca   :  { %2773 = vmatmul.mubr.f32.gmra.mxu1 %v3461_v31  ;;  %v1570_v31 = vld [vmem:[#allocation7 + $0x5d8] sm:$0xff] }
 0x1cb   :  { %2775 = vmatprep.mubr.f32.mxu1 %v3464_v32  ;;  %v3667_v32 = vpop.f32.mrf.mxu1  ;;  %1738 = vmatprep.subr.mxu1 %v1570_v31  ;;  %v1550_v31 = vld [vmem:[#allocation7 + $0x538] sm:$0xff] }
 0x1cc   :  { %1739 = vmatpush1.msra.mxu1 %v1569_v41  ;;  %v1549_v41 = vld [vmem:[#allocation7 + $0x530] sm:$0xff] }
 0x1cd   :  { %1740 = vmatprep.subr.mxu1 %v1566_v42  ;;  %v3669_v48 = vpop.f32.mrf.mxu1  ;;  %v1544_v42 = vld [vmem:[#allocation7 + $0x508] sm:$0xff] }
 0x1ce   :  { %2776 = vmatmul.mubr.f32.gmra.mxu1 %v3469_v33  ;;  %v1564_v33 = vld [vmem:[#allocation7 + $0x5a8] sm:$0xff] }
 0x1cf   :  { %1800 = vmatprep.mubr.f32.mxu1 %v4284_v0  ;;  %1579 = vmatprep.subr.mxu0 %v1564_v33  ;;  %v3671_v27 = vpop.f32.mrf.mxu1  ;;  %v1547_v33 = vld [vmem:[#allocation7 + $0x520] sm:$0xff]  ;;  %v225_v0 = vld [vmem:[#allocation10 + $0x10] sm:$0xff] }
 0x1d0   :  { %1580 = vmatpush1.msra.mxu0 %v1563_v50  ;;  %1741 = vmatpush1.msra.mxu1 %v1565_v43  ;;  %v1546_v50 = vld [vmem:[#allocation7 + $0x518] sm:$0xff]  ;;  %v675_v34 = vadd.f32 %v3633_v38, %v225_v0 }
 0x1d1   :  { %1581 = vmatprep.subr.mxu0 %v1560_v44  ;;  %1742 = vmatprep.subr.mxu1 %v1562_v47  ;;  %v3673_v43 = vpop.f32.mrf.mxu1  ;;  %v1543_v44 = vld [vmem:[#allocation7 + $0x500] sm:$0xff]  ;;  %v1545_v47 = vld [vmem:[#allocation7 + $0x510] sm:$0xff] }
 0x1d2   :  { %1582 = vmatpush1.msra.mxu0 %v1559_v49  ;;  %1743 = vmatpush1.msra.mxu1 %v1561_v52  ;;  %v1540_v49 = vld [vmem:[#allocation7 + $0x4e8] sm:$0xff]  ;;  %v1542_v52 = vld [vmem:[#allocation7 + $0x4f8] sm:$0xff] }
 0x1d3   :  { %1583 = vmatprep.subr.mxu0 %v1556_v53  ;;  %1744 = vmatprep.subr.mxu1 %v1558_v46  ;;  %v1539_v53 = vld [vmem:[#allocation7 + $0x4e0] sm:$0xff]  ;;  %v1541_v46 = vld [vmem:[#allocation7 + $0x4f0] sm:$0xff] }
 0x1d4   :  { %1584 = vmatpush1.msra.mxu0 %v1555_v54  ;;  %1745 = vmatpush1.msra.mxu1 %v1557_v56  ;;  %v1536_v54 = vld [vmem:[#allocation7 + $0x4c8] sm:$0xff]  ;;  %v1538_v56 = vld [vmem:[#allocation7 + $0x4d8] sm:$0xff] }
 0x1d5   :  { %1585 = vmatprep.subr.mxu0 %v1552_v24  ;;  %1746 = vmatprep.subr.mxu1 %v1554_v25  ;;  %v3675_v24 = vpop.f32.mrf.mxu1  ;;  %v1535_v25 = vld [vmem:[#allocation7 + $0x4c0] sm:$0xff] }
 0x1d6   :  { %1586 = vmatpush1.msra.mxu0 %v1551_v28  ;;  %1747 = vmatpush1.msra.mxu1 %v1553_v29  ;;  %v1537_v28 = vld [vmem:[#allocation7 + $0x4d0] sm:$0xff]  ;;  %v1532_v29 = vld [vmem:[#allocation7 + $0x4a8] sm:$0xff] }
 0x1d7   :  { %1587 = vmatprep.subr.mxu0 %v1548_v30  ;;  %1748 = vmatprep.subr.mxu1 %v1550_v31  ;;  %v1534_v30 = vld [vmem:[#allocation7 + $0x4b8] sm:$0xff]  ;;  %v1531_v31 = vld [vmem:[#allocation7 + $0x4a0] sm:$0xff] }
 0x1d8   :  { %1588 = vmatpush1.msra.mxu0 %v1547_v33  ;;  %1749 = vmatpush1.msra.mxu1 %v1549_v41  ;;  %v1533_v33 = vld [vmem:[#allocation7 + $0x4b0] sm:$0xff]  ;;  %v1528_v41 = vld [vmem:[#allocation7 + $0x488] sm:$0xff] }
 0x1d9   :  { %1589 = vmatprep.subr.mxu0 %v1544_v42  ;;  %1750 = vmatprep.subr.mxu1 %v1546_v50  ;;  %v1530_v42 = vld [vmem:[#allocation7 + $0x498] sm:$0xff]  ;;  %v3677_v50 = vpop.f32.mrf.mxu1 }
 0x1da   :  { %1590 = vmatpush1.msra.mxu0 %v1543_v44  ;;  %1751 = vmatpush1.msra.mxu1 %v1545_v47  ;;  %v1527_v44 = vld [vmem:[#allocation7 + $0x480] sm:$0xff]  ;;  %v1529_v47 = vld [vmem:[#allocation7 + $0x490] sm:$0xff] }
 0x1db   :  { %1591 = vmatprep.subr.mxu0 %v1540_v49  ;;  %1752 = vmatprep.subr.mxu1 %v1542_v52  ;;  %v1524_v49 = vld [vmem:[#allocation7 + $0x468] sm:$0xff]  ;;  %v1526_v52 = vld [vmem:[#allocation7 + $0x478] sm:$0xff] }
 0x1dc   :  { %1592 = vmatpush1.msra.mxu0 %v1539_v53  ;;  %1753 = vmatpush1.msra.mxu1 %v1541_v46  ;;  %v1523_v53 = vld [vmem:[#allocation7 + $0x460] sm:$0xff]  ;;  %v1525_v46 = vld [vmem:[#allocation7 + $0x470] sm:$0xff] }
 0x1dd   :  { %1593 = vmatprep.subr.mxu0 %v1536_v54  ;;  %1754 = vmatprep.subr.mxu1 %v1538_v56  ;;  %v1520_v54 = vld [vmem:[#allocation7 + $0x448] sm:$0xff]  ;;  %v1522_v56 = vld [vmem:[#allocation7 + $0x458] sm:$0xff] }
 0x1de   :  { %1594 = vmatpush1.msra.mxu0 %v1535_v25  ;;  %1755 = vmatpush1.msra.mxu1 %v1537_v28  ;;  %v3679_v25 = vpop.f32.mrf.mxu1  ;;  %v1519_v28 = vld [vmem:[#allocation7 + $0x440] sm:$0xff] }
 0x1df   :  { %1595 = vmatprep.subr.mxu0 %v1532_v29  ;;  %1756 = vmatprep.subr.mxu1 %v1534_v30  ;;  %v1521_v29 = vld [vmem:[#allocation7 + $0x450] sm:$0xff]  ;;  %v1516_v30 = vld [vmem:[#allocation7 + $0x428] sm:$0xff] }
 0x1e0   :  { %1596 = vmatpush1.msra.mxu0 %v1531_v31  ;;  %1757 = vmatpush1.msra.mxu1 %v1533_v33  ;;  %v1518_v31 = vld [vmem:[#allocation7 + $0x438] sm:$0xff]  ;;  %v1515_v33 = vld [vmem:[#allocation7 + $0x420] sm:$0xff] }
 0x1e1   :  { %1597 = vmatprep.subr.mxu0 %v1528_v41  ;;  %1758 = vmatprep.subr.mxu1 %v1530_v42  ;;  %v1517_v41 = vld [vmem:[#allocation7 + $0x430] sm:$0xff]  ;;  %v1512_v42 = vld [vmem:[#allocation7 + $0x408] sm:$0xff] }
 0x1e2   :  { %1598 = vmatpush1.msra.mxu0 %v1527_v44  ;;  %1759 = vmatpush1.msra.mxu1 %v1529_v47  ;;  %v1514_v44 = vld [vmem:[#allocation7 + $0x418] sm:$0xff]  ;;  %v3681_v47 = vpop.f32.mrf.mxu1 }
 0x1e3   :  { %1599 = vmatprep.subr.mxu0 %v1524_v49  ;;  %1760 = vmatprep.subr.mxu1 %v1526_v52  ;;  %v1511_v49 = vld [vmem:[#allocation7 + $0x400] sm:$0xff]  ;;  %v1513_v52 = vld [vmem:[#allocation7 + $0x410] sm:$0xff] }
 0x1e4   :  { %1600 = vmatpush1.msra.mxu0 %v1523_v53  ;;  %1761 = vmatpush1.msra.mxu1 %v1525_v46  ;;  %v3683_v53 = vpop.f32.mrf.mxu1 }
 0x1e5   :  { %1601 = vmatprep.subr.mxu0 %v1520_v54  ;;  %1762 = vmatprep.subr.mxu1 %v1522_v56 }
 0x1e6   :  { %1602 = vmatpush1.msra.mxu0 %v1519_v28  ;;  %1763 = vmatpush1.msra.mxu1 %v1521_v29  ;;  %v3685_v46 = vpop.f32.mrf.mxu1 }
 0x1e7   :  { %1603 = vmatprep.subr.mxu0 %v1516_v30  ;;  %1764 = vmatprep.subr.mxu1 %v1518_v31 }
 0x1e8   :  { %1604 = vmatpush1.msra.mxu0 %v1515_v33  ;;  %1765 = vmatpush1.msra.mxu1 %v1517_v41  ;;  %v3687_v54 = vpop.f32.mrf.mxu1 }
 0x1e9   :  { %1605 = vmatprep.subr.mxu0 %v1512_v42  ;;  %1766 = vmatprep.subr.mxu1 %v1514_v44 }
 0x1ea   :  { %1606 = vmatpush1.msra.mxu0 %v1511_v49  ;;  %1767 = vmatpush1.msra.mxu1 %v1513_v52  ;;  %v3689_v56 = vpop.f32.mrf.mxu1  ;;  %v223_v52 = vld [vmem:[#allocation10] sm:$0xff] }
 0x1eb   :  { %v673_v35 = vadd.f32 %v3493_v57, %v223_v52  ;;  %v677_v57 = vadd.f32 %v3497_v60, %v227_v20  ;;  %v234_v60 = vld [vmem:[#allocation10 + $0x58] sm:$0xff] }
 0x1ec   :  { %v3691_v28 = vpop.f32.mrf.mxu1 }
 0x1ee   :  { %v3693_v29 = vpop.f32.mrf.mxu1 }
 0x1ef   :  { %4296 = vst [vmem:[#allocation34_spill] sm:$0xff] %v3693_v29 }
 0x1f0   :  { %v3695_v30 = vpop.f32.mrf.mxu1 }
 0x1f1   :  { %4297 = vst [vmem:[#allocation35_spill] sm:$0xff] %v3695_v30  ;;  %v228_v30 = vld [vmem:[#allocation10 + $0x28] sm:$0xff] }
 0x1f2   :  { %v3697_v31 = vpop.f32.mrf.mxu1 }
 0x1f3   :  { %4298 = vst [vmem:[#allocation36_spill] sm:$0xff] %v3697_v31 }
 0x1f4   :  { %v3699_v33 = vpop.f32.mrf.mxu1 }
 0x1f5   :  { %4299 = vst [vmem:[#allocation37_spill] sm:$0xff] %v3699_v33  ;;  %v229_v33 = vld [vmem:[#allocation10 + $0x30] sm:$0xff] }
 0x1f6   :  { %v3701_v41 = vpop.f32.mrf.mxu1  ;;  %v679_v0 = vadd.f32 %v3641_v40, %v229_v33 }
 0x1f7   :  { %4300 = vst [vmem:[#allocation38_spill] sm:$0xff] %v3701_v41 }
 0x1f8   :  { %v3703_v42 = vpop.f32.mrf.mxu1 }
 0x1f9   :  { %4301 = vst [vmem:[#allocation39_spill] sm:$0xff] %v3703_v42  ;;  %v674_v42 = vadd.f32 %v3495_v58, %v224_v37  ;;  %v233_v58 = vld [vmem:[#allocation10 + $0x50] sm:$0xff] }
 0x1fa   :  { %v3705_v44 = vpop.f32.mrf.mxu1 }
 0x1fb   :  { %4302 = vst [vmem:[#allocation40_spill] sm:$0xff] %v3705_v44  ;;  %v676_v44 = vadd.f32 %v3637_v39, %v226_v36 }
 0x1fc   :  { %v3707_v49 = vpop.f32.mrf.mxu1 }
 0x1fd   :  { %4303 = vst [vmem:[#allocation41_spill] sm:$0xff] %v3707_v49 }
 0x1fe   :  { %v3709_v51 = vpop.f32.mrf.mxu1 }
 0x1ff   :  { %4304 = vst [vmem:[#allocation42_spill] sm:$0xff] %v3709_v51 }
 0x231   :  { %v1013_v31 = vpop.f32.mrf.mxu1  ;;  %v1174_v41 = vpop.f32.mrf.mxu0 }
 0x232   :  { %v3715_v19 = vadd.f32 %v1013_v31, %v673_v35  ;;  %v3717_v49 = vadd.f32 %v1174_v41, %v675_v34  ;;  %v678_v35 = vadd.f32 %v3499_v45, %v228_v30  ;;  %v680_v34 = vadd.f32 %v3645_v15, %v230_v17  ;;  %v232_v41 = vld [vmem:[#allocation10 + $0x48] sm:$0xff]  ;;  %v237_v45 = vld [vmem:[#allocation10 + $0x70] sm:$0xff] }
 0x233   :  { %v1015_v29 = vpop.f32.mrf.mxu1  ;;  %v1176_v51 = vpop.f32.mrf.mxu0  ;;  %v682_v15 = vadd.f32 %v3503_v62, %v232_v41  ;;  %v241_v62 = vld [vmem:[#allocation10 + $0x90] sm:$0xff] }
 0x234   :  { %v3721_v38 = vadd.f32 %v1015_v29, %v674_v42  ;;  %v3723_v52 = vadd.f32 %v1176_v51, %v676_v44  ;;  %v681_v29 = vadd.f32 %v3501_v61, %v231_v14  ;;  %v683_v51 = vadd.f32 %v3649_v16, %v233_v58  ;;  %v235_v44 = vld [vmem:[#allocation10 + $0x60] sm:$0xff]  ;;  %v238_v61 = vld [vmem:[#allocation10 + $0x78] sm:$0xff] }
 0x235   :  { %v1019_v37 = vpop.f32.mrf.mxu1  ;;  %v1180_v36 = vpop.f32.mrf.mxu0  ;;  %v685_v58 = vadd.f32 %v3505_v63, %v235_v44  ;;  %v242_v63 = vld [vmem:[#allocation10 + $0x98] sm:$0xff] }
 0x236   :  { %v3727_v39 = vadd.f32 %v1019_v37, %v677_v57  ;;  %v3729_v31 = vadd.f32 %v1180_v36, %v679_v0  ;;  %v684_v57 = vadd.f32 %v3653_v18, %v234_v60  ;;  %v236_v36 = vld [vmem:[#allocation10 + $0x68] sm:$0xff] }
 0x237   :  { %v1021_v20 = vpop.f32.mrf.mxu1  ;;  %v1182_v40 = vpop.f32.mrf.mxu0  ;;  %v686_v60 = vadd.f32 %v3507_v1, %v236_v36  ;;  %v245_v1 = vld [vmem:[#allocation10 + $0xb0] sm:$0xff] }
 0x238   :  { %v3733_v33 = vadd.f32 %v1021_v20, %v678_v35  ;;  %v3735_v42 = vadd.f32 %v1182_v40, %v680_v34  ;;  %v687_v35 = vadd.f32 %v3657_v21, %v237_v45  ;;  %v239_v40 = vld [vmem:[#allocation10 + $0x80] sm:$0xff] }
 0x239   :  { %v1025_v30 = vpop.f32.mrf.mxu1  ;;  %v1186_v17 = vpop.f32.mrf.mxu0  ;;  %v689_v45 = vadd.f32 %v3509_v2, %v239_v40  ;;  %v246_v2 = vld [vmem:[#allocation10 + $0xb8] sm:$0xff] }
 0x23a   :  { %v3739_v0 = vadd.f32 %v1025_v30, %v681_v29  ;;  %v3741_v37 = vadd.f32 %v1186_v17, %v683_v51  ;;  %v688_v29 = vadd.f32 %v3660_v22, %v238_v61  ;;  %v240_v17 = vld [vmem:[#allocation10 + $0x88] sm:$0xff] }
 0x23b   :  { %v1027_v14 = vpop.f32.mrf.mxu1  ;;  %v1188_v16 = vpop.f32.mrf.mxu0  ;;  %v690_v61 = vadd.f32 %v3511_v3, %v240_v17  ;;  %v249_v3 = vld [vmem:[#allocation10 + $0xd0] sm:$0xff] }
 0x23c   :  { %v3745_v34 = vadd.f32 %v1027_v14, %v682_v15  ;;  %v3747_v20 = vadd.f32 %v1188_v16, %v684_v57  ;;  %v691_v15 = vadd.f32 %v3663_v23, %v241_v62  ;;  %v243_v16 = vld [vmem:[#allocation10 + $0xa0] sm:$0xff] }
 0x23d   :  { %v1031_v41 = vpop.f32.mrf.mxu1  ;;  %v1192_v18 = vpop.f32.mrf.mxu0  ;;  %v693_v62 = vadd.f32 %v3513_v59, %v243_v16  ;;  %v250_v59 = vld [vmem:[#allocation10 + $0xd8] sm:$0xff] }
 0x23e   :  { %v3751_v51 = vadd.f32 %v1031_v41, %v685_v58  ;;  %v3753_v30 = vadd.f32 %v1192_v18, %v687_v35  ;;  %v692_v58 = vadd.f32 %v3665_v26, %v242_v63  ;;  %v244_v18 = vld [vmem:[#allocation10 + $0xa8] sm:$0xff] }
 0x23f   :  { %v1033_v44 = vpop.f32.mrf.mxu1  ;;  %v1194_v21 = vpop.f32.mrf.mxu0  ;;  %v694_v63 = vadd.f32 %v3515_v4, %v244_v18  ;;  %v253_v4 = vld [vmem:[#allocation10 + $0xf0] sm:$0xff] }
 0x240   :  { %v3757_v57 = vadd.f32 %v1033_v44, %v686_v60  ;;  %v3759_v14 = vadd.f32 %v1194_v21, %v688_v29  ;;  %v695_v60 = vadd.f32 %v3667_v32, %v245_v1  ;;  %v247_v21 = vld [vmem:[#allocation10 + $0xc0] sm:$0xff] }
 0x241   :  { %v1037_v36 = vpop.f32.mrf.mxu1  ;;  %v1198_v22 = vpop.f32.mrf.mxu0  ;;  %v697_v1 = vadd.f32 %v3517_v5, %v247_v21  ;;  %v254_v5 = vld [vmem:[#allocation10 + $0xf8] sm:$0xff] }
 0x242   :  { %v3763_v35 = vadd.f32 %v1037_v36, %v689_v45  ;;  %v3765_v41 = vadd.f32 %v1198_v22, %v691_v15  ;;  %v696_v45 = vadd.f32 %v3669_v48, %v246_v2  ;;  %v248_v22 = vld [vmem:[#allocation10 + $0xc8] sm:$0xff] }
 0x243   :  { %v1039_v40 = vpop.f32.mrf.mxu1  ;;  %v1200_v23 = vpop.f32.mrf.mxu0  ;;  %v698_v2 = vadd.f32 %v3519_v6, %v248_v22 }
 0x244   :  { %v3769_v29 = vadd.f32 %v1039_v40, %v690_v61  ;;  %v3771_v44 = vadd.f32 %v1200_v23, %v692_v58  ;;  %v699_v61 = vadd.f32 %v3671_v27, %v249_v3  ;;  %v251_v23 = vld [vmem:[#allocation10 + $0xe0] sm:$0xff] }
 0x245   :  { %v1043_v17 = vpop.f32.mrf.mxu1  ;;  %v1204_v26 = vpop.f32.mrf.mxu0  ;;  %v701_v3 = vadd.f32 %v3521_v7, %v251_v23 }
 0x246   :  { %v3775_v15 = vadd.f32 %v1043_v17, %v693_v62  ;;  %v3777_v36 = vadd.f32 %v1204_v26, %v695_v60  ;;  %v700_v62 = vadd.f32 %v3673_v43, %v250_v59  ;;  %v252_v26 = vld [vmem:[#allocation10 + $0xe8] sm:$0xff]  ;;  %v255_v59 = vld [vmem:[#allocation10 + $0x100] sm:$0xff] }
 0x247   :  { %v1045_v16 = vpop.f32.mrf.mxu1  ;;  %v1206_v32 = vpop.f32.mrf.mxu0  ;;  %v702_v43 = vadd.f32 %v3523_v8, %v252_v26  ;;  %v261_v8 = vld [vmem:[#allocation10 + $0x130] sm:$0xff] }
 0x248   :  { %v3781_v58 = vadd.f32 %v1045_v16, %v694_v63  ;;  %v3783_v40 = vadd.f32 %v1206_v32, %v696_v45  ;;  %v703_v63 = vadd.f32 %v3675_v24, %v253_v4  ;;  %v257_v32 = vld [vmem:[#allocation10 + $0x110] sm:$0xff]  ;;  %v256_v24 = vld [vmem:[#allocation10 + $0x108] sm:$0xff] }
 0x249   :  { %v1049_v18 = vpop.f32.mrf.mxu1  ;;  %v1210_v48 = vpop.f32.mrf.mxu0  ;;  %v707_v4 = vadd.f32 %v3679_v25, %v257_v32  ;;  %v260_v32 = vld [vmem:[#allocation10 + $0x128] sm:$0xff] }
 0x24a   :  { %v3787_v60 = vadd.f32 %v1049_v18, %v697_v1  ;;  %v3789_v17 = vadd.f32 %v1210_v48, %v699_v61  ;;  %v704_v1 = vadd.f32 %v3677_v50, %v254_v5  ;;  %v258_v48 = vld [vmem:[#allocation10 + $0x118] sm:$0xff] }
 0x24b   :  { %v1051_v21 = vpop.f32.mrf.mxu1  ;;  %v1212_v27 = vpop.f32.mrf.mxu0  ;;  %v708_v50 = vadd.f32 %v3681_v47, %v258_v48  ;;  %v263_v48 = vld [vmem:[#allocation10 + $0x140] sm:$0xff] }
 0x24c   :  { %v3793_v45 = vadd.f32 %v1051_v21, %v698_v2  ;;  %v3795_v16 = vadd.f32 %v1212_v27, %v700_v62  ;;  %v705_v21 = vadd.f32 %v3525_v9, %v255_v59  ;;  %v259_v27 = vld [vmem:[#allocation10 + $0x120] sm:$0xff]  ;;  %v265_v59 = vld [vmem:[#allocation10 + $0x150] sm:$0xff] }
 0x24d   :  { %v1055_v6 = vpop.f32.mrf.mxu1  ;;  %v1216_v22 = vpop.f32.mrf.mxu0  ;;  %v709_v9 = vadd.f32 %v3529_v11, %v259_v27 }
 0x24e   :  { %4305 = vst [vmem:[#allocation43_spill] sm:$0xff] %v3795_v16  ;;  %v3799_v61 = vadd.f32 %v1055_v6, %v701_v3  ;;  %v3801_v18 = vadd.f32 %v1216_v22, %v703_v63  ;;  %v706_v63 = vadd.f32 %v3527_v10, %v256_v24  ;;  %v262_v6 = vld [vmem:[#allocation10 + $0x138] sm:$0xff] }
 0x24f   :  { %v1057_v7 = vpop.f32.mrf.mxu1  ;;  %v1218_v23 = vpop.f32.mrf.mxu0 }
 0x250   :  { %v3804_v2 = vadd.f32 %v1057_v7, %v702_v43  ;;  %v3806_v62 = vadd.f32 %v1218_v23, %v704_v1  ;;  %v711_v43 = vadd.f32 %v3683_v53, %v261_v8  ;;  %v264_v8 = vld [vmem:[#allocation10 + $0x148] sm:$0xff] }
 0x251   :  { %v1222_v26 = vpop.f32.mrf.mxu0 }
 0x252   :  { %4306 = vst [vmem:[#allocation44_spill] sm:$0xff] %v3806_v62  ;;  %v1061_v5 = vpop.f32.mrf.mxu1  ;;  %v3810_v3 = vadd.f32 %v1222_v26, %v707_v4  ;;  %v712_v4 = vadd.f32 %v3685_v46, %v262_v6  ;;  %v266_v26 = vld [vmem:[#allocation10 + $0x158] sm:$0xff]  ;;  %v267_v6 = vld [vmem:[#allocation10 + $0x160] sm:$0xff] }
 0x253   :  { %v3813_v22 = vadd.f32 %v1061_v5, %v705_v21  ;;  %v1224_v25 = vpop.f32.mrf.mxu0  ;;  %v710_v21 = vadd.f32 %v3531_v12, %v260_v32 }
 0x254   :  { %v1063_v1 = vpop.f32.mrf.mxu1  ;;  %v3816_v7 = vadd.f32 %v1224_v25, %v708_v50  ;;  %v715_v50 = vadd.f32 %v3687_v54, %v265_v59  ;;  %v269_v25 = vld [vmem:[#allocation10 + $0x170] sm:$0xff]  ;;  %v268_v59 = vld [vmem:[#allocation10 + $0x168] sm:$0xff] }
 0x255   :  { %v3819_v23 = vadd.f32 %v1063_v1, %v706_v63  ;;  %v1228_v47 = vpop.f32.mrf.mxu0  ;;  %v713_v63 = vadd.f32 %v3533_v55, %v263_v48 }
 0x256   :  { %4307 = vst [vmem:[#allocation45_spill] sm:$0xff] %v3816_v7  ;;  %v1067_v10 = vpop.f32.mrf.mxu1  ;;  %v3822_v24 = vadd.f32 %v1228_v47, %v711_v43  ;;  %v716_v43 = vadd.f32 %v3689_v56, %v266_v26  ;;  %v270_v47 = vld [vmem:[#allocation10 + $0x178] sm:$0xff]  ;;  %v271_v26 = vld [vmem:[#allocation10 + $0x180] sm:$0xff] }
 0x257   :  { %v3825_v5 = vadd.f32 %v1067_v10, %v709_v9  ;;  %v1230_v53 = vpop.f32.mrf.mxu0  ;;  %v714_v9 = vadd.f32 %v3535_v13, %v264_v8  ;;  %v274_v7 = vld [vmem:[#allocation10 + $0x198] sm:$0xff] }
 0x258   :  { %4308 = vst [vmem:[#allocation46_spill] sm:$0xff] %v3822_v24  ;;  %v1069_v11 = vpop.f32.mrf.mxu1  ;;  %v3828_v27 = vadd.f32 %v1230_v53, %v712_v4  ;;  %v719_v4 = vadd.f32 %v3691_v28, %v269_v25  ;;  %v272_v25 = vld [vmem:[#allocation10 + $0x188] sm:$0xff] }
 0x259   :  { %v3831_v1 = vadd.f32 %v1069_v11, %v710_v21  ;;  %v1234_v46 = vpop.f32.mrf.mxu0  ;;  %v4312_v21 = vld [vmem:[#allocation24_spill] sm:$0xff]  ;;  %v273_v11 = vld [vmem:[#allocation10 + $0x190] sm:$0xff] }
 0x25a   :  { %4309 = vst [vmem:[#allocation47_spill] sm:$0xff] %v3828_v27  ;;  %v1073_v12 = vpop.f32.mrf.mxu1  ;;  %v3834_v32 = vadd.f32 %v1234_v46, %v715_v50  ;;  %v717_v53 = vadd.f32 %v4312_v21, %v267_v6  ;;  %v4314_v50 = vld [vmem:[#allocation34_spill] sm:$0xff] }
 0x25b   :  { %v3837_v10 = vadd.f32 %v1073_v12, %v713_v63  ;;  %v1236_v54 = vpop.f32.mrf.mxu0  ;;  %v720_v46 = vadd.f32 %v4314_v50, %v270_v47  ;;  %v4316_v63 = vld [vmem:[#allocation25_spill] sm:$0xff] }
 0x25c   :  { %4310 = vst [vmem:[#allocation48_spill] sm:$0xff] %v3834_v32  ;;  %v1075_v55 = vpop.f32.mrf.mxu1  ;;  %v3840_v48 = vadd.f32 %v1236_v54, %v716_v43  ;;  %v718_v12 = vadd.f32 %v4316_v63, %v268_v59  ;;  %v4318_v43 = vld [vmem:[#allocation35_spill] sm:$0xff] }
 0x25d   :  { %v3843_v27 = vadd.f32 %v1075_v55, %v714_v9  ;;  %v1240_v56 = vpop.f32.mrf.mxu0  ;;  %v723_v54 = vadd.f32 %v4318_v43, %v273_v11  ;;  %v4320_v9 = vld [vmem:[#allocation26_spill] sm:$0xff] }
 0x25e   :  { %4311 = vst [vmem:[#allocation49_spill] sm:$0xff] %v3840_v48  ;;  %v1079_v13 = vpop.f32.mrf.mxu1  ;;  %v3846_v8 = vadd.f32 %v1240_v56, %v719_v4  ;;  %v721_v55 = vadd.f32 %v4320_v9, %v271_v26  ;;  %v277_v48 = vld [vmem:[#allocation10 + $0x1b0] sm:$0xff]  ;;  %v275_v4 = vld [vmem:[#allocation10 + $0x1a0] sm:$0xff] }
 0x25f   :  { %4313 = vst [vmem:[#allocation24_spill] sm:$0xff] %v3843_v27  ;;  %v3849_v32 = vadd.f32 %v1079_v13, %v717_v53  ;;  %v1242_v28 = vpop.f32.mrf.mxu0  ;;  %v4322_v56 = vld [vmem:[#allocation36_spill] sm:$0xff]  ;;  %v4324_v53 = vld [vmem:[#allocation27_spill] sm:$0xff] }
 0x260   :  { %4315 = vst [vmem:[#allocation34_spill] sm:$0xff] %v3846_v8  ;;  %v1081_v6 = vpop.f32.mrf.mxu1  ;;  %v3852_v21 = vadd.f32 %v1242_v28, %v720_v46  ;;  %v724_v50 = vadd.f32 %v4322_v56, %v274_v7  ;;  %v722_v13 = vadd.f32 %v4324_v53, %v272_v25  ;;  %v278_v8 = vld [vmem:[#allocation10 + $0x1b8] sm:$0xff]  ;;  %v276_v46 = vld [vmem:[#allocation10 + $0x1a8] sm:$0xff] }
 0x261   :  { %4317 = vst [vmem:[#allocation25_spill] sm:$0xff] %v3849_v32  ;;  %v3855_v62 = vadd.f32 %v1081_v6, %v718_v12  ;;  %v1246_v47 = vpop.f32.mrf.mxu0  ;;  %v4326_v28 = vld [vmem:[#allocation37_spill] sm:$0xff]  ;;  %v4328_v12 = vld [vmem:[#allocation28_spill] sm:$0xff] }
 0x262   :  { %4319 = vst [vmem:[#allocation35_spill] sm:$0xff] %v3852_v21  ;;  %v1085_v59 = vpop.f32.mrf.mxu1  ;;  %v3858_v63 = vadd.f32 %v1246_v47, %v723_v54  ;;  %v727_v43 = vadd.f32 %v4326_v28, %v277_v48  ;;  %v725_v6 = vadd.f32 %v4328_v12, %v275_v4  ;;  %v281_v21 = vld [vmem:[#allocation10 + $0x1d0] sm:$0xff]  ;;  %v279_v54 = vld [vmem:[#allocation10 + $0x1c0] sm:$0xff] }
 0x263   :  { %4321 = vst [vmem:[#allocation26_spill] sm:$0xff] %v3855_v62  ;;  %v3861_v16 = vadd.f32 %v1085_v59, %v721_v55  ;;  %v1248_v11 = vpop.f32.mrf.mxu0  ;;  %v4330_v47 = vld [vmem:[#allocation38_spill] sm:$0xff]  ;;  %v4332_v55 = vld [vmem:[#allocation29_spill] sm:$0xff] }
 0x264   :  { %4323 = vst [vmem:[#allocation36_spill] sm:$0xff] %v3858_v63  ;;  %v1087_v26 = vpop.f32.mrf.mxu1  ;;  %v3864_v9 = vadd.f32 %v1248_v11, %v724_v50  ;;  %v728_v56 = vadd.f32 %v4330_v47, %v278_v8  ;;  %v726_v59 = vadd.f32 %v4332_v55, %v276_v46  ;;  %v282_v63 = vld [vmem:[#allocation10 + $0x1d8] sm:$0xff]  ;;  %v280_v50 = vld [vmem:[#allocation10 + $0x1c8] sm:$0xff] }
 0x265   :  { %4325 = vst [vmem:[#allocation27_spill] sm:$0xff] %v3861_v16  ;;  %v3867_v62 = vadd.f32 %v1087_v26, %v722_v13  ;;  %v1252_v7 = vpop.f32.mrf.mxu0  ;;  %v4334_v11 = vld [vmem:[#allocation39_spill] sm:$0xff]  ;;  %v4336_v13 = vld [vmem:[#allocation30_spill] sm:$0xff] }
 0x266   :  { %4327 = vst [vmem:[#allocation37_spill] sm:$0xff] %v3864_v9  ;;  %v1091_v25 = vpop.f32.mrf.mxu1  ;;  %v3870_v53 = vadd.f32 %v1252_v7, %v727_v43  ;;  %v731_v28 = vadd.f32 %v4334_v11, %v281_v21  ;;  %v729_v26 = vadd.f32 %v4336_v13, %v279_v54  ;;  %v285_v9 = vld [vmem:[#allocation10 + $0x1f0] sm:$0xff]  ;;  %v283_v43 = vld [vmem:[#allocation10 + $0x1e0] sm:$0xff]  ;;  %v284_v11 = vld [vmem:[#allocation10 + $0x1e8] sm:$0xff] }
 0x267   :  { %4329 = vst [vmem:[#allocation28_spill] sm:$0xff] %v3867_v62  ;;  %v3873_v16 = vadd.f32 %v1091_v25, %v725_v6  ;;  %v1254_v48 = vpop.f32.mrf.mxu0  ;;  %v4338_v7 = vld [vmem:[#allocation40_spill] sm:$0xff]  ;;  %v4340_v6 = vld [vmem:[#allocation31_spill] sm:$0xff] }
 0x268   :  { %4331 = vst [vmem:[#allocation38_spill] sm:$0xff] %v3870_v53  ;;  %v1093_v4 = vpop.f32.mrf.mxu1  ;;  %v3876_v12 = vadd.f32 %v1254_v48, %v728_v56  ;;  %v732_v47 = vadd.f32 %v4338_v7, %v282_v63  ;;  %v730_v25 = vadd.f32 %v4340_v6, %v280_v50  ;;  %v4342_v56 = vld [vmem:[#allocation41_spill] sm:$0xff] }
 0x269   :  { %4333 = vst [vmem:[#allocation29_spill] sm:$0xff] %v3873_v16  ;;  %v3879_v62 = vadd.f32 %v1093_v4, %v726_v59  ;;  %v1258_v8 = vpop.f32.mrf.mxu0  ;;  %v735_v48 = vadd.f32 %v4342_v56, %v285_v9  ;;  %v4344_v59 = vld [vmem:[#allocation32_spill] sm:$0xff] }
 0x26a   :  { %4335 = vst [vmem:[#allocation39_spill] sm:$0xff] %v3876_v12  ;;  %v1097_v46 = vpop.f32.mrf.mxu1  ;;  %v3882_v55 = vadd.f32 %v1258_v8, %v731_v28  ;;  %v733_v4 = vadd.f32 %v4344_v59, %v283_v43  ;;  %v4347_v28 = vld [vmem:[#allocation33_spill] sm:$0xff] }
 0x26b   :  { %4337 = vst [vmem:[#allocation30_spill] sm:$0xff] %v3879_v62  ;;  %v3885_v53 = vadd.f32 %v1097_v46, %v729_v26  ;;  %v1260_v21 = vpop.f32.mrf.mxu0  ;;  %v734_v8 = vadd.f32 %v4347_v28, %v284_v11 }
 0x26c   :  { %4339 = vst [vmem:[#allocation40_spill] sm:$0xff] %v3882_v55  ;;  %v1099_v12 = vpop.f32.mrf.mxu1  ;;  %v3888_v54 = vadd.f32 %v1260_v21, %v732_v47 }
 0x26d   :  { %4341 = vst [vmem:[#allocation31_spill] sm:$0xff] %v3885_v53  ;;  %v3891_v13 = vadd.f32 %v1099_v12, %v730_v25  ;;  %v1264_v62 = vpop.f32.mrf.mxu0  ;;  %v4350_v25 = vmov 0.0   ;;  %v3968_v53 = vld [vmem:[#allocation13 + $0x18] sm:$0xff] }
 0x26e   :  { %4343 = vst [vmem:[#allocation41_spill] sm:$0xff] %v3888_v54  ;;  %v1103_v63 = vpop.f32.mrf.mxu1  ;;  %v3893_v7 = vadd.f32 %v1264_v62, %v735_v48  ;;  %v3047_v54 = vld [vmem:[#allocation12] sm:$0xff]  ;;  %v3048_v62 = vld [vmem:[#allocation12 + $0x8] sm:$0xff] }
 0x26f   :  { %4345 = vst [vmem:[#allocation32_spill] sm:$0xff] %v3891_v13  ;;  %v3896_v50 = vadd.f32 %v1103_v63, %v733_v4  ;;  %v3049_v63 = vld [vmem:[#allocation12 + $0x10] sm:$0xff] }
 0x270   :  { %4346 = vst [vmem:[#allocation50_spill] sm:$0xff] %v3893_v7  ;;  %v1105_v26 = vpop.f32.mrf.mxu1 }
 0x271   :  { %4348 = vst [vmem:[#allocation33_spill] sm:$0xff] %v3896_v50  ;;  %v3898_v46 = vadd.f32 %v1105_v26, %v734_v8  ;;  %v3050_v8 = vld [vmem:[#allocation12 + $0x18] sm:$0xff] }
 0x272   :  { %v2756_v6 = vpop.f32.mrf.mxu1 }
 0x273   :  { %4349 = vst [vmem:[#allocation51_spill] sm:$0xff] %v3898_v46  ;;  %v1479_v21 = vmul.f32 2.0, %v2756_v6 }
 0x274   :  { %v1399_v9 = vpop.f32.mrf.mxu1 }
 0x275   :  { %v1478_v56 = vmul.f32 2.0, %v1399_v9  ;;  %v1495_v11 = vsub.f32 %v1479_v21, %v3048_v62 }
 0x276   :  { %v2759_v47 = vpop.f32.mrf.mxu1 }
 0x277   :  { %v1494_v43 = vsub.f32 %v1478_v56, %v3047_v54  ;;  %v1481_v4 = vmul.f32 2.0, %v2759_v47  ;;  %v3051_v47 = vld [vmem:[#allocation12 + $0x20] sm:$0xff] }
 0x278   :  { %v1409_v12 = vpop.f32.mrf.mxu1 }
 0x279   :  { %1640 = vmatmul.mubr.f32.vlgmr.msra.gmra.mxu0 %v1494_v43  ;;  %1801 = vmatmul.mubr.f32.vlgmr.msra.gmra.mxu1 %v1494_v43  ;;  %v1480_v48 = vmul.f32 2.0, %v1409_v12  ;;  %v1497_v26 = vsub.f32 %v1481_v4, %v3050_v8  ;;  %v3052_v12 = vld [vmem:[#allocation12 + $0x28] sm:$0xff]  ;;  %v3053_v4 = vld [vmem:[#allocation12 + $0x30] sm:$0xff] }
 0x27a   :  { %1645 = vmatprep.mubr.f32.mxu0 %v4350_v25  ;;  %1806 = vmatprep.mubr.f32.mxu1 %v4350_v25  ;;  %v2762_v59 = vpop.f32.mrf.mxu1 }
 0x27b   :  { %v1496_v54 = vsub.f32 %v1480_v48, %v3049_v63  ;;  %v1483_v56 = vmul.f32 2.0, %v2762_v59 }
 0x27c   :  { %v1419_v28 = vpop.f32.mrf.mxu1 }
 0x27d   :  { %1646 = vmatmul.mubr.f32.gmra.mxu0 %v1495_v11  ;;  %1807 = vmatmul.mubr.f32.gmra.mxu1 %v1495_v11  ;;  %v1482_v6 = vmul.f32 2.0, %v1419_v28  ;;  %v1499_v62 = vsub.f32 %v1483_v56, %v3052_v12  ;;  %v3054_v28 = vld [vmem:[#allocation12 + $0x38] sm:$0xff]  ;;  %v3055_v56 = vld [vmem:[#allocation12 + $0x40] sm:$0xff] }
 0x27e   :  { %1651 = vmatprep.mubr.f32.mxu0 %v4350_v25  ;;  %1812 = vmatprep.mubr.f32.mxu1 %v4350_v25  ;;  %v2765_v9 = vpop.f32.mrf.mxu1 }
 0x27f   :  { %v1498_v21 = vsub.f32 %v1482_v6, %v3051_v47  ;;  %v1485_v59 = vmul.f32 2.0, %v2765_v9 }
 0x280   :  { %v1429_v43 = vpop.f32.mrf.mxu1 }
 0x281   :  { %1652 = vmatmul.mubr.f32.gmra.mxu0 %v1496_v54  ;;  %1813 = vmatmul.mubr.f32.gmra.mxu1 %v1496_v54  ;;  %v1484_v11 = vmul.f32 2.0, %v1429_v43  ;;  %v1501_v8 = vsub.f32 %v1485_v59, %v3054_v28  ;;  %v3056_v43 = vld [vmem:[#allocation12 + $0x48] sm:$0xff]  ;;  %v3057_v59 = vld [vmem:[#allocation12 + $0x50] sm:$0xff] }
 0x282   :  { %1657 = vmatprep.mubr.f32.mxu0 %v4350_v25  ;;  %1818 = vmatprep.mubr.f32.mxu1 %v4350_v25  ;;  %v2768_v48 = vpop.f32.mrf.mxu1 }
 0x283   :  { %v1500_v63 = vsub.f32 %v1484_v11, %v3053_v4  ;;  %v1487_v9 = vmul.f32 2.0, %v2768_v48 }
 0x284   :  { %v1439_v54 = vpop.f32.mrf.mxu1 }
 0x285   :  { %1658 = vmatmul.mubr.f32.gmra.mxu0 %v1497_v26  ;;  %1819 = vmatmul.mubr.f32.gmra.mxu1 %v1497_v26  ;;  %v1486_v26 = vmul.f32 2.0, %v1439_v54  ;;  %v1503_v12 = vsub.f32 %v1487_v9, %v3056_v43  ;;  %v3058_v54 = vld [vmem:[#allocation12 + $0x58] sm:$0xff]  ;;  %v3059_v9 = vld [vmem:[#allocation12 + $0x60] sm:$0xff] }
 0x286   :  { %1663 = vmatprep.mubr.f32.mxu0 %v4350_v25  ;;  %1824 = vmatprep.mubr.f32.mxu1 %v4350_v25  ;;  %v2771_v6 = vpop.f32.mrf.mxu1 }
 0x287   :  { %v1502_v47 = vsub.f32 %v1486_v26, %v3055_v56  ;;  %v1489_v48 = vmul.f32 2.0, %v2771_v6 }
 0x289   :  { %1664 = vmatmul.mubr.f32.gmra.mxu0 %v1498_v21  ;;  %1825 = vmatmul.mubr.f32.gmra.mxu1 %v1498_v21  ;;  %v1449_v21 = vpop.f32.mrf.mxu1  ;;  %v1505_v28 = vsub.f32 %v1489_v48, %v3058_v54 }
 0x28a   :  { %1669 = vmatprep.mubr.f32.mxu0 %v4350_v25  ;;  %1830 = vmatprep.mubr.f32.mxu1 %v4350_v25 }
 0x28b   :  { %v2774_v11 = vpop.f32.mrf.mxu1 }
 0x28c   :  { %v1491_v6 = vmul.f32 2.0, %v2774_v11  ;;  %v3061_v11 = vld [vmem:[#allocation12 + $0x70] sm:$0xff] }
 0x28d   :  { %1670 = vmatmul.mubr.f32.gmra.mxu0 %v1499_v62  ;;  %1831 = vmatmul.mubr.f32.gmra.mxu1 %v1499_v62  ;;  %v1488_v62 = vmul.f32 2.0, %v1449_v21  ;;  %v3060_v21 = vld [vmem:[#allocation12 + $0x68] sm:$0xff] }
 0x28e   :  { %1675 = vmatprep.mubr.f32.mxu0 %v4350_v25  ;;  %1836 = vmatprep.mubr.f32.mxu1 %v4350_v25  ;;  %v1507_v43 = vsub.f32 %v1491_v6, %v3060_v21 }
 0x28f   :  { %v1504_v4 = vsub.f32 %v1488_v62, %v3057_v59  ;;  %v3062_v59 = vld [vmem:[#allocation12 + $0x78] sm:$0xff] }
 0x291   :  { %1676 = vmatmul.mubr.f32.gmra.mxu0 %v1500_v63  ;;  %1837 = vmatmul.mubr.f32.gmra.mxu1 %v1500_v63  ;;  %v1459_v63 = vpop.f32.mrf.mxu1 }
 0x292   :  { %1681 = vmatprep.mubr.f32.mxu0 %v4350_v25  ;;  %1842 = vmatprep.mubr.f32.mxu1 %v4350_v25 }
 0x293   :  { %v2777_v26 = vpop.f32.mrf.mxu1 }
 0x294   :  { %v1493_v62 = vmul.f32 2.0, %v2777_v26 }
 0x295   :  { %1682 = vmatmul.mubr.f32.gmra.mxu0 %v1501_v8  ;;  %1843 = vmatmul.mubr.f32.gmra.mxu1 %v1501_v8  ;;  %v1490_v8 = vmul.f32 2.0, %v1459_v63  ;;  %v1962_v63 = vlaneseq }
 0x296   :  { %1687 = vmatprep.mubr.f32.mxu0 %v4350_v25  ;;  %1848 = vmatprep.mubr.f32.mxu1 %v4350_v25 }
 0x297   :  { %v1506_v56 = vsub.f32 %v1490_v8, %v3059_v9  ;;  %v3930_v54 = vshrl.u32 %v1962_v63, 7  ;;  %v3933_v8 = vld [vmem:[#allocation9] sm:$0xf]  ;;  %v3939_v9 = vld [vmem:[#allocation13] sm:$0xff] }
 0x299   :  { %1688 = vmatmul.mubr.f32.gmra.mxu0 %v1502_v47  ;;  %1849 = vmatmul.mubr.f32.gmra.mxu1 %v1502_v47  ;;  %v1469_v47 = vpop.f32.mrf.mxu1  ;;  %v2096_v26 = vsub.s32 1, %v3930_v54 }
 0x29a   :  { %1693 = vmatprep.mubr.f32.mxu0 %v4350_v25  ;;  %1854 = vmatprep.mubr.f32.mxu1 %v4350_v25 }
 0x29d   :  { %1694 = vmatmul.mubr.f32.gmra.mxu0 %v1503_v12  ;;  %1855 = vmatmul.mubr.f32.gmra.mxu1 %v1503_v12  ;;  %v1492_v12 = vmul.f32 2.0, %v1469_v47 }
 0x29e   :  { %1699 = vmatprep.mubr.f32.mxu0 %v4350_v25  ;;  %1860 = vmatprep.mubr.f32.mxu1 %v4350_v25 }
 0x29f   :  { %v1508_v48 = vsub.f32 %v1492_v12, %v3061_v11  ;;  %v3948_v12 = vld [vmem:[#allocation13 + $0x8] sm:$0xff] }
 0x2a1   :  { %1700 = vmatmul.mubr.f32.gmra.mxu0 %v1504_v4  ;;  %1861 = vmatmul.mubr.f32.gmra.mxu1 %v1504_v4  ;;  %v1509_v4 = vsub.f32 %v1493_v62, %v3062_v59 }
 0x2a2   :  { %1705 = vmatprep.mubr.f32.mxu0 %v4350_v25  ;;  %1866 = vmatprep.mubr.f32.mxu1 %v4350_v25 }
 0x2a5   :  { %1706 = vmatmul.mubr.f32.gmra.mxu0 %v1505_v28  ;;  %1867 = vmatmul.mubr.f32.gmra.mxu1 %v1505_v28  ;;  %v1964_v28 = vsub.s32 0, %v3930_v54 }
 0x2a6   :  { %1711 = vmatprep.mubr.f32.mxu0 %v4350_v25  ;;  %1872 = vmatprep.mubr.f32.mxu1 %v4350_v25 }
 0x2a7   :  { %v3937_v6 = vrot.slane %v3933_v8, %v1964_v28 }
 0x2a9   :  { %1712 = vmatmul.mubr.f32.gmra.mxu0 %v1506_v56  ;;  %1873 = vmatmul.mubr.f32.gmra.mxu1 %v1506_v56  ;;  %v3944_v56 = vpop.f32.mrf.mxu0  ;;  %v1966_v47 = vmul.f32 %v3937_v6, %v3939_v9  ;;  %v1967_v28 = vmul.f32 %v3937_v6, %v3948_v12 }
 0x2aa   :  { %1717 = vmatprep.mubr.f32.mxu0 %v4350_v25  ;;  %1878 = vmatprep.mubr.f32.mxu1 %v4350_v25  ;;  %4351 = vst [vmem:[#allocation52_spill] sm:$0xff] %v3944_v56 }
 0x2ad   :  { %1718 = vmatmul.mubr.f32.gmra.mxu0 %v1507_v43  ;;  %1879 = vmatmul.mubr.f32.gmra.mxu1 %v1507_v43 }
 0x2ae   :  { %1723 = vmatprep.mubr.f32.mxu0 %v4350_v25  ;;  %1884 = vmatprep.mubr.f32.mxu1 %v4350_v25 }
 0x2b1   :  { %1724 = vmatmul.mubr.f32.gmra.mxu0 %v1508_v48  ;;  %1885 = vmatmul.mubr.f32.gmra.mxu1 %v1508_v48 }
 0x2b2   :  { %1729 = vmatprep.mubr.f32.mxu0 %v4350_v25  ;;  %1890 = vmatprep.mubr.f32.mxu1 %v4350_v25  ;;  %v3942_v25 = vrot.slane %v3933_v8, %v2096_v26  ;;  %v3958_v26 = vld [vmem:[#allocation13 + $0x10] sm:$0xff] }
 0x2b4   :  { %v2098_v11 = vmul.f32 %v3942_v25, %v3939_v9 }
 0x2b5   :  { %1730 = vmatmul.mubr.f32.gmra.mxu0 %v1509_v4  ;;  %1891 = vmatmul.mubr.f32.gmra.mxu1 %v1509_v4 }
 0x339   :  { %v1641_v21 = vpop.f32.mrf.mxu0  ;;  %v1802_v43 = vpop.f32.mrf.mxu1 }
 0x33a   :  { %v1897_v62 = vadd.f32 %v1641_v21, %v3715_v19  ;;  %v2099_v21 = vmul.f32 %v3942_v25, %v3948_v12 }
 0x33b   :  { %v1643_v48 = vpop.f32.mrf.mxu0  ;;  %v3953_v59 = vpop.f32.mrf.mxu1 }
 0x33c   :  { %v1982_v4 = vadd.f32 %v1966_v47, %v1897_v62  ;;  %v1898_v63 = vadd.f32 %v1643_v48, %v3721_v38  ;;  %v1968_v38 = vmul.f32 %v3937_v6, %v3958_v26 }
 0x33d   :  { %v1647_v56 = vpop.f32.mrf.mxu0  ;;  %v1808_v7 = vpop.f32.mrf.mxu1 }
 0x33e   :  { %v2554_v55 = vmul.f32 -1.442695, %v1982_v4  ;;  %v2114_v46 = vadd.f32 %v2098_v11, %v1898_v63  ;;  %v1901_v19 = vadd.f32 %v1647_v56, %v3727_v39  ;;  %v2100_v39 = vmul.f32 %v3942_v25, %v3958_v26 }
 0x33f   :  { %v1649_v50 = vpop.f32.mrf.mxu0  ;;  %v3963_v13 = vpop.f32.mrf.mxu1 }
 0x340   :  { %2791 = vpow2.f32 %v2554_v55  ;;  %v2570_v47 = vmul.f32 -1.442695, %v2114_v46  ;;  %v1983_v62 = vadd.f32 %v1967_v28, %v1901_v19  ;;  %v1902_v48 = vadd.f32 %v1649_v50, %v3733_v33  ;;  %v3978_v28 = vld [vmem:[#allocation13 + $0x20] sm:$0xff] }
 0x341   :  { %v1653_v4 = vpop.f32.mrf.mxu0  ;;  %v1814_v11 = vpop.f32.mrf.mxu1  ;;  %v1969_v55 = vmul.f32 %v3937_v6, %v3968_v53 }
 0x342   :  { %2793 = vpow2.f32 %v2570_v47  ;;  %v2555_v56 = vmul.f32 -1.442695, %v1983_v62  ;;  %v2115_v63 = vadd.f32 %v2099_v21, %v1902_v48  ;;  %v1905_v16 = vadd.f32 %v1653_v4, %v3739_v0 }
 0x343   :  { %v1655_v32 = vpop.f32.mrf.mxu0  ;;  %v3973_v24 = vpop.f32.mrf.mxu1  ;;  %v2101_v21 = vmul.f32 %v3942_v25, %v3968_v53  ;;  %v1899_v48 = vadd.f32 %v1802_v43, %v3717_v49 }
 0x344   :  { %2795 = vpow2.f32 %v2555_v56  ;;  %v2571_v33 = vmul.f32 -1.442695, %v2115_v63  ;;  %v1984_v50 = vadd.f32 %v1968_v38, %v1905_v16  ;;  %v1906_v46 = vadd.f32 %v1655_v32, %v3745_v34 }
 0x345   :  { %v1659_v19 = vpop.f32.mrf.mxu0  ;;  %v1820_v27 = vpop.f32.mrf.mxu1  ;;  %v1970_v34 = vmul.f32 %v3937_v6, %v3978_v28  ;;  %v1903_v63 = vadd.f32 %v1808_v7, %v3729_v31 }
 0x346   :  { %2797 = vpow2.f32 %v2571_v33  ;;  %v2556_v0 = vmul.f32 -1.442695, %v1984_v50  ;;  %v2116_v47 = vadd.f32 %v2100_v39, %v1906_v46  ;;  %v1909_v62 = vadd.f32 %v1659_v19, %v3751_v51  ;;  %v3995_v46 = vld [vmem:[#allocation13 + $0x28] sm:$0xff] }
 0x347   :  { %v1661_v4 = vpop.f32.mrf.mxu0  ;;  %v3984_v56 = vpop.f32.mrf.mxu1  ;;  %v2102_v39 = vmul.f32 %v3942_v25, %v3978_v28 }
 0x348   :  { %2799 = vpow2.f32 %v2556_v0  ;;  %v2572_v16 = vmul.f32 -1.442695, %v2116_v47  ;;  %v1985_v32 = vadd.f32 %v1969_v55, %v1909_v62  ;;  %v1910_v38 = vadd.f32 %v1661_v4, %v3757_v57  ;;  %v3999_v0 = vld [vmem:[#allocation13 + $0x30] sm:$0xff] }
 0x349   :  { %v1665_v33 = vpop.f32.mrf.mxu0  ;;  %v3993_v50 = vpop.f32.mrf.mxu1  ;;  %v1907_v55 = vadd.f32 %v1814_v11, %v3741_v37  ;;  %v2103_v62 = vmul.f32 %v3942_v25, %v3995_v46 }
 0x34a   :  { %2801 = vpow2.f32 %v2572_v16  ;;  %v2557_v51 = vmul.f32 -1.442695, %v1985_v32  ;;  %v2117_v49 = vadd.f32 %v2101_v21, %v1910_v38  ;;  %v1913_v43 = vadd.f32 %v1665_v33, %v3763_v35 }
 0x34b   :  { %2803 = vtanh.f32 %v1899_v48  ;;  %v1667_v19 = vpop.f32.mrf.mxu0  ;;  %v1971_v35 = vmul.f32 %v3937_v6, %v3995_v46  ;;  %v4005_v4 = vpop.f32.mrf.mxu1  ;;  %v1972_v32 = vmul.f32 %v3937_v6, %v3999_v0 }
 0x34c   :  { %2805 = vpow2.f32 %v2557_v51  ;;  %v2573_v57 = vmul.f32 -1.442695, %v2117_v49  ;;  %v1986_v31 = vadd.f32 %v1970_v34, %v1913_v43  ;;  %v1914_v7 = vadd.f32 %v1667_v19, %v3769_v29 }
 0x34d   :  { %v2792_v47 = vpop.eup %2791  ;;  %2807 = vtanh.f32 %v1903_v63  ;;  %v1671_v21 = vpop.f32.mrf.mxu0 }
 0x34e   :  { %v2046_v48 = vadd.f32 1.0, %v2792_v47  ;;  %2809 = vpow2.f32 %v2573_v57  ;;  %v2558_v37 = vmul.f32 -1.442695, %v1986_v31  ;;  %v2118_v11 = vadd.f32 %v2102_v39, %v1914_v7  ;;  %v4011_v39 = vld [vmem:[#allocation13 + $0x38] sm:$0xff] }
 0x34f   :  { %v2794_v34 = vpop.eup %2793  ;;  %2811 = vtanh.f32 %v1907_v55  ;;  %v1917_v29 = vadd.f32 %v1671_v21, %v3775_v15  ;;  %v1673_v16 = vpop.f32.mrf.mxu0  ;;  %v1911_v7 = vadd.f32 %v1820_v27, %v3753_v30 }
 0x350   :  { %2813 = vrcp.f32 %v2046_v48  ;;  %v2178_v38 = vadd.f32 1.0, %v2794_v34  ;;  %v2574_v63 = vmul.f32 -1.442695, %v2118_v11  ;;  %v1918_v33 = vadd.f32 %v1673_v16, %v3781_v58  ;;  %v4013_v55 = vpop.f32.mrf.mxu1 }
 0x351   :  { %v2796_v51 = vpop.eup %2795  ;;  %2815 = vpow2.f32 %v2558_v37  ;;  %v1987_v49 = vadd.f32 %v1971_v35, %v1917_v29  ;;  %v1677_v43 = vpop.f32.mrf.mxu0  ;;  %v2104_v58 = vmul.f32 %v3942_v25, %v3999_v0  ;;  %v1973_v37 = vmul.f32 %v3937_v6, %v4011_v39 }
 0x352   :  { %2817 = vrcp.f32 %v2178_v38  ;;  %v2047_v19 = vadd.f32 1.0, %v2796_v51  ;;  %v2119_v15 = vadd.f32 %v2103_v62, %v1918_v33  ;;  %v1921_v57 = vadd.f32 %v1677_v43, %v3787_v60  ;;  %v4022_v27 = vpop.f32.mrf.mxu1  ;;  %v4025_v43 = vld [vmem:[#allocation13 + $0x40] sm:$0xff] }
 0x353   :  { %v2798_v31 = vpop.eup %2797  ;;  %2819 = vpow2.f32 %v2574_v63  ;;  %v2559_v47 = vmul.f32 -1.442695, %v1987_v49  ;;  %v1679_v21 = vpop.f32.mrf.mxu0 }
 0x354   :  { %2821 = vrcp.f32 %v2047_v19  ;;  %v2179_v35 = vadd.f32 1.0, %v2798_v31  ;;  %v1988_v48 = vadd.f32 %v1972_v32, %v1921_v57  ;;  %v2575_v62 = vmul.f32 -1.442695, %v2119_v15  ;;  %v1838_v31 = vpop.f32.mrf.mxu1 }
 0x355   :  { %v2800_v11 = vpop.eup %2799  ;;  %2823 = vpow2.f32 %v2559_v47  ;;  %v1922_v60 = vadd.f32 %v1679_v21, %v3793_v45  ;;  %v1683_v34 = vpop.f32.mrf.mxu0  ;;  %v1915_v45 = vadd.f32 %v3993_v50, %v3765_v41  ;;  %v2105_v47 = vmul.f32 %v3942_v25, %v4011_v39 }
 0x356   :  { %2825 = vrcp.f32 %v2179_v35  ;;  %v2048_v30 = vadd.f32 1.0, %v2800_v11  ;;  %v1925_v29 = vadd.f32 %v1683_v34, %v3799_v61  ;;  %v2560_v38 = vmul.f32 -1.442695, %v1988_v48  ;;  %v4036_v34 = vpop.f32.mrf.mxu1 }
 0x357   :  { %v2802_v16 = vpop.eup %2801  ;;  %2827 = vtanh.f32 %v1911_v7  ;;  %v2120_v63 = vadd.f32 %v2104_v58, %v1922_v60  ;;  %v1685_v32 = vpop.f32.mrf.mxu0  ;;  %v1974_v48 = vmul.f32 %v3937_v6, %v4025_v43  ;;  %v2292_v50 = vsub.s32 3, %v3930_v54 }
 0x358   :  { %v2804_v33 = vpop.eup %2803  ;;  %2829 = vrcp.f32 %v2048_v30  ;;  %v2180_v51 = vadd.f32 1.0, %v2802_v16  ;;  %v1989_v49 = vadd.f32 %v1973_v37, %v1925_v29  ;;  %v1926_v7 = vadd.f32 %v1685_v32, %v3804_v2 }
 0x359   :  { %v2806_v19 = vpop.eup %2805  ;;  %2831 = vpow2.f32 %v2575_v62  ;;  %v1689_v15 = vpop.f32.mrf.mxu0  ;;  %v2576_v58 = vmul.f32 -1.442695, %v2120_v63  ;;  %v4040_v54 = vrot.slane %v3933_v8, %v2292_v50  ;;  %v1919_v32 = vadd.f32 %v4013_v55, %v3777_v36 }
 0x35a   :  { %v2808_v57 = vpop.eup %2807  ;;  %2833 = vrcp.f32 %v2180_v51  ;;  %v2049_v61 = vadd.f32 1.0, %v2806_v19  ;;  %v1929_v35 = vadd.f32 %v1689_v15, %v3813_v22  ;;  %v2561_v11 = vmul.f32 -1.442695, %v1989_v49 }
 0x35b   :  { %v2810_v21 = vpop.eup %2809  ;;  %2835 = vpow2.f32 %v2560_v38  ;;  %v2121_v30 = vadd.f32 %v2105_v47, %v1926_v7  ;;  %v1691_v51 = vpop.f32.mrf.mxu0  ;;  %v2106_v47 = vmul.f32 %v3942_v25, %v4025_v43 }
 0x35c   :  { %v2812_v41 = vpop.eup %2811  ;;  %2837 = vrcp.f32 %v2049_v61  ;;  %v2181_v37 = vadd.f32 1.0, %v2810_v21  ;;  %v1990_v22 = vadd.f32 %v1974_v48, %v1929_v35  ;;  %v1844_v61 = vpop.f32.mrf.mxu1  ;;  %v1900_v21 = vadd.f32 %v3953_v59, %v3723_v52 }
 0x35d   :  { %v2814_v62 = vpop.eup %2813  ;;  %2839 = vtanh.f32 %v1915_v45  ;;  %v2577_v7 = vmul.f32 -1.442695, %v2121_v30  ;;  %v1923_v48 = vadd.f32 %v1838_v31, %v3789_v17  ;;  %v1695_v50 = vpop.f32.mrf.mxu0  ;;  %v1927_v52 = vadd.f32 %v1844_v61, %v3801_v18 }
 0x35e   :  { %v2816_v2 = vpop.eup %2815  ;;  %v2258_v60 = vmul.f32 %v2814_v62, %v2804_v33  ;;  %2841 = vrcp.f32 %v2181_v37  ;;  %v2562_v55 = vmul.f32 -1.442695, %v1990_v22  ;;  %v1930_v17 = vadd.f32 %v1691_v51, %v3819_v23  ;;  %v4064_v23 = vpop.f32.mrf.mxu1 }
 0x35f   :  { %v2818_v29 = vpop.eup %2817  ;;  %v2050_v16 = vadd.f32 1.0, %v2816_v2  ;;  %2843 = vpow2.f32 %v2576_v58  ;;  %v1933_v31 = vadd.f32 %v1695_v50, %v3825_v5  ;;  %v1697_v5 = vpop.f32.mrf.mxu0 }
 0x360   :  { %v2820_v38 = vpop.eup %2819  ;;  %v2242_v63 = vmul.f32 %v2818_v29, %v3939_v9  ;;  %2845 = vpow2.f32 %v2561_v11  ;;  %v4046_v9 = vld [vmem:[#allocation13 + $0x48] sm:$0xff]  ;;  %v1904_v11 = vadd.f32 %v3963_v13, %v3735_v42 }
 0x361   :  { %v2822_v33 = vpop.eup %2821  ;;  %2847 = vrcp.f32 %v2050_v16  ;;  %v2182_v49 = vadd.f32 1.0, %v2820_v38  ;;  %v1975_v59 = vmul.f32 %v3937_v6, %v4046_v9 }
 0x362   :  { %v2824_v19 = vpop.eup %2823  ;;  %v2274_v45 = vadd.f32 %v2258_v60, %v2242_v63  ;;  %v2259_v15 = vmul.f32 %v2822_v33, %v2808_v57 }
 0x363   :  { %v2826_v8 = vpop.eup %2825  ;;  %2849 = vrcp.f32 %v2182_v49  ;;  %v2051_v36 = vadd.f32 1.0, %v2824_v19  ;;  %v1908_v49 = vadd.f32 %v3973_v24, %v3747_v20  ;;  %v2122_v19 = vadd.f32 %v2106_v47, %v1930_v17 }
 0x364   :  { %v2828_v58 = vpop.eup %2827  ;;  %v2294_v35 = vmul.f32 %v4040_v54, %v2274_v45  ;;  %2502 = vst [vmem:[#allocation16] sm:$0xff] %v2274_v45  ;;  %v2243_v57 = vmul.f32 %v2826_v8, %v3948_v12  ;;  %2851 = vtanh.f32 %v1919_v32  ;;  %v2107_v20 = vmul.f32 %v3942_v25, %v4046_v9 }
 0x365   :  { %v2830_v37 = vpop.eup %2829  ;;  %2853 = vrcp.f32 %v2051_v36  ;;  %v1912_v36 = vadd.f32 %v3984_v56, %v3759_v14 }
 0x366   :  { %v2832_v62 = vpop.eup %2831  ;;  %v2310_v2 = vadd.f32 %v2294_v35, %v1900_v21  ;;  %v2275_v60 = vadd.f32 %v2259_v15, %v2243_v57  ;;  %v2260_v30 = vmul.f32 %v2830_v37, %v2812_v41  ;;  %2855 = vpow2.f32 %v2577_v7  ;;  %v1850_v57 = vpop.f32.mrf.mxu1  ;;  %v4079_v37 = vld [vmem:[#allocation13 + $0x50] sm:$0xff] }
 0x367   :  { %v2834_v12 = vpop.eup %2833  ;;  %v2183_v29 = vadd.f32 1.0, %v2832_v62  ;;  %2857 = vpow2.f32 %v2562_v55 }
 0x368   :  { %v2836_v16 = vpop.eup %2835  ;;  %v2586_v42 = vmul.f32 -1.442695, %v2310_v2  ;;  %v2295_v13 = vmul.f32 %v4040_v54, %v2275_v60  ;;  %2503 = vst [vmem:[#allocation16 + $0x8] sm:$0xff] %v2275_v60  ;;  %v2244_v18 = vmul.f32 %v2834_v12, %v3958_v26  ;;  %2859 = vtanh.f32 %v1923_v48  ;;  %v1701_v48 = vpop.f32.mrf.mxu0 }
 0x369   :  { %v2838_v22 = vpop.eup %2837  ;;  %2861 = vrcp.f32 %v2183_v29  ;;  %v2052_v38 = vadd.f32 1.0, %v2836_v16  ;;  %v1991_v26 = vadd.f32 %v1975_v59, %v1933_v31  ;;  %v1931_v2 = vadd.f32 %v1850_v57, %v3810_v3 }
 0x36a   :  { %v2840_v41 = vpop.eup %2839  ;;  %2863 = vpow2.f32 %v2586_v42  ;;  %v2311_v63 = vadd.f32 %v2295_v13, %v1904_v11  ;;  %v4062_v32 = vadd.f32 %v2260_v30, %v2244_v18  ;;  %v2261_v33 = vmul.f32 %v2838_v22, %v2828_v58 }
 0x36b   :  { %v2842_v51 = vpop.eup %2841  ;;  %2865 = vrcp.f32 %v2052_v38  ;;  %v1976_v12 = vmul.f32 %v3937_v6, %v4079_v37  ;;  %v1937_v16 = vadd.f32 %v1701_v48, %v3837_v10  ;;  %v1916_v22 = vadd.f32 %v4005_v4, %v3771_v44  ;;  %v4352_v48 = vld [vmem:[#allocation24_spill] sm:$0xff] }
 0x36c   :  { %v2844_v15 = vpop.eup %2843  ;;  %v2587_v61 = vmul.f32 -1.442695, %v2311_v63  ;;  %v2296_v7 = vmul.f32 %v4040_v54, %v4062_v32  ;;  %2504 = vst [vmem:[#allocation16 + $0x10] sm:$0xff] %v4062_v32  ;;  %v2245_v8 = vmul.f32 %v2842_v51, %v3968_v53  ;;  %2867 = vtanh.f32 %v1927_v52  ;;  %v4096_v63 = vpop.f32.mrf.mxu1 }
 0x36d   :  { %v2846_v21 = vpop.eup %2845  ;;  %2869 = vtanh.f32 %v2274_v45  ;;  %v2184_v55 = vadd.f32 1.0, %v2844_v15  ;;  %v2578_v53 = vmul.f32 -1.442695, %v2122_v19  ;;  %v1934_v45 = vadd.f32 %v1697_v5, %v3831_v1 }
 0x36e   :  { %v2848_v24 = vpop.eup %2847  ;;  %2871 = vpow2.f32 %v2587_v61  ;;  %v2312_v47 = vadd.f32 %v2296_v7, %v1908_v49  ;;  %v4076_v58 = vadd.f32 %v2261_v33, %v2245_v8  ;;  %v2053_v35 = vadd.f32 1.0, %v2846_v21  ;;  %v1856_v21 = vpop.f32.mrf.mxu1 }
 0x36f   :  { %v2262_v50 = vmul.f32 %v2848_v24, %v2840_v41  ;;  %2873 = vrcp.f32 %v2184_v55  ;;  %v2563_v52 = vmul.f32 -1.442695, %v1991_v26  ;;  %v2123_v18 = vadd.f32 %v2107_v20, %v1934_v45  ;;  %v4104_v55 = vld [vmem:[#allocation13 + $0x58] sm:$0xff] }
 0x370   :  { %v2850_v14 = vpop.eup %2849  ;;  %2875 = vtanh.f32 %v2275_v60  ;;  %v2588_v56 = vmul.f32 -1.442695, %v2312_v47  ;;  %v2297_v11 = vmul.f32 %v4040_v54, %v4076_v58  ;;  %2505 = vst [vmem:[#allocation16 + $0x18] sm:$0xff] %v4076_v58  ;;  %v1703_v60 = vpop.f32.mrf.mxu0  ;;  %v1992_v19 = vadd.f32 %v1976_v12, %v1937_v16  ;;  %v4355_v16 = vld [vmem:[#allocation43_spill] sm:$0xff] }
 0x371   :  { %v2852_v59 = vpop.eup %2851  ;;  %v2246_v62 = vmul.f32 %v2850_v14, %v3978_v28  ;;  %2877 = vrcp.f32 %v2053_v35  ;;  %v2579_v4 = vmul.f32 -1.442695, %v2123_v18  ;;  %v1920_v24 = vadd.f32 %v4022_v27, %v3783_v40  ;;  %v4118_v27 = vpop.f32.mrf.mxu1 }
 0x372   :  { %v2854_v30 = vpop.eup %2853  ;;  %2879 = vpow2.f32 %v2588_v56  ;;  %v2313_v1 = vadd.f32 %v2297_v11, %v1912_v36  ;;  %v1707_v10 = vpop.f32.mrf.mxu0  ;;  %v1977_v56 = vmul.f32 %v3937_v6, %v4104_v55 }
 0x373   :  { %v2856_v29 = vpop.eup %2855  ;;  %v4088_v17 = vadd.f32 %v2262_v50, %v2246_v62  ;;  %v2263_v31 = vmul.f32 %v2854_v30, %v2852_v59  ;;  %2881 = vpow2.f32 %v2578_v53  ;;  %v1938_v50 = vadd.f32 %v1703_v60, %v4352_v48  ;;  %v4354_v59 = vld [vmem:[#allocation25_spill] sm:$0xff] }
 0x374   :  { %v2858_v42 = vpop.eup %2857  ;;  %v2589_v13 = vmul.f32 -1.442695, %v2313_v1  ;;  %v2185_v28 = vadd.f32 1.0, %v2856_v29  ;;  %2883 = vpow2.f32 %v2563_v52  ;;  %v2108_v53 = vmul.f32 %v3942_v25, %v4079_v37  ;;  %v4353_v52 = vld [vmem:[#allocation46_spill] sm:$0xff] }
 0x375   :  { %v2860_v3 = vpop.eup %2859  ;;  %v2298_v38 = vmul.f32 %v4040_v54, %v4088_v17  ;;  %2506 = vst [vmem:[#allocation16 + $0x20] sm:$0xff] %v4088_v17  ;;  %v2054_v41 = vadd.f32 1.0, %v2858_v42  ;;  %2885 = vtanh.f32 %v1931_v2  ;;  %v1941_v62 = vadd.f32 %v1707_v10, %v4354_v59 }
 0x376   :  { %v2862_v33 = vpop.eup %2861  ;;  %2887 = vpow2.f32 %v2589_v13  ;;  %v2109_v2 = vmul.f32 %v3942_v25, %v4104_v55  ;;  %v1924_v42 = vadd.f32 %v4036_v34, %v4355_v16  ;;  %v2124_v13 = vadd.f32 %v2108_v53, %v1938_v50 }
 0x377   :  { %v2864_v5 = vpop.eup %2863  ;;  %v2314_v51 = vadd.f32 %v2298_v38, %v1916_v22  ;;  %v2247_v49 = vmul.f32 %v2862_v33, %v3995_v46  ;;  %2889 = vrcp.f32 %v2185_v28  ;;  %v1709_v46 = vpop.f32.mrf.mxu0  ;;  %v4131_v28 = vld [vmem:[#allocation13 + $0x60] sm:$0xff] }
 0x378   :  { %v2866_v26 = vpop.eup %2865  ;;  %v2374_v44 = vadd.f32 1.0, %v2864_v5  ;;  %2891 = vrcp.f32 %v2054_v41  ;;  %v1862_v38 = vpop.f32.mrf.mxu1  ;;  %v4356_v41 = vld [vmem:[#allocation26_spill] sm:$0xff]  ;;  %v1993_v5 = vadd.f32 %v1977_v56, %v1941_v62  ;;  %v4360_v62 = vld [vmem:[#allocation28_spill] sm:$0xff] }
 0x379   :  { %v2868_v15 = vpop.eup %2867  ;;  %2893 = vtanh.f32 %v4062_v32  ;;  %v2590_v61 = vmul.f32 -1.442695, %v2314_v51  ;;  %v4100_v7 = vadd.f32 %v2263_v31, %v2247_v49  ;;  %v2264_v8 = vmul.f32 %v2866_v26, %v2860_v3  ;;  %v1713_v30 = vpop.f32.mrf.mxu0 }
 0x37a   :  { %v4102_v36 = vpop.eup %2869  ;;  %2895 = vrcp.f32 %v2374_v44  ;;  %v2564_v32 = vmul.f32 -1.442695, %v1992_v19  ;;  %v1942_v33 = vadd.f32 %v1709_v46, %v4356_v41  ;;  %v1978_v19 = vmul.f32 %v3937_v6, %v4131_v28 }
 0x37b   :  { %v2872_v20 = vpop.eup %2871  ;;  %2897 = vpow2.f32 %v2590_v61  ;;  %v2299_v47 = vmul.f32 %v4040_v54, %v4100_v7  ;;  %2507 = vst [vmem:[#allocation16 + $0x28] sm:$0xff] %v4100_v7  ;;  %v1715_v51 = vpop.f32.mrf.mxu0  ;;  %v4141_v61 = vld [vmem:[#allocation13 + $0x68] sm:$0xff] }
 0x37c   :  { %v2874_v35 = vpop.eup %2873  ;;  %v2375_v57 = vadd.f32 1.0, %v2872_v20  ;;  %2899 = vtanh.f32 %v4076_v58  ;;  %v1935_v58 = vadd.f32 %v1856_v21, %v4353_v52  ;;  %v4144_v20 = vpop.f32.mrf.mxu1 }
 0x37d   :  { %v4115_v45 = vpop.eup %2875  ;;  %v2315_v14 = vadd.f32 %v2299_v47, %v1920_v24  ;;  %v2248_v40 = vmul.f32 %v2874_v35, %v3999_v0  ;;  %2901 = vpow2.f32 %v2579_v4  ;;  %v2580_v4 = vmul.f32 -1.442695, %v2124_v13  ;;  %v1719_v50 = vpop.f32.mrf.mxu0 }
 0x37e   :  { %v2878_v11 = vpop.eup %2877  ;;  %2903 = vrcp.f32 %v2375_v57  ;;  %v2125_v24 = vadd.f32 %v2109_v2, %v1942_v33  ;;  %v2565_v35 = vmul.f32 -1.442695, %v1993_v5  ;;  %v4357_v57 = vld [vmem:[#allocation27_spill] sm:$0xff]  ;;  %v1946_v2 = vadd.f32 %v1715_v51, %v4360_v62 }
 0x37f   :  { %v2880_v1 = vpop.eup %2879  ;;  %v2591_v12 = vmul.f32 -1.442695, %v2315_v14  ;;  %v4126_v60 = vadd.f32 %v2264_v8, %v2248_v40  ;;  %v2265_v0 = vmul.f32 %v2878_v11, %v2868_v15  ;;  %2905 = vpow2.f32 %v2564_v32  ;;  %v4358_v14 = vld [vmem:[#allocation44_spill] sm:$0xff] }
 0x380   :  { %v2882_v29 = vpop.eup %2881  ;;  %v2376_v31 = vadd.f32 1.0, %v2880_v1  ;;  %2907 = vtanh.f32 %v4088_v17  ;;  %v2110_v15 = vmul.f32 %v3942_v25, %v4131_v28  ;;  %v1945_v48 = vadd.f32 %v1713_v30, %v4357_v57 }
 0x381   :  { %v2884_v18 = vpop.eup %2883  ;;  %2909 = vpow2.f32 %v2591_v12  ;;  %v2300_v3 = vmul.f32 %v4040_v54, %v4126_v60  ;;  %2508 = vst [vmem:[#allocation16 + $0x30] sm:$0xff] %v4126_v60  ;;  %v2186_v22 = vadd.f32 1.0, %v2882_v29  ;;  %v1928_v40 = vadd.f32 %v4064_v23, %v4358_v14  ;;  %v1868_v12 = vpop.f32.mrf.mxu1 }
 0x382   :  { %v2886_v10 = vpop.eup %2885  ;;  %2911 = vrcp.f32 %v2376_v31  ;;  %v2055_v17 = vadd.f32 1.0, %v2884_v18  ;;  %v1994_v16 = vadd.f32 %v1978_v19, %v1945_v48  ;;  %v4363_v48 = vld [vmem:[#allocation31_spill] sm:$0xff] }
 0x383   :  { %v2888_v34 = vpop.eup %2887  ;;  %v2316_v49 = vadd.f32 %v2300_v3, %v1924_v42  ;;  %2913 = vtanh.f32 %v1935_v58  ;;  %v4359_v58 = vld [vmem:[#allocation48_spill] sm:$0xff]  ;;  %v1721_v42 = vpop.f32.mrf.mxu0 }
 0x384   :  { %v2890_v26 = vpop.eup %2889  ;;  %v2377_v44 = vadd.f32 1.0, %v2888_v34  ;;  %2915 = vrcp.f32 %v2186_v22  ;;  %v1939_v59 = vadd.f32 %v1862_v38, %v4359_v58  ;;  %v2126_v38 = vadd.f32 %v2110_v15, %v1946_v2  ;;  %v4364_v2 = vld [vmem:[#allocation45_spill] sm:$0xff] }
 0x385   :  { %v2892_v8 = vpop.eup %2891  ;;  %v2592_v21 = vmul.f32 -1.442695, %v2316_v49  ;;  %v2249_v46 = vmul.f32 %v2890_v26, %v4011_v39  ;;  %2917 = vrcp.f32 %v2055_v17  ;;  %v1979_v39 = vmul.f32 %v3937_v6, %v4141_v61  ;;  %v4166_v17 = vpop.f32.mrf.mxu1  ;;  %v4168_v49 = vld [vmem:[#allocation13 + $0x70] sm:$0xff] }
 0x386   :  { %v2894_v47 = vpop.eup %2893  ;;  %2919 = vrcp.f32 %v2377_v44  ;;  %v4146_v32 = vmul.f32 %v2892_v8, %v2886_v10  ;;  %v2566_v34 = vmul.f32 -1.442695, %v1994_v16  ;;  %v1725_v19 = vpop.f32.mrf.mxu0  ;;  %v2111_v15 = vmul.f32 %v3942_v25, %v4141_v61 }
 0x387   :  { %v2896_v53 = vpop.eup %2895  ;;  %2921 = vpow2.f32 %v2592_v21  ;;  %v4151_v56 = vadd.f32 %v2265_v0, %v2249_v46  ;;  %v4361_v0 = vld [vmem:[#allocation29_spill] sm:$0xff]  ;;  %v2582_v46 = vmul.f32 -1.442695, %v2126_v38  ;;  %v2112_v58 = vmul.f32 %v3942_v25, %v4168_v49 }
 0x388   :  { %v2898_v11 = vpop.eup %2897  ;;  %v2438_v52 = vmul.f32 %v2896_v53, %v4102_v36  ;;  %2923 = vpow2.f32 %v2580_v4  ;;  %v1949_v29 = vadd.f32 %v1719_v50, %v4361_v0  ;;  %v2581_v36 = vmul.f32 -1.442695, %v2125_v24 }
 0x389   :  { %v2900_v30 = vpop.eup %2899  ;;  %v2378_v1 = vadd.f32 1.0, %v2898_v11  ;;  %2925 = vtanh.f32 %v4100_v7  ;;  %v2301_v23 = vmul.f32 %v4040_v54, %v4151_v56  ;;  %2509 = vst [vmem:[#allocation16 + $0x38] sm:$0xff] %v4151_v56  ;;  %v1953_v50 = vadd.f32 %v1725_v19, %v4363_v48  ;;  %v4369_v48 = vld [vmem:[#allocation38_spill] sm:$0xff] }
 0x38a   :  { %v2902_v31 = vpop.eup %2901  ;;  %2486 = vst [vmem:[#allocation15] sm:$0xff] %v2438_v52  ;;  %2927 = vpow2.f32 %v2565_v35  ;;  %v1995_v5 = vadd.f32 %v1979_v39, %v1949_v29  ;;  %v1874_v35 = vpop.f32.mrf.mxu1  ;;  %v1980_v53 = vmul.f32 %v3937_v6, %v4168_v49  ;;  %v4365_v29 = vld [vmem:[#allocation34_spill] sm:$0xff] }
 0x38b   :  { %v2904_v13 = vpop.eup %2903  ;;  %2929 = vrcp.f32 %v2378_v1  ;;  %v2317_v18 = vadd.f32 %v2301_v23, %v1928_v40  ;;  %v2187_v3 = vadd.f32 1.0, %v2902_v31  ;;  %v1727_v39 = vpop.f32.mrf.mxu0  ;;  %v1932_v1 = vadd.f32 %v4096_v63, %v4364_v2 }
 0x38c   :  { %v2906_v22 = vpop.eup %2905  ;;  %v2439_v7 = vmul.f32 %v2904_v13, %v4115_v45  ;;  %2931 = vtanh.f32 %v1939_v59  ;;  %v4362_v45 = vld [vmem:[#allocation30_spill] sm:$0xff]  ;;  %v2567_v57 = vmul.f32 -1.442695, %v1995_v5  ;;  %v1943_v31 = vadd.f32 %v1868_v12, %v4365_v29 }
 0x38d   :  { %v4164_v41 = vpop.eup %2907  ;;  %v2593_v33 = vmul.f32 -1.442695, %v2317_v18  ;;  %2933 = vrcp.f32 %v2187_v3  ;;  %v2056_v10 = vadd.f32 1.0, %v2906_v22  ;;  %v1950_v4 = vadd.f32 %v1721_v42, %v4362_v45  ;;  %v1731_v13 = vpop.f32.mrf.mxu0  ;;  %v4193_v3 = vld [vmem:[#allocation13 + $0x78] sm:$0xff] }
 0x38e   :  { %v2910_v51 = vpop.eup %2909  ;;  %2487 = vst [vmem:[#allocation15 + $0x8] sm:$0xff] %v2439_v7  ;;  %2935 = vpow2.f32 %v2581_v36  ;;  %v4186_v36 = vpop.f32.mrf.mxu1 }
 0x38f   :  { %v2912_v26 = vpop.eup %2911  ;;  %v2379_v44 = vadd.f32 1.0, %v2910_v51  ;;  %2937 = vpow2.f32 %v2593_v33  ;;  %v2127_v52 = vadd.f32 %v2111_v15, %v1950_v4  ;;  %v4367_v15 = vld [vmem:[#allocation33_spill] sm:$0xff] }
 0x390   :  { %v2914_v8 = vpop.eup %2913  ;;  %v2440_v21 = vmul.f32 %v2912_v26, %v2894_v47  ;;  %2939 = vrcp.f32 %v2056_v10  ;;  %v1880_v10 = vpop.f32.mrf.mxu1  ;;  %v1981_v26 = vmul.f32 %v3937_v6, %v4193_v3 }
 0x391   :  { %v2916_v24 = vpop.eup %2915  ;;  %2941 = vrcp.f32 %v2379_v44  ;;  %v2583_v12 = vmul.f32 -1.442695, %v2127_v52  ;;  %v1733_v44 = vpop.f32.mrf.mxu0 }
 0x392   :  { %v2918_v14 = vpop.eup %2917  ;;  %2488 = vst [vmem:[#allocation15 + $0x10] sm:$0xff] %v2440_v21  ;;  %v2250_v40 = vmul.f32 %v2916_v24, %v4025_v43  ;;  %2943 = vpow2.f32 %v2566_v34  ;;  %v4368_v24 = vld [vmem:[#allocation36_spill] sm:$0xff] }
 0x393   :  { %v2920_v11 = vpop.eup %2919  ;;  %2945 = vtanh.f32 %v4126_v60  ;;  %v2267_v47 = vmul.f32 %v2918_v14, %v2914_v8  ;;  %v1996_v60 = vadd.f32 %v1980_v53, %v1953_v50  ;;  %v1957_v8 = vadd.f32 %v1731_v13, %v4367_v15 }
 0x394   :  { %v2922_v59 = vpop.eup %2921  ;;  %v2441_v62 = vmul.f32 %v2920_v11, %v2900_v30  ;;  %v4183_v23 = vadd.f32 %v4146_v32, %v2250_v40  ;;  %2947 = vpow2.f32 %v2582_v46  ;;  %v4366_v32 = vld [vmem:[#allocation32_spill] sm:$0xff]  ;;  %v1951_v50 = vadd.f32 %v1880_v10, %v4369_v48  ;;  %v4370_v40 = vld [vmem:[#allocation51_spill] sm:$0xff] }
 0x395   :  { %v2924_v43 = vpop.eup %2923  ;;  %v2380_v0 = vadd.f32 1.0, %v2922_v59  ;;  %2949 = vpow2.f32 %v2567_v57  ;;  %v1954_v42 = vadd.f32 %v1727_v39, %v4366_v32  ;;  %v2568_v5 = vmul.f32 -1.442695, %v1996_v60  ;;  %v4371_v11 = vld [vmem:[#allocation47_spill] sm:$0xff] }
 0x396   :  { %v2926_v16 = vpop.eup %2925  ;;  %2489 = vst [vmem:[#allocation15 + $0x18] sm:$0xff] %v2441_v62  ;;  %2951 = vtanh.f32 %v4151_v56  ;;  %v2302_v30 = vmul.f32 %v4040_v54, %v4183_v23  ;;  %2510 = vst [vmem:[#allocation16 + $0x40] sm:$0xff] %v4183_v23  ;;  %v2188_v63 = vadd.f32 1.0, %v2924_v43  ;;  %v1947_v57 = vadd.f32 %v1874_v35, %v4368_v24 }
 0x397   :  { %v2928_v18 = vpop.eup %2927  ;;  %2953 = vrcp.f32 %v2380_v0  ;;  %v2128_v19 = vadd.f32 %v2112_v58, %v1954_v42  ;;  %v1936_v52 = vadd.f32 %v4118_v27, %v4371_v11  ;;  %v1997_v2 = vadd.f32 %v1981_v26, %v1957_v8 }
 0x398   :  { %v2930_v22 = vpop.eup %2929  ;;  %v2318_v7 = vadd.f32 %v2302_v30, %v1932_v1  ;;  %2955 = vrcp.f32 %v2188_v63  ;;  %v2057_v38 = vadd.f32 1.0, %v2928_v18 }
 0x399   :  { %v2932_v33 = vpop.eup %2931  ;;  %v2442_v56 = vmul.f32 %v2930_v22, %v4164_v41  ;;  %2957 = vtanh.f32 %v1943_v31  ;;  %v2113_v41 = vmul.f32 %v3942_v25, %v4193_v3  ;;  %v2584_v25 = vmul.f32 -1.442695, %v2128_v19 }
 0x39a   :  { %v2934_v51 = vpop.eup %2933  ;;  %v2594_v34 = vmul.f32 -1.442695, %v2318_v7  ;;  %2959 = vrcp.f32 %v2057_v38  ;;  %v2569_v42 = vmul.f32 -1.442695, %v1997_v2 }
 0x39b   :  { %v2936_v45 = vpop.eup %2935  ;;  %2490 = vst [vmem:[#allocation15 + $0x20] sm:$0xff] %v2442_v56  ;;  %v2251_v4 = vmul.f32 %v2934_v51, %v4046_v9  ;;  %2961 = vpow2.f32 %v2583_v12  ;;  %v1958_v9 = vadd.f32 %v1733_v44, %v4370_v40 }
 0x39c   :  { %v2938_v21 = vpop.eup %2937  ;;  %2963 = vpow2.f32 %v2594_v34  ;;  %v2189_v46 = vadd.f32 1.0, %v2936_v45 }
 0x39d   :  { %v2940_v53 = vpop.eup %2939  ;;  %v2381_v6 = vadd.f32 1.0, %v2938_v21  ;;  %v4204_v14 = vadd.f32 %v2267_v47, %v2251_v4  ;;  %2965 = vpow2.f32 %v2568_v5  ;;  %v4212_v47 = vpop.f32.mrf.mxu1  ;;  %v2129_v29 = vadd.f32 %v2113_v41, %v1958_v9  ;;  %v4373_v4 = vld [vmem:[#allocation49_spill] sm:$0xff]  ;;  %v4374_v9 = vld [vmem:[#allocation35_spill] sm:$0xff] }
 0x39e   :  { %v2942_v39 = vpop.eup %2941  ;;  %v2268_v58 = vmul.f32 %v2940_v53, %v2932_v33  ;;  %2967 = vrcp.f32 %v2189_v46  ;;  %v4372_v33 = vld [vmem:[#allocation40_spill] sm:$0xff] }
 0x39f   :  { %v2944_v59 = vpop.eup %2943  ;;  %v2443_v62 = vmul.f32 %v2942_v39, %v2926_v16  ;;  %2969 = vrcp.f32 %v2381_v6  ;;  %v2303_v35 = vmul.f32 %v4040_v54, %v4204_v14  ;;  %2511 = vst [vmem:[#allocation16 + $0x48] sm:$0xff] %v4204_v14  ;;  %v1886_v32 = vpop.f32.mrf.mxu1  ;;  %v2585_v22 = vmul.f32 -1.442695, %v2129_v29 }
 0x3a0   :  { %v2946_v1 = vpop.eup %2945  ;;  %v2058_v43 = vadd.f32 1.0, %v2944_v59  ;;  %2971 = vtanh.f32 %v1947_v57  ;;  %v1955_v56 = vadd.f32 %v1886_v32, %v4372_v33  ;;  %v1944_v39 = vadd.f32 %v4166_v17, %v4374_v9 }
 0x3a1   :  { %v2948_v0 = vpop.eup %2947  ;;  %2491 = vst [vmem:[#allocation15 + $0x28] sm:$0xff] %v2443_v62  ;;  %v2319_v27 = vadd.f32 %v2303_v35, %v1936_v52  ;;  %2973 = vtanh.f32 %v1951_v50  ;;  %v4225_v24 = vpop.f32.mrf.mxu1 }
 0x3a2   :  { %v2950_v31 = vpop.eup %2949  ;;  %2975 = vrcp.f32 %v2058_v43  ;;  %v2190_v60 = vadd.f32 1.0, %v2948_v0  ;;  %v4375_v43 = vld [vmem:[#allocation50_spill] sm:$0xff] }
 0x3a3   :  { %v2952_v16 = vpop.eup %2951  ;;  %v2595_v30 = vmul.f32 -1.442695, %v2319_v27  ;;  %v2059_v63 = vadd.f32 1.0, %v2950_v31  ;;  %2977 = vpow2.f32 %v2584_v25  ;;  %v1892_v52 = vpop.f32.mrf.mxu1 }
 0x3a4   :  { %v2954_v13 = vpop.eup %2953  ;;  %2979 = vrcp.f32 %v2190_v60  ;;  %v1959_v0 = vadd.f32 %v1892_v52, %v4375_v43  ;;  %v4380_v52 = vld [vmem:[#allocation52_spill] sm:$0xff] }
 0x3a5   :  { %v2956_v18 = vpop.eup %2955  ;;  %v2444_v12 = vmul.f32 %v2954_v13, %v2946_v1  ;;  %2981 = vpow2.f32 %v2595_v30 }
 0x3a6   :  { %v2958_v7 = vpop.eup %2957  ;;  %v2252_v38 = vmul.f32 %v2956_v18, %v4079_v37  ;;  %2983 = vrcp.f32 %v2059_v63  ;;  %v1940_v37 = vadd.f32 %v4144_v20, %v4373_v4  ;;  %v4376_v63 = vld [vmem:[#allocation37_spill] sm:$0xff] }
 0x3a7   :  { %v2960_v10 = vpop.eup %2959  ;;  %2492 = vst [vmem:[#allocation15 + $0x30] sm:$0xff] %v2444_v12  ;;  %2985 = vpow2.f32 %v2569_v42 }
 0x3a8   :  { %v2962_v5 = vpop.eup %2961  ;;  %2987 = vtanh.f32 %v4183_v23  ;;  %v4217_v51 = vadd.f32 %v2268_v58, %v2252_v38  ;;  %v2269_v34 = vmul.f32 %v2960_v10, %v2958_v7 }
 0x3a9   :  { %v2964_v19 = vpop.eup %2963  ;;  %v2191_v26 = vadd.f32 1.0, %v2962_v5  ;;  %2989 = vpow2.f32 %v2585_v22  ;;  %v4377_v5 = vld [vmem:[#allocation39_spill] sm:$0xff] }
 0x3aa   :  { %v2966_v44 = vpop.eup %2965  ;;  %v2382_v45 = vadd.f32 1.0, %v2964_v19  ;;  %v2304_v15 = vmul.f32 %v4040_v54, %v4217_v51  ;;  %2512 = vst [vmem:[#allocation16 + $0x50] sm:$0xff] %v4217_v51  ;;  %2991 = vtanh.f32 %v1955_v56 }
 0x3ab   :  { %v2968_v8 = vpop.eup %2967  ;;  %2993 = vrcp.f32 %v2191_v26  ;;  %v2060_v23 = vadd.f32 1.0, %v2966_v44 }
 0x3ac   :  { %v2970_v41 = vpop.eup %2969  ;;  %2995 = vrcp.f32 %v2382_v45  ;;  %v2320_v21 = vadd.f32 %v2304_v15, %v1940_v37  ;;  %v2253_v46 = vmul.f32 %v2968_v8, %v4104_v55 }
 0x3ad   :  { %v2972_v57 = vpop.eup %2971  ;;  %v2445_v48 = vmul.f32 %v2970_v41, %v2952_v16  ;;  %2997 = vrcp.f32 %v2060_v23 }
 0x3ae   :  { %v2974_v20 = vpop.eup %2973  ;;  %v2596_v50 = vmul.f32 -1.442695, %v2320_v21  ;;  %v4227_v53 = vadd.f32 %v2269_v34, %v2253_v46  ;;  %v1952_v34 = vadd.f32 %v4212_v47, %v4377_v5  ;;  %v286_v21 = vld [vmem:[#allocation10 + $0x1f8] sm:$0xff] }
 0x3af   :  { %v2976_v6 = vpop.eup %2975  ;;  %2493 = vst [vmem:[#allocation15 + $0x38] sm:$0xff] %v2445_v48 }
 0x3b0   :  { %v2978_v40 = vpop.eup %2977  ;;  %2999 = vpow2.f32 %v2596_v50  ;;  %v2305_v11 = vmul.f32 %v4040_v54, %v4227_v53  ;;  %2513 = vst [vmem:[#allocation16 + $0x58] sm:$0xff] %v4227_v53  ;;  %v2270_v55 = vmul.f32 %v2976_v6, %v2972_v57  ;;  %v4379_v6 = vld [vmem:[#allocation42_spill] sm:$0xff] }
 0x3b1   :  { %v2980_v58 = vpop.eup %2979  ;;  %v2192_v25 = vadd.f32 1.0, %v2978_v40  ;;  %v736_v40 = vadd.f32 %v4379_v6, %v286_v21 }
 0x3b2   :  { %v2982_v59 = vpop.eup %2981  ;;  %v2321_v62 = vadd.f32 %v2305_v11, %v1944_v39  ;;  %v2254_v35 = vmul.f32 %v2980_v58, %v4131_v28  ;;  %v1948_v28 = vadd.f32 %v4186_v36, %v4376_v63  ;;  %v1894_v11 = vpop.f32.mrf.mxu1 }
 0x3b3   :  { %v2984_v2 = vpop.eup %2983  ;;  %v2383_v1 = vadd.f32 1.0, %v2982_v59  ;;  %3001 = vrcp.f32 %v2192_v25 }
 0x3b4   :  { %v2986_v27 = vpop.eup %2985  ;;  %3003 = vtanh.f32 %v4204_v14  ;;  %v2597_v17 = vmul.f32 -1.442695, %v2321_v62  ;;  %v4237_v29 = vadd.f32 %v2270_v55, %v2254_v35  ;;  %v2271_v31 = vmul.f32 %v2984_v2, %v2974_v20 }
 0x3b5   :  { %v2988_v60 = vpop.eup %2987  ;;  %3005 = vrcp.f32 %v2383_v1  ;;  %v2061_v16 = vadd.f32 1.0, %v2986_v27 }
 0x3b6   :  { %v2990_v30 = vpop.eup %2989  ;;  %3007 = vpow2.f32 %v2597_v17  ;;  %v2306_v32 = vmul.f32 %v4040_v54, %v4237_v29  ;;  %2514 = vst [vmem:[#allocation16 + $0x60] sm:$0xff] %v4237_v29 }
 0x3b7   :  { %v2992_v42 = vpop.eup %2991  ;;  %3009 = vtanh.f32 %v1959_v0  ;;  %v2193_v14 = vadd.f32 1.0, %v2990_v30 }
 0x3b8   :  { %v2994_v13 = vpop.eup %2993  ;;  %v2322_v18 = vadd.f32 %v2306_v32, %v1948_v28  ;;  %3011 = vrcp.f32 %v2061_v16 }
 0x3b9   :  { %v2996_v12 = vpop.eup %2995  ;;  %v2255_v22 = vmul.f32 %v2994_v13, %v4141_v61  ;;  %3013 = vrcp.f32 %v2193_v14 }
 0x3ba   :  { %v2998_v7 = vpop.eup %2997  ;;  %v2446_v38 = vmul.f32 %v2996_v12, %v2988_v60  ;;  %v2598_v33 = vmul.f32 -1.442695, %v2322_v18 }
 0x3bb   :  { %v4245_v56 = vadd.f32 %v2271_v31, %v2255_v22  ;;  %v2272_v36 = vmul.f32 %v2998_v7, %v2992_v42 }
 0x3bc   :  { %2494 = vst [vmem:[#allocation15 + $0x40] sm:$0xff] %v2446_v38  ;;  %3015 = vpow2.f32 %v2598_v33 }
 0x3bd   :  { %v3000_v10 = vpop.eup %2999  ;;  %v2307_v19 = vmul.f32 %v4040_v54, %v4245_v56  ;;  %2515 = vst [vmem:[#allocation16 + $0x68] sm:$0xff] %v4245_v56  ;;  %3017 = vtanh.f32 %v4217_v51  ;;  %v4378_v51 = vld [vmem:[#allocation41_spill] sm:$0xff] }
 0x3be   :  { %v2384_v26 = vadd.f32 1.0, %v3000_v10  ;;  %v1956_v48 = vadd.f32 %v4225_v24, %v4378_v51 }
 0x3bf   :  { %v2323_v61 = vadd.f32 %v2307_v19, %v1952_v34 }
 0x3c0   :  { %v3002_v44 = vpop.eup %3001  ;;  %3019 = vrcp.f32 %v2384_v26 }
 0x3c1   :  { %v3004_v45 = vpop.eup %3003  ;;  %v2599_v4 = vmul.f32 -1.442695, %v2323_v61  ;;  %v2256_v37 = vmul.f32 %v3002_v44, %v4168_v49 }
 0x3c2   :  { %v3006_v15 = vpop.eup %3005 }
 0x3c3   :  { %v3008_v8 = vpop.eup %3007  ;;  %v2447_v23 = vmul.f32 %v3006_v15, %v3004_v45  ;;  %3021 = vpow2.f32 %v2599_v4  ;;  %v2288_v47 = vadd.f32 %v2272_v36, %v2256_v37 }
 0x3c4   :  { %v3010_v41 = vpop.eup %3009  ;;  %v2385_v46 = vadd.f32 1.0, %v3008_v8  ;;  %3023 = vtanh.f32 %v4227_v53  ;;  %v1332_v53 = vadd.f32 %v4380_v52, %v736_v40 }
 0x3c5   :  { %v3012_v57 = vpop.eup %3011  ;;  %2495 = vst [vmem:[#allocation15 + $0x48] sm:$0xff] %v2447_v23  ;;  %v2308_v20 = vmul.f32 %v4040_v54, %v2288_v47  ;;  %2516 = vst [vmem:[#allocation16 + $0x70] sm:$0xff] %v2288_v47 }
 0x3c6   :  { %v3014_v50 = vpop.eup %3013  ;;  %3025 = vrcp.f32 %v2385_v46  ;;  %v2273_v49 = vmul.f32 %v3012_v57, %v3010_v41  ;;  %v1960_v59 = vadd.f32 %v1894_v11, %v1332_v53 }
 0x3c7   :  { %v2324_v9 = vadd.f32 %v2308_v20, %v1956_v48  ;;  %v2257_v39 = vmul.f32 %v3014_v50, %v4193_v3  ;;  %3027 = vtanh.f32 %v4237_v29 }
 0x3c9   :  { %v3016_v55 = vpop.eup %3015  ;;  %v2600_v58 = vmul.f32 -1.442695, %v2324_v9  ;;  %v2289_v25 = vadd.f32 %v2273_v49, %v2257_v39 }
 0x3ca   :  { %v2386_v24 = vadd.f32 1.0, %v3016_v55  ;;  %v3018_v35 = vpop.eup %3017 }
 0x3cb   :  { %3029 = vpow2.f32 %v2600_v58  ;;  %v2309_v62 = vmul.f32 %v4040_v54, %v2289_v25  ;;  %2517 = vst [vmem:[#allocation16 + $0x78] sm:$0xff] %v2289_v25 }
 0x3cc   :  { %3031 = vrcp.f32 %v2386_v24 }
 0x3cd   :  { %3194 = shalt.err (!%p3191_p6)
}
 0x3ce   :  { %2541 = dma.vmem_to_hbm [thread:$0]  %s2536_s5, 2048, %s4283_s7, [#allocation17], %s3240_s1, %s3240_s1, %s3241_s16   ;;  %v3020_v3 = vpop.eup %3019  ;;  %v2325_v2 = vadd.f32 %v2309_v62, %v1960_v59 }
 0x3cf   :  { %v2448_v54 = vmul.f32 %v3020_v3, %v3018_v35  ;;  %s3247_s7 = smov [#allocation15]  }
 0x3d0   :  { %v2601_v1 = vmul.f32 -1.442695, %v2325_v2  ;;  %v3022_v43 = vpop.eup %3021  ;;  %s2523_s11 = sshll.u32 %s3247_s7, 4  ;;  %s2524_s11 = int_to_ptr.vmem [resolvable:$true] %s2523_s11 }
 0x3d1   :  { %2496 = vst [vmem:[#allocation15 + $0x50] sm:$0xff] %v2448_v54  ;;  %v2387_v0 = vadd.f32 1.0, %v3022_v43  ;;  %v3024_v27 = vpop.eup %3023  ;;  %s3203_s12 = scalar_lea.vmem %s2524_s11, 2048  ;;  %p3208_p8 = scmp.lt.s32.totalorder %s2524_s11, %s2524_s11 }
 0x3d2   :  { %3033 = vpow2.f32 %v2601_v1  ;;  %p3204_p7 = scmp.ne.s32.totalorder %s2524_s11, %s3203_s12  ;;  %p3209_p9 = scmp.lt.s32.totalorder %s3203_s12, %s3203_s12 }
 0x3d3   :  { %3035 = vtanh.f32 %v4245_v56  ;;  %v3026_v17 = vpop.eup %3025 }
 0x3d4   :  { %3037 = vrcp.f32 %v2387_v0  ;;  %v2449_v29 = vmul.f32 %v3026_v17, %v3024_v27  ;;  %v3028_v31 = vpop.eup %3027  ;;  %p3210_p10 = por %p3209_p9, %p3208_p8 }
 0x3d5   :  { %3039 = vtanh.f32 %v2288_v47 }
 0x3d6   :  { %2497 = vst [vmem:[#allocation15 + $0x58] sm:$0xff] %v2449_v29  ;;  %p3211_p11 = pnand %p3210_p10, %p3204_p7 }
 0x3d8   :  { %v3030_v60 = vpop.eup %3029 }
 0x3d9   :  { %v3032_v16 = vpop.eup %3031  ;;  %v2388_v30 = vadd.f32 1.0, %v3030_v60 }
 0x3da   :  { %v2450_v63 = vmul.f32 %v3032_v16, %v3028_v31 }
 0x3db   :  { %3041 = vrcp.f32 %v2388_v30 }
 0x3dc   :  { %2498 = vst [vmem:[#allocation15 + $0x60] sm:$0xff] %v2450_v63  ;;  %3043 = vtanh.f32 %v2289_v25 }
 0x3df   :  { %v3034_v28 = vpop.eup %3033 }
 0x3e0   :  { %v3036_v32 = vpop.eup %3035  ;;  %v2389_v42 = vadd.f32 1.0, %v3034_v28 }
 0x3e1   :  { %v3038_v14 = vpop.eup %3037 }
 0x3e2   :  { %v2451_v13 = vmul.f32 %v3038_v14, %v3036_v32  ;;  %3045 = vrcp.f32 %v2389_v42  ;;  %v3040_v18 = vpop.eup %3039 }
 0x3e4   :  { %2499 = vst [vmem:[#allocation15 + $0x68] sm:$0xff] %v2451_v13 }
 0x3e8   :  { %v3042_v12 = vpop.eup %3041 }
 0x3e9   :  { %v2452_v22 = vmul.f32 %v3042_v12, %v3040_v18  ;;  %v3044_v7 = vpop.eup %3043 }
 0x3eb   :  { %2500 = vst [vmem:[#allocation15 + $0x70] sm:$0xff] %v2452_v22 }
 0x3ef   :  { %v3046_v38 = vpop.eup %3045 }
 0x3f0   :  { %v2453_v33 = vmul.f32 %v3046_v38, %v3044_v7 }
 0x3f2   :  { %2501 = vst [vmem:[#allocation15 + $0x78] sm:$0xff] %v2453_v33 }
 0x3f3   :  { %3214 = shalt.err (!%p3211_p11)
}
 0x3f4   :  { %2529 = dma.vmem_to_hbm [thread:$0]  %s2524_s11, 2048, %s4282_s6, [#allocation6], %s3240_s1, %s3240_s1, %s3241_s16  }
 0x3f5   :  { %3231 = dma.done.wait [#allocation6], 2048  }
 0x3f6   :  { %3232 = vsyncadd [#allocation6], 4294965248 }
 0x3f7   :  { %3233 = dma.done.wait [#allocation17], 2048  }
 0x3f8   :  { %3234 = vsyncadd [#allocation17], 4294965248 }
 0x3f9   :  { %2548 = vsyncpa [#allocation5], 1 }
 0x3fa   :  { %2549 = vsyncpa [#allocation8], 1 }
 0x3fb   :  { %2550 = vsyncpa [#allocation11], 1 }
 0x3fc   :  { %2551 = vsyncpa [#allocation14], 1 }
 0x3fd   :  { %2552 = vsyncpa [#allocation6], 1 }
 0x3fe   :  { %2553 = vsyncpa [#allocation17], 1 }

</bundles_post_ra>
